<compile_context>
chip_gen: v7x
topology: tpu7x:2x2x1
jax: 0.10.0
libtpu: 0.0.40
codegen_flags: <defaults>
</compile_context>

<pallas_src>
import numpy as np
import jax
import jax.numpy as jnp
from jax.experimental import pallas as pl
from jax.experimental.pallas import tpu as pltpu

CHANNELS = 8          # `channels` ctor argument
L0 = 32               # spatial length: fc expects channels * (L0 // 4) == channels * 8
BN_EPS = 1e-5


# ----------------------------------------------------------------------------
# host-side constant construction (built ONCE per weight set)
# ----------------------------------------------------------------------------
def _block_banded(w, L):
    """Conv1d(k=3, padding=1) as a block-banded matrix in the l-major layout.

    w: [3, Ci, Co] (tap k uses input position l + k - 1).
    Returns Wb with Wb[(l+k-1)*Ci + c, l*Co + d] = w[k, c, d]."""
    _, ci, co = w.shape
    out = np.zeros((L * ci, L * co), np.float32)
    for l in range(L):
        for k in range(3):
            lp = l + k - 1
            if 0 <= lp < L:
                out[lp * ci:(lp + 1) * ci, l * co:(l + 1) * co] = w[k]
    return out


def _pool_fold(L, C):
    """AvgPool1d(2, 2) in the l-major flat layout: [L*C, (L//2)*C]."""
    P = np.zeros((L * C, (L // 2) * C), np.float32)
    for l in range(L):
        for c in range(C):
            P[l * C + c, (l // 2) * C + c] = 0.5
    return P


def _channel_collapse(L, C):
    """M[l*C + c, c] = 1  (per-channel reduce over spatial positions)."""
    M = np.zeros((L * C, C), np.float32)
    for l in range(L):
        for c in range(C):
            M[l * C + c, c] = 1.0
    return M


def prepare_constants(params, c=CHANNELS, L=L0):
    w0 = np.asarray(params["w0"], np.float32)          # [3, 3, c]
    wr = np.asarray(params["wr"], np.float32)          # [5, 3, c, c]
    wb = [
        _block_banded(w0, L),                                   # [96, 256]
        _block_banded(wr[0], L),                                # [256, 256]
        _block_banded(wr[1], L),                                # [256, 256]
        _pool_fold(L, c) @ _block_banded(wr[2], L // 2),        # pool0 folded -> [256, 128]
        _block_banded(wr[3], L // 2),                           # [128, 128]
        _block_banded(wr[4], L // 2),                           # [128, 128]
    ]
    # Flatten (torch order: c_idx*8 + p) + preceding AvgPool folded into fc1.
    H1 = params["fc1w"].shape[1]
    fc1 = np.asarray(params["fc1w"], np.float32)                # [c*8, H1]
    fc1_perm = fc1.reshape(c, L // 4, H1).transpose(1, 0, 2).reshape(c * (L // 4), H1)
    fc1_eff = _pool_fold(L // 2, c) @ fc1_perm                  # [128, H1]
    # Lane-dense fc2: pad the 10-wide output to 128 lanes (sliced in wrapper).
    fc2_pad = np.zeros((H1, 128), np.float32)
    fc2_pad[:, :10] = np.asarray(params["fc2w"], np.float32)
    fc2b_pad = np.zeros((1, 128), np.float32)
    fc2b_pad[:, :10] = np.asarray(params["fc2b"], np.float32)

    cA = _channel_collapse(L, c)          # [256, c]
    cB = _channel_collapse(L // 2, c)     # [128, c]
    return dict(
        wb=[jnp.asarray(w, jnp.bfloat16) for w in wb],
        cmapA=jnp.asarray(cA), cmapAT=jnp.asarray(cA.T),
        cmapB=jnp.asarray(cB), cmapBT=jnp.asarray(cB.T),
        gamma=jnp.asarray(params["gamma"], jnp.float32),
        beta=jnp.asarray(params["beta"], jnp.float32),
        fc1w=jnp.asarray(fc1_eff, jnp.bfloat16),
        fc1b=jnp.asarray(params["fc1b"], jnp.float32),
        fc2w=jnp.asarray(fc2_pad, jnp.bfloat16),
        fc2b=jnp.asarray(fc2b_pad, jnp.float32),
    )


# ----------------------------------------------------------------------------
# Pallas kernel: whole forward pass, everything VMEM resident, linear in N
# ----------------------------------------------------------------------------
def cifar10net_kernel(x_ref,
                      wb1_ref, wb2_ref, wb3_ref, wb4_ref, wb5_ref, wb6_ref,
                      cmapA_ref, cmapAT_ref, cmapB_ref, cmapBT_ref,
                      gamma_ref, beta_ref,
                      fc1w_ref, fc1b_ref, fc2w_ref, fc2b_ref,
                      out_ref):
    n_rows = x_ref.shape[0]

    def mm(a, b):
        # bf16 x bf16 -> f32 accumulation on the MXU
        return jnp.dot(a, b, preferred_element_type=jnp.float32)

    def mm_exact(a, b):
        # tiny f32 stat / broadcast matmuls (K <= 256, M = 1): keep exact
        return jnp.dot(a, b, preferred_element_type=jnp.float32,
                       precision=jax.lax.Precision.HIGHEST)

    def conv_bn_relu(h, wb_ref, cmap_ref, cmapT_ref, layer):
        # h: [N, K] bf16 ; wb: [K, L*C] bf16 ; returns bf16 [N, L*C]
        y = mm(h, wb_ref[...])                                   # f32 [N, L*C]
        cmap = cmap_ref[...]                                     # [L*C, C] f32 (0/1)
        L_here = cmap.shape[0] // cmap.shape[1]
        inv_count = 1.0 / float(n_rows * L_here)
        # One-pass BN stats (training mode, biased variance): E[y], E[y^2].
        s1 = mm_exact(jnp.sum(y, axis=0, keepdims=True), cmap)   # [1, C]
        s2 = mm_exact(jnp.sum(y * y, axis=0, keepdims=True), cmap)
        mean = s1 * inv_count
        var = s2 * inv_count - mean * mean
        scale = gamma_ref[layer:layer + 1] * jax.lax.rsqrt(var + BN_EPS)   # [1, C]
        shift = beta_ref[layer:layer + 1] - mean * scale
        # broadcast per-channel scale/shift back onto the [1, L*C] lane layout
        scale_f = mm_exact(scale, cmapT_ref[...])
        shift_f = mm_exact(shift, cmapT_ref[...])
        return jnp.maximum(y * scale_f + shift_f, 0.0).astype(jnp.bfloat16)

    h = x_ref[...]                                               # bf16 [N, 96]
    h = conv_bn_relu(h, wb1_ref, cmapA_ref, cmapAT_ref, 0)       # [N, 256]
    h = conv_bn_relu(h, wb2_ref, cmapA_ref, cmapAT_ref, 1)
    h = conv_bn_relu(h, wb3_ref, cmapA_ref, cmapAT_ref, 2)
    # AvgPool1d(2,2) #1 is folded into wb4 (host side)
    h = conv_bn_relu(h, wb4_ref, cmapB_ref, cmapBT_ref, 3)       # [N, 128]
    h = conv_bn_relu(h, wb5_ref, cmapB_ref, cmapBT_ref, 4)
    h = conv_bn_relu(h, wb6_ref, cmapB_ref, cmapBT_ref, 5)
    # AvgPool1d(2,2) #2 + torch Flatten are folded into fc1w (host side)
    h1 = jnp.maximum(mm(h, fc1w_ref[...]) + fc1b_ref[...], 0.0)  # [N, H1] f32
    out_ref[...] = mm(h1.astype(jnp.bfloat16), fc2w_ref[...]) + fc2b_ref[...]


# ----------------------------------------------------------------------------
# parameters (deterministic, in-script; shapes from CIFAR10Net.__init__)
# ----------------------------------------------------------------------------
def init_params(key, c):
    ks = jax.random.split(key, 6)
    return {
        # conv weights stored as (tap, Cin, Cout) = torch weight transposed (2,1,0)
        "w0": jax.random.normal(ks[0], (3, 3, c), jnp.float32) * 0.3,
        "wr": jax.random.normal(ks[1], (5, 3, c, c), jnp.float32) * 0.2,
        "gamma": jnp.ones((6, c), jnp.float32),    # BatchNorm weight (PyTorch default)
        "beta": jnp.zeros((6, c), jnp.float32),    # BatchNorm bias  (PyTorch default)
        "fc1w": jax.random.normal(ks[2], (c * 8, c * 8 // 4), jnp.float32) * 0.1,
        "fc1b": jax.random.normal(ks[3], (1, c * 8 // 4), jnp.float32) * 0.1,
        "fc2w": jax.random.normal(ks[4], (c * 8 // 4, 10), jnp.float32) * 0.1,
        "fc2b": jax.random.normal(ks[5], (1, 10), jnp.float32) * 0.1,
    }


# ----------------------------------------------------------------------------
# wrapper (jitted; constants prepared once outside)
# ----------------------------------------------------------------------------
def cifar10net_forward(x, consts):
    B, Cin, L, T = x.shape
    N = T * B
    # PyTorch: permute(3,0,1,2).flatten(0,1) -> [N, 3, L]; then lane-dense [N, L*3]
    x_ncl = jnp.transpose(x, (3, 0, 1, 2)).reshape(N, Cin, L)
    x2d = jnp.transpose(x_ncl, (0, 2, 1)).reshape(N, L * Cin).astype(jnp.bfloat16)

    args = (x2d, *consts["wb"],
            consts["cmapA"], consts["cmapAT"], consts["cmapB"], consts["cmapBT"],
            consts["gamma"], consts["beta"],
            consts["fc1w"], consts["fc1b"], consts["fc2w"], consts["fc2b"])

    out_pad = pl.pallas_call(
        cifar10net_kernel,
        out_shape=jax.ShapeDtypeStruct((N, 128), jnp.float32),
        in_specs=[pl.BlockSpec(memory_space=pltpu.MemorySpace.VMEM) for _ in args],
        out_specs=pl.BlockSpec(memory_space=pltpu.MemorySpace.VMEM),
        compiler_params=pltpu.CompilerParams(vmem_limit_bytes=48 * 1024 * 1024),
    )(*args)
    return out_pad[:, :10]


# ----------------------------------------------------------------------------
# pure-JAX f32 reference (mirrors the PyTorch forward directly)
# ----------------------------------------------------------------------------
def reference_forward(x, params):
    B, Cin, L, T = x.shape
    N = T * B
    c = CHANNELS
    hi = jax.lax.Precision.HIGHEST
    h = jnp.transpose(x, (3, 0, 1, 2)).reshape(N, Cin, L)   # [N, C, L]

    def conv_bn_relu(h, w, g, b):
        Lc = h.shape[2]
        hp = jnp.pad(h, ((0, 0), (0, 0), (1, 1)))
        y = 0.0
        for k in range(3):
            y = y + jnp.einsum("ncl,cd->ndl", hp[:, :, k:k + Lc], w[k], precision=hi)
        mean = jnp.mean(y, axis=(0, 2), keepdims=True)
        var = jnp.mean(jnp.square(y - mean), axis=(0, 2), keepdims=True)
        y = (y - mean) / jnp.sqrt(var + BN_EPS) * g.reshape(1, -1, 1) + b.reshape(1, -1, 1)
        return jnp.maximum(y, 0.0)

    def pool(h):
        n_, c_, l_ = h.shape
        return h.reshape(n_, c_, l_ // 2, 2).mean(-1)

    w0, wr, gamma, beta = params["w0"], params["wr"], params["gamma"], params["beta"]
    h = conv_bn_relu(h, w0, gamma[0], beta[0])
    h = conv_bn_relu(h, wr[0], gamma[1], beta[1])
    h = conv_bn_relu(h, wr[1], gamma[2], beta[2])
    h = pool(h)
    h = conv_bn_relu(h, wr[2], gamma[3], beta[3])
    h = conv_bn_relu(h, wr[3], gamma[4], beta[4])
    h = conv_bn_relu(h, wr[4], gamma[5], beta[5])
    h = pool(h)
    hf = h.reshape(N, c * 8)                                  # torch Flatten: c-major, l-minor
    h1 = jnp.maximum(jnp.dot(hf, params["fc1w"], precision=hi) + params["fc1b"], 0.0)
    return jnp.dot(h1, params["fc2w"], precision=hi) + params["fc2b"]


if __name__ == "__main__":
    key = jax.random.PRNGKey(0)
    kx, kp = jax.random.split(key)
    B, T = 2, 2
    x = jax.random.normal(kx, (B, 3, L0, T), jnp.float32)     # [B, 3, L, T]
    params = init_params(kp, CHANNELS)
    consts = prepare_constants(params)                        # host-side, once per weight set

    fwd = jax.jit(cifar10net_forward)
    out = jax.block_until_ready(fwd(x, consts))
    ref = reference_forward(x, params)

    assert out.shape == (T * B, 10)
    # bf16 matmul inputs with f32 accumulation -> compare at 2e-2.
    np.testing.assert_allclose(np.asarray(out), np.asarray(ref), rtol=2e-2, atol=2e-2)
    print("KERNEL_OK")
</pallas_src>

<mosaic_0001>
module attributes {stable_mosaic.version = 11 : i64} {
  func.func @cifar10net_kernel(%arg0: memref<4x96xbf16, #tpu.memory_space<vmem>>, %arg1: memref<96x256xbf16, #tpu.memory_space<vmem>>, %arg2: memref<256x256xbf16, #tpu.memory_space<vmem>>, %arg3: memref<256x256xbf16, #tpu.memory_space<vmem>>, %arg4: memref<256x128xbf16, #tpu.memory_space<vmem>>, %arg5: memref<128x128xbf16, #tpu.memory_space<vmem>>, %arg6: memref<128x128xbf16, #tpu.memory_space<vmem>>, %arg7: memref<256x8xf32, #tpu.memory_space<vmem>>, %arg8: memref<8x256xf32, #tpu.memory_space<vmem>>, %arg9: memref<128x8xf32, #tpu.memory_space<vmem>>, %arg10: memref<8x128xf32, #tpu.memory_space<vmem>>, %arg11: memref<6x8xf32, #tpu.memory_space<vmem>>, %arg12: memref<6x8xf32, #tpu.memory_space<vmem>>, %arg13: memref<128x16xbf16, #tpu.memory_space<vmem>>, %arg14: memref<1x16xf32, #tpu.memory_space<vmem>>, %arg15: memref<16x128xbf16, #tpu.memory_space<vmem>>, %arg16: memref<1x128xf32, #tpu.memory_space<vmem>>, %arg17: memref<4x128xf32, #tpu.memory_space<vmem>>) attributes {dimension_semantics = [], scalar_prefetch = 0 : i64, scratch_operands = 0 : i64, tpu.core_type = #tpu.core_type<tc>} {
    %c0 = arith.constant 0 : index
    %c0_0 = arith.constant 0 : index
    %0 = vector.load %arg0[%c0, %c0_0] : memref<4x96xbf16, #tpu.memory_space<vmem>>, vector<4x96xbf16>
    %c0_1 = arith.constant 0 : index
    %c0_2 = arith.constant 0 : index
    %1 = vector.load %arg1[%c0_1, %c0_2] : memref<96x256xbf16, #tpu.memory_space<vmem>>, vector<96x256xbf16>
    %cst = arith.constant dense<0.000000e+00> : vector<4x256xf32>
    %2 = tpu.matmul %0, %1, %cst {dimension_numbers = #tpu.dot_dimension_numbers<[1], [0], [0], [1], [0, 0, 1, 1], [], []>} : vector<4x96xbf16>, vector<96x256xbf16>, vector<4x256xf32> -> vector<4x256xf32>
    %c0_3 = arith.constant 0 : index
    %c0_4 = arith.constant 0 : index
    %3 = vector.load %arg7[%c0_3, %c0_4] : memref<256x8xf32, #tpu.memory_space<vmem>>, vector<256x8xf32>
    %cst_5 = arith.constant dense<0.000000e+00> : vector<256xf32>
    %4 = vector.multi_reduction <add>, %2, %cst_5 [0] : vector<4x256xf32> to vector<256xf32>
    %5 = vector.shape_cast %4 : vector<256xf32> to vector<1x256xf32>
    %cst_6 = arith.constant dense<0.000000e+00> : vector<1x8xf32>
    %6 = tpu.matmul %5, %3, %cst_6 {dimension_numbers = #tpu.dot_dimension_numbers<[1], [0], [0], [1], [0, 0, 1, 1], [], []>, precision = #tpu.contract_precision<fp32>} : vector<1x256xf32>, vector<256x8xf32>, vector<1x8xf32> -> vector<1x8xf32>
    %7 = arith.mulf %2, %2 : vector<4x256xf32>
    %cst_7 = arith.constant dense<0.000000e+00> : vector<256xf32>
    %8 = vector.multi_reduction <add>, %7, %cst_7 [0] : vector<4x256xf32> to vector<256xf32>
    %9 = vector.shape_cast %8 : vector<256xf32> to vector<1x256xf32>
    %cst_8 = arith.constant dense<0.000000e+00> : vector<1x8xf32>
    %10 = tpu.matmul %9, %3, %cst_8 {dimension_numbers = #tpu.dot_dimension_numbers<[1], [0], [0], [1], [0, 0, 1, 1], [], []>, precision = #tpu.contract_precision<fp32>} : vector<1x256xf32>, vector<256x8xf32>, vector<1x8xf32> -> vector<1x8xf32>
    %cst_9 = arith.constant 7.812500e-03 : f32
    %11 = vector.broadcast %cst_9 : f32 to vector<1x8xf32>
    %12 = arith.mulf %6, %11 : vector<1x8xf32>
    %cst_10 = arith.constant 7.812500e-03 : f32
    %13 = vector.broadcast %cst_10 : f32 to vector<1x8xf32>
    %14 = arith.mulf %10, %13 : vector<1x8xf32>
    %15 = arith.mulf %12, %12 : vector<1x8xf32>
    %16 = arith.subf %14, %15 : vector<1x8xf32>
    %c0_11 = arith.constant 0 : index
    %c0_12 = arith.constant 0 : index
    %17 = vector.load %arg11[%c0_11, %c0_12] : memref<6x8xf32, #tpu.memory_space<vmem>>, vector<1x8xf32>
    %cst_13 = arith.constant 9.99999974E-6 : f32
    %18 = vector.broadcast %cst_13 : f32 to vector<1x8xf32>
    %19 = arith.addf %16, %18 : vector<1x8xf32>
    %20 = math.rsqrt %19 : vector<1x8xf32>
    %21 = arith.mulf %17, %20 : vector<1x8xf32>
    %c0_14 = arith.constant 0 : index
    %c0_15 = arith.constant 0 : index
    %22 = vector.load %arg12[%c0_14, %c0_15] : memref<6x8xf32, #tpu.memory_space<vmem>>, vector<1x8xf32>
    %23 = arith.mulf %12, %21 : vector<1x8xf32>
    %24 = arith.subf %22, %23 : vector<1x8xf32>
    %c0_16 = arith.constant 0 : index
    %c0_17 = arith.constant 0 : index
    %25 = vector.load %arg8[%c0_16, %c0_17] : memref<8x256xf32, #tpu.memory_space<vmem>>, vector<8x256xf32>
    %cst_18 = arith.constant dense<0.000000e+00> : vector<1x256xf32>
    %26 = tpu.matmul %21, %25, %cst_18 {dimension_numbers = #tpu.dot_dimension_numbers<[1], [0], [0], [1], [0, 0, 1, 1], [], []>, precision = #tpu.contract_precision<fp32>} : vector<1x8xf32>, vector<8x256xf32>, vector<1x256xf32> -> vector<1x256xf32>
    %c0_19 = arith.constant 0 : index
    %c0_20 = arith.constant 0 : index
    %27 = vector.load %arg8[%c0_19, %c0_20] : memref<8x256xf32, #tpu.memory_space<vmem>>, vector<8x256xf32>
    %cst_21 = arith.constant dense<0.000000e+00> : vector<1x256xf32>
    %28 = tpu.matmul %24, %27, %cst_21 {dimension_numbers = #tpu.dot_dimension_numbers<[1], [0], [0], [1], [0, 0, 1, 1], [], []>, precision = #tpu.contract_precision<fp32>} : vector<1x8xf32>, vector<8x256xf32>, vector<1x256xf32> -> vector<1x256xf32>
    %29 = vector.broadcast %26 : vector<1x256xf32> to vector<4x256xf32>
    %30 = arith.mulf %2, %29 : vector<4x256xf32>
    %31 = vector.broadcast %28 : vector<1x256xf32> to vector<4x256xf32>
    %32 = arith.addf %30, %31 : vector<4x256xf32>
    %cst_22 = arith.constant 0.000000e+00 : f32
    %33 = vector.broadcast %cst_22 : f32 to vector<4x256xf32>
    %34 = arith.maximumf %32, %33 : vector<4x256xf32>
    %35 = arith.truncf %34 : vector<4x256xf32> to vector<4x256xbf16>
    %c0_23 = arith.constant 0 : index
    %c0_24 = arith.constant 0 : index
    %36 = vector.load %arg2[%c0_23, %c0_24] : memref<256x256xbf16, #tpu.memory_space<vmem>>, vector<256x256xbf16>
    %cst_25 = arith.constant dense<0.000000e+00> : vector<4x256xf32>
    %37 = tpu.matmul %35, %36, %cst_25 {dimension_numbers = #tpu.dot_dimension_numbers<[1], [0], [0], [1], [0, 0, 1, 1], [], []>} : vector<4x256xbf16>, vector<256x256xbf16>, vector<4x256xf32> -> vector<4x256xf32>
    %c0_26 = arith.constant 0 : index
    %c0_27 = arith.constant 0 : index
    %38 = vector.load %arg7[%c0_26, %c0_27] : memref<256x8xf32, #tpu.memory_space<vmem>>, vector<256x8xf32>
    %cst_28 = arith.constant dense<0.000000e+00> : vector<256xf32>
    %39 = vector.multi_reduction <add>, %37, %cst_28 [0] : vector<4x256xf32> to vector<256xf32>
    %40 = vector.shape_cast %39 : vector<256xf32> to vector<1x256xf32>
    %cst_29 = arith.constant dense<0.000000e+00> : vector<1x8xf32>
    %41 = tpu.matmul %40, %38, %cst_29 {dimension_numbers = #tpu.dot_dimension_numbers<[1], [0], [0], [1], [0, 0, 1, 1], [], []>, precision = #tpu.contract_precision<fp32>} : vector<1x256xf32>, vector<256x8xf32>, vector<1x8xf32> -> vector<1x8xf32>
    %42 = arith.mulf %37, %37 : vector<4x256xf32>
    %cst_30 = arith.constant dense<0.000000e+00> : vector<256xf32>
    %43 = vector.multi_reduction <add>, %42, %cst_30 [0] : vector<4x256xf32> to vector<256xf32>
    %44 = vector.shape_cast %43 : vector<256xf32> to vector<1x256xf32>
    %cst_31 = arith.constant dense<0.000000e+00> : vector<1x8xf32>
    %45 = tpu.matmul %44, %38, %cst_31 {dimension_numbers = #tpu.dot_dimension_numbers<[1], [0], [0], [1], [0, 0, 1, 1], [], []>, precision = #tpu.contract_precision<fp32>} : vector<1x256xf32>, vector<256x8xf32>, vector<1x8xf32> -> vector<1x8xf32>
    %cst_32 = arith.constant 7.812500e-03 : f32
    %46 = vector.broadcast %cst_32 : f32 to vector<1x8xf32>
    %47 = arith.mulf %41, %46 : vector<1x8xf32>
    %cst_33 = arith.constant 7.812500e-03 : f32
    %48 = vector.broadcast %cst_33 : f32 to vector<1x8xf32>
    %49 = arith.mulf %45, %48 : vector<1x8xf32>
    %50 = arith.mulf %47, %47 : vector<1x8xf32>
    %51 = arith.subf %49, %50 : vector<1x8xf32>
    %c1 = arith.constant 1 : index
    %c0_34 = arith.constant 0 : index
    %52 = vector.load %arg11[%c1, %c0_34] : memref<6x8xf32, #tpu.memory_space<vmem>>, vector<1x8xf32>
    %cst_35 = arith.constant 9.99999974E-6 : f32
    %53 = vector.broadcast %cst_35 : f32 to vector<1x8xf32>
    %54 = arith.addf %51, %53 : vector<1x8xf32>
    %55 = math.rsqrt %54 : vector<1x8xf32>
    %56 = arith.mulf %52, %55 : vector<1x8xf32>
    %c1_36 = arith.constant 1 : index
    %c0_37 = arith.constant 0 : index
    %57 = vector.load %arg12[%c1_36, %c0_37] : memref<6x8xf32, #tpu.memory_space<vmem>>, vector<1x8xf32>
    %58 = arith.mulf %47, %56 : vector<1x8xf32>
    %59 = arith.subf %57, %58 : vector<1x8xf32>
    %c0_38 = arith.constant 0 : index
    %c0_39 = arith.constant 0 : index
    %60 = vector.load %arg8[%c0_38, %c0_39] : memref<8x256xf32, #tpu.memory_space<vmem>>, vector<8x256xf32>
    %cst_40 = arith.constant dense<0.000000e+00> : vector<1x256xf32>
    %61 = tpu.matmul %56, %60, %cst_40 {dimension_numbers = #tpu.dot_dimension_numbers<[1], [0], [0], [1], [0, 0, 1, 1], [], []>, precision = #tpu.contract_precision<fp32>} : vector<1x8xf32>, vector<8x256xf32>, vector<1x256xf32> -> vector<1x256xf32>
    %c0_41 = arith.constant 0 : index
    %c0_42 = arith.constant 0 : index
    %62 = vector.load %arg8[%c0_41, %c0_42] : memref<8x256xf32, #tpu.memory_space<vmem>>, vector<8x256xf32>
    %cst_43 = arith.constant dense<0.000000e+00> : vector<1x256xf32>
    %63 = tpu.matmul %59, %62, %cst_43 {dimension_numbers = #tpu.dot_dimension_numbers<[1], [0], [0], [1], [0, 0, 1, 1], [], []>, precision = #tpu.contract_precision<fp32>} : vector<1x8xf32>, vector<8x256xf32>, vector<1x256xf32> -> vector<1x256xf32>
    %64 = vector.broadcast %61 : vector<1x256xf32> to vector<4x256xf32>
    %65 = arith.mulf %37, %64 : vector<4x256xf32>
    %66 = vector.broadcast %63 : vector<1x256xf32> to vector<4x256xf32>
    %67 = arith.addf %65, %66 : vector<4x256xf32>
    %cst_44 = arith.constant 0.000000e+00 : f32
    %68 = vector.broadcast %cst_44 : f32 to vector<4x256xf32>
    %69 = arith.maximumf %67, %68 : vector<4x256xf32>
    %70 = arith.truncf %69 : vector<4x256xf32> to vector<4x256xbf16>
    %c0_45 = arith.constant 0 : index
    %c0_46 = arith.constant 0 : index
    %71 = vector.load %arg3[%c0_45, %c0_46] : memref<256x256xbf16, #tpu.memory_space<vmem>>, vector<256x256xbf16>
    %cst_47 = arith.constant dense<0.000000e+00> : vector<4x256xf32>
    %72 = tpu.matmul %70, %71, %cst_47 {dimension_numbers = #tpu.dot_dimension_numbers<[1], [0], [0], [1], [0, 0, 1, 1], [], []>} : vector<4x256xbf16>, vector<256x256xbf16>, vector<4x256xf32> -> vector<4x256xf32>
    %c0_48 = arith.constant 0 : index
    %c0_49 = arith.constant 0 : index
    %73 = vector.load %arg7[%c0_48, %c0_49] : memref<256x8xf32, #tpu.memory_space<vmem>>, vector<256x8xf32>
    %cst_50 = arith.constant dense<0.000000e+00> : vector<256xf32>
    %74 = vector.multi_reduction <add>, %72, %cst_50 [0] : vector<4x256xf32> to vector<256xf32>
    %75 = vector.shape_cast %74 : vector<256xf32> to vector<1x256xf32>
    %cst_51 = arith.constant dense<0.000000e+00> : vector<1x8xf32>
    %76 = tpu.matmul %75, %73, %cst_51 {dimension_numbers = #tpu.dot_dimension_numbers<[1], [0], [0], [1], [0, 0, 1, 1], [], []>, precision = #tpu.contract_precision<fp32>} : vector<1x256xf32>, vector<256x8xf32>, vector<1x8xf32> -> vector<1x8xf32>
    %77 = arith.mulf %72, %72 : vector<4x256xf32>
    %cst_52 = arith.constant dense<0.000000e+00> : vector<256xf32>
    %78 = vector.multi_reduction <add>, %77, %cst_52 [0] : vector<4x256xf32> to vector<256xf32>
    %79 = vector.shape_cast %78 : vector<256xf32> to vector<1x256xf32>
    %cst_53 = arith.constant dense<0.000000e+00> : vector<1x8xf32>
    %80 = tpu.matmul %79, %73, %cst_53 {dimension_numbers = #tpu.dot_dimension_numbers<[1], [0], [0], [1], [0, 0, 1, 1], [], []>, precision = #tpu.contract_precision<fp32>} : vector<1x256xf32>, vector<256x8xf32>, vector<1x8xf32> -> vector<1x8xf32>
    %cst_54 = arith.constant 7.812500e-03 : f32
    %81 = vector.broadcast %cst_54 : f32 to vector<1x8xf32>
    %82 = arith.mulf %76, %81 : vector<1x8xf32>
    %cst_55 = arith.constant 7.812500e-03 : f32
    %83 = vector.broadcast %cst_55 : f32 to vector<1x8xf32>
    %84 = arith.mulf %80, %83 : vector<1x8xf32>
    %85 = arith.mulf %82, %82 : vector<1x8xf32>
    %86 = arith.subf %84, %85 : vector<1x8xf32>
    %c2 = arith.constant 2 : index
    %c0_56 = arith.constant 0 : index
    %87 = vector.load %arg11[%c2, %c0_56] : memref<6x8xf32, #tpu.memory_space<vmem>>, vector<1x8xf32>
    %cst_57 = arith.constant 9.99999974E-6 : f32
    %88 = vector.broadcast %cst_57 : f32 to vector<1x8xf32>
    %89 = arith.addf %86, %88 : vector<1x8xf32>
    %90 = math.rsqrt %89 : vector<1x8xf32>
    %91 = arith.mulf %87, %90 : vector<1x8xf32>
    %c2_58 = arith.constant 2 : index
    %c0_59 = arith.constant 0 : index
    %92 = vector.load %arg12[%c2_58, %c0_59] : memref<6x8xf32, #tpu.memory_space<vmem>>, vector<1x8xf32>
    %93 = arith.mulf %82, %91 : vector<1x8xf32>
    %94 = arith.subf %92, %93 : vector<1x8xf32>
    %c0_60 = arith.constant 0 : index
    %c0_61 = arith.constant 0 : index
    %95 = vector.load %arg8[%c0_60, %c0_61] : memref<8x256xf32, #tpu.memory_space<vmem>>, vector<8x256xf32>
    %cst_62 = arith.constant dense<0.000000e+00> : vector<1x256xf32>
    %96 = tpu.matmul %91, %95, %cst_62 {dimension_numbers = #tpu.dot_dimension_numbers<[1], [0], [0], [1], [0, 0, 1, 1], [], []>, precision = #tpu.contract_precision<fp32>} : vector<1x8xf32>, vector<8x256xf32>, vector<1x256xf32> -> vector<1x256xf32>
    %c0_63 = arith.constant 0 : index
    %c0_64 = arith.constant 0 : index
    %97 = vector.load %arg8[%c0_63, %c0_64] : memref<8x256xf32, #tpu.memory_space<vmem>>, vector<8x256xf32>
    %cst_65 = arith.constant dense<0.000000e+00> : vector<1x256xf32>
    %98 = tpu.matmul %94, %97, %cst_65 {dimension_numbers = #tpu.dot_dimension_numbers<[1], [0], [0], [1], [0, 0, 1, 1], [], []>, precision = #tpu.contract_precision<fp32>} : vector<1x8xf32>, vector<8x256xf32>, vector<1x256xf32> -> vector<1x256xf32>
    %99 = vector.broadcast %96 : vector<1x256xf32> to vector<4x256xf32>
    %100 = arith.mulf %72, %99 : vector<4x256xf32>
    %101 = vector.broadcast %98 : vector<1x256xf32> to vector<4x256xf32>
    %102 = arith.addf %100, %101 : vector<4x256xf32>
    %cst_66 = arith.constant 0.000000e+00 : f32
    %103 = vector.broadcast %cst_66 : f32 to vector<4x256xf32>
    %104 = arith.maximumf %102, %103 : vector<4x256xf32>
    %105 = arith.truncf %104 : vector<4x256xf32> to vector<4x256xbf16>
    %c0_67 = arith.constant 0 : index
    %c0_68 = arith.constant 0 : index
    %106 = vector.load %arg4[%c0_67, %c0_68] : memref<256x128xbf16, #tpu.memory_space<vmem>>, vector<256x128xbf16>
    %cst_69 = arith.constant dense<0.000000e+00> : vector<4x128xf32>
    %107 = tpu.matmul %105, %106, %cst_69 {dimension_numbers = #tpu.dot_dimension_numbers<[1], [0], [0], [1], [0, 0, 1, 1], [], []>} : vector<4x256xbf16>, vector<256x128xbf16>, vector<4x128xf32> -> vector<4x128xf32>
    %c0_70 = arith.constant 0 : index
    %c0_71 = arith.constant 0 : index
    %108 = vector.load %arg9[%c0_70, %c0_71] : memref<128x8xf32, #tpu.memory_space<vmem>>, vector<128x8xf32>
    %cst_72 = arith.constant dense<0.000000e+00> : vector<128xf32>
    %109 = vector.multi_reduction <add>, %107, %cst_72 [0] : vector<4x128xf32> to vector<128xf32>
    %110 = vector.shape_cast %109 : vector<128xf32> to vector<1x128xf32>
    %cst_73 = arith.constant dense<0.000000e+00> : vector<1x8xf32>
    %111 = tpu.matmul %110, %108, %cst_73 {dimension_numbers = #tpu.dot_dimension_numbers<[1], [0], [0], [1], [0, 0, 1, 1], [], []>, precision = #tpu.contract_precision<fp32>} : vector<1x128xf32>, vector<128x8xf32>, vector<1x8xf32> -> vector<1x8xf32>
    %112 = arith.mulf %107, %107 : vector<4x128xf32>
    %cst_74 = arith.constant dense<0.000000e+00> : vector<128xf32>
    %113 = vector.multi_reduction <add>, %112, %cst_74 [0] : vector<4x128xf32> to vector<128xf32>
    %114 = vector.shape_cast %113 : vector<128xf32> to vector<1x128xf32>
    %cst_75 = arith.constant dense<0.000000e+00> : vector<1x8xf32>
    %115 = tpu.matmul %114, %108, %cst_75 {dimension_numbers = #tpu.dot_dimension_numbers<[1], [0], [0], [1], [0, 0, 1, 1], [], []>, precision = #tpu.contract_precision<fp32>} : vector<1x128xf32>, vector<128x8xf32>, vector<1x8xf32> -> vector<1x8xf32>
    %cst_76 = arith.constant 1.562500e-02 : f32
    %116 = vector.broadcast %cst_76 : f32 to vector<1x8xf32>
    %117 = arith.mulf %111, %116 : vector<1x8xf32>
    %cst_77 = arith.constant 1.562500e-02 : f32
    %118 = vector.broadcast %cst_77 : f32 to vector<1x8xf32>
    %119 = arith.mulf %115, %118 : vector<1x8xf32>
    %120 = arith.mulf %117, %117 : vector<1x8xf32>
    %121 = arith.subf %119, %120 : vector<1x8xf32>
    %c3 = arith.constant 3 : index
    %c0_78 = arith.constant 0 : index
    %122 = vector.load %arg11[%c3, %c0_78] : memref<6x8xf32, #tpu.memory_space<vmem>>, vector<1x8xf32>
    %cst_79 = arith.constant 9.99999974E-6 : f32
    %123 = vector.broadcast %cst_79 : f32 to vector<1x8xf32>
    %124 = arith.addf %121, %123 : vector<1x8xf32>
    %125 = math.rsqrt %124 : vector<1x8xf32>
    %126 = arith.mulf %122, %125 : vector<1x8xf32>
    %c3_80 = arith.constant 3 : index
    %c0_81 = arith.constant 0 : index
    %127 = vector.load %arg12[%c3_80, %c0_81] : memref<6x8xf32, #tpu.memory_space<vmem>>, vector<1x8xf32>
    %128 = arith.mulf %117, %126 : vector<1x8xf32>
    %129 = arith.subf %127, %128 : vector<1x8xf32>
    %c0_82 = arith.constant 0 : index
    %c0_83 = arith.constant 0 : index
    %130 = vector.load %arg10[%c0_82, %c0_83] : memref<8x128xf32, #tpu.memory_space<vmem>>, vector<8x128xf32>
    %cst_84 = arith.constant dense<0.000000e+00> : vector<1x128xf32>
    %131 = tpu.matmul %126, %130, %cst_84 {dimension_numbers = #tpu.dot_dimension_numbers<[1], [0], [0], [1], [0, 0, 1, 1], [], []>, precision = #tpu.contract_precision<fp32>} : vector<1x8xf32>, vector<8x128xf32>, vector<1x128xf32> -> vector<1x128xf32>
    %c0_85 = arith.constant 0 : index
    %c0_86 = arith.constant 0 : index
    %132 = vector.load %arg10[%c0_85, %c0_86] : memref<8x128xf32, #tpu.memory_space<vmem>>, vector<8x128xf32>
    %cst_87 = arith.constant dense<0.000000e+00> : vector<1x128xf32>
    %133 = tpu.matmul %129, %132, %cst_87 {dimension_numbers = #tpu.dot_dimension_numbers<[1], [0], [0], [1], [0, 0, 1, 1], [], []>, precision = #tpu.contract_precision<fp32>} : vector<1x8xf32>, vector<8x128xf32>, vector<1x128xf32> -> vector<1x128xf32>
    %134 = vector.broadcast %131 : vector<1x128xf32> to vector<4x128xf32>
    %135 = arith.mulf %107, %134 : vector<4x128xf32>
    %136 = vector.broadcast %133 : vector<1x128xf32> to vector<4x128xf32>
    %137 = arith.addf %135, %136 : vector<4x128xf32>
    %cst_88 = arith.constant 0.000000e+00 : f32
    %138 = vector.broadcast %cst_88 : f32 to vector<4x128xf32>
    %139 = arith.maximumf %137, %138 : vector<4x128xf32>
    %140 = arith.truncf %139 : vector<4x128xf32> to vector<4x128xbf16>
    %c0_89 = arith.constant 0 : index
    %c0_90 = arith.constant 0 : index
    %141 = vector.load %arg5[%c0_89, %c0_90] : memref<128x128xbf16, #tpu.memory_space<vmem>>, vector<128x128xbf16>
    %cst_91 = arith.constant dense<0.000000e+00> : vector<4x128xf32>
    %142 = tpu.matmul %140, %141, %cst_91 {dimension_numbers = #tpu.dot_dimension_numbers<[1], [0], [0], [1], [0, 0, 1, 1], [], []>} : vector<4x128xbf16>, vector<128x128xbf16>, vector<4x128xf32> -> vector<4x128xf32>
    %c0_92 = arith.constant 0 : index
    %c0_93 = arith.constant 0 : index
    %143 = vector.load %arg9[%c0_92, %c0_93] : memref<128x8xf32, #tpu.memory_space<vmem>>, vector<128x8xf32>
    %cst_94 = arith.constant dense<0.000000e+00> : vector<128xf32>
    %144 = vector.multi_reduction <add>, %142, %cst_94 [0] : vector<4x128xf32> to vector<128xf32>
    %145 = vector.shape_cast %144 : vector<128xf32> to vector<1x128xf32>
    %cst_95 = arith.constant dense<0.000000e+00> : vector<1x8xf32>
    %146 = tpu.matmul %145, %143, %cst_95 {dimension_numbers = #tpu.dot_dimension_numbers<[1], [0], [0], [1], [0, 0, 1, 1], [], []>, precision = #tpu.contract_precision<fp32>} : vector<1x128xf32>, vector<128x8xf32>, vector<1x8xf32> -> vector<1x8xf32>
    %147 = arith.mulf %142, %142 : vector<4x128xf32>
    %cst_96 = arith.constant dense<0.000000e+00> : vector<128xf32>
    %148 = vector.multi_reduction <add>, %147, %cst_96 [0] : vector<4x128xf32> to vector<128xf32>
    %149 = vector.shape_cast %148 : vector<128xf32> to vector<1x128xf32>
    %cst_97 = arith.constant dense<0.000000e+00> : vector<1x8xf32>
    %150 = tpu.matmul %149, %143, %cst_97 {dimension_numbers = #tpu.dot_dimension_numbers<[1], [0], [0], [1], [0, 0, 1, 1], [], []>, precision = #tpu.contract_precision<fp32>} : vector<1x128xf32>, vector<128x8xf32>, vector<1x8xf32> -> vector<1x8xf32>
    %cst_98 = arith.constant 1.562500e-02 : f32
    %151 = vector.broadcast %cst_98 : f32 to vector<1x8xf32>
    %152 = arith.mulf %146, %151 : vector<1x8xf32>
    %cst_99 = arith.constant 1.562500e-02 : f32
    %153 = vector.broadcast %cst_99 : f32 to vector<1x8xf32>
    %154 = arith.mulf %150, %153 : vector<1x8xf32>
    %155 = arith.mulf %152, %152 : vector<1x8xf32>
    %156 = arith.subf %154, %155 : vector<1x8xf32>
    %c4 = arith.constant 4 : index
    %c0_100 = arith.constant 0 : index
    %157 = vector.load %arg11[%c4, %c0_100] : memref<6x8xf32, #tpu.memory_space<vmem>>, vector<1x8xf32>
    %cst_101 = arith.constant 9.99999974E-6 : f32
    %158 = vector.broadcast %cst_101 : f32 to vector<1x8xf32>
    %159 = arith.addf %156, %158 : vector<1x8xf32>
    %160 = math.rsqrt %159 : vector<1x8xf32>
    %161 = arith.mulf %157, %160 : vector<1x8xf32>
    %c4_102 = arith.constant 4 : index
    %c0_103 = arith.constant 0 : index
    %162 = vector.load %arg12[%c4_102, %c0_103] : memref<6x8xf32, #tpu.memory_space<vmem>>, vector<1x8xf32>
    %163 = arith.mulf %152, %161 : vector<1x8xf32>
    %164 = arith.subf %162, %163 : vector<1x8xf32>
    %c0_104 = arith.constant 0 : index
    %c0_105 = arith.constant 0 : index
    %165 = vector.load %arg10[%c0_104, %c0_105] : memref<8x128xf32, #tpu.memory_space<vmem>>, vector<8x128xf32>
    %cst_106 = arith.constant dense<0.000000e+00> : vector<1x128xf32>
    %166 = tpu.matmul %161, %165, %cst_106 {dimension_numbers = #tpu.dot_dimension_numbers<[1], [0], [0], [1], [0, 0, 1, 1], [], []>, precision = #tpu.contract_precision<fp32>} : vector<1x8xf32>, vector<8x128xf32>, vector<1x128xf32> -> vector<1x128xf32>
    %c0_107 = arith.constant 0 : index
    %c0_108 = arith.constant 0 : index
    %167 = vector.load %arg10[%c0_107, %c0_108] : memref<8x128xf32, #tpu.memory_space<vmem>>, vector<8x128xf32>
    %cst_109 = arith.constant dense<0.000000e+00> : vector<1x128xf32>
    %168 = tpu.matmul %164, %167, %cst_109 {dimension_numbers = #tpu.dot_dimension_numbers<[1], [0], [0], [1], [0, 0, 1, 1], [], []>, precision = #tpu.contract_precision<fp32>} : vector<1x8xf32>, vector<8x128xf32>, vector<1x128xf32> -> vector<1x128xf32>
    %169 = vector.broadcast %166 : vector<1x128xf32> to vector<4x128xf32>
    %170 = arith.mulf %142, %169 : vector<4x128xf32>
    %171 = vector.broadcast %168 : vector<1x128xf32> to vector<4x128xf32>
    %172 = arith.addf %170, %171 : vector<4x128xf32>
    %cst_110 = arith.constant 0.000000e+00 : f32
    %173 = vector.broadcast %cst_110 : f32 to vector<4x128xf32>
    %174 = arith.maximumf %172, %173 : vector<4x128xf32>
    %175 = arith.truncf %174 : vector<4x128xf32> to vector<4x128xbf16>
    %c0_111 = arith.constant 0 : index
    %c0_112 = arith.constant 0 : index
    %176 = vector.load %arg6[%c0_111, %c0_112] : memref<128x128xbf16, #tpu.memory_space<vmem>>, vector<128x128xbf16>
    %cst_113 = arith.constant dense<0.000000e+00> : vector<4x128xf32>
    %177 = tpu.matmul %175, %176, %cst_113 {dimension_numbers = #tpu.dot_dimension_numbers<[1], [0], [0], [1], [0, 0, 1, 1], [], []>} : vector<4x128xbf16>, vector<128x128xbf16>, vector<4x128xf32> -> vector<4x128xf32>
    %c0_114 = arith.constant 0 : index
    %c0_115 = arith.constant 0 : index
    %178 = vector.load %arg9[%c0_114, %c0_115] : memref<128x8xf32, #tpu.memory_space<vmem>>, vector<128x8xf32>
    %cst_116 = arith.constant dense<0.000000e+00> : vector<128xf32>
    %179 = vector.multi_reduction <add>, %177, %cst_116 [0] : vector<4x128xf32> to vector<128xf32>
    %180 = vector.shape_cast %179 : vector<128xf32> to vector<1x128xf32>
    %cst_117 = arith.constant dense<0.000000e+00> : vector<1x8xf32>
    %181 = tpu.matmul %180, %178, %cst_117 {dimension_numbers = #tpu.dot_dimension_numbers<[1], [0], [0], [1], [0, 0, 1, 1], [], []>, precision = #tpu.contract_precision<fp32>} : vector<1x128xf32>, vector<128x8xf32>, vector<1x8xf32> -> vector<1x8xf32>
    %182 = arith.mulf %177, %177 : vector<4x128xf32>
    %cst_118 = arith.constant dense<0.000000e+00> : vector<128xf32>
    %183 = vector.multi_reduction <add>, %182, %cst_118 [0] : vector<4x128xf32> to vector<128xf32>
    %184 = vector.shape_cast %183 : vector<128xf32> to vector<1x128xf32>
    %cst_119 = arith.constant dense<0.000000e+00> : vector<1x8xf32>
    %185 = tpu.matmul %184, %178, %cst_119 {dimension_numbers = #tpu.dot_dimension_numbers<[1], [0], [0], [1], [0, 0, 1, 1], [], []>, precision = #tpu.contract_precision<fp32>} : vector<1x128xf32>, vector<128x8xf32>, vector<1x8xf32> -> vector<1x8xf32>
    %cst_120 = arith.constant 1.562500e-02 : f32
    %186 = vector.broadcast %cst_120 : f32 to vector<1x8xf32>
    %187 = arith.mulf %181, %186 : vector<1x8xf32>
    %cst_121 = arith.constant 1.562500e-02 : f32
    %188 = vector.broadcast %cst_121 : f32 to vector<1x8xf32>
    %189 = arith.mulf %185, %188 : vector<1x8xf32>
    %190 = arith.mulf %187, %187 : vector<1x8xf32>
    %191 = arith.subf %189, %190 : vector<1x8xf32>
    %c5 = arith.constant 5 : index
    %c0_122 = arith.constant 0 : index
    %192 = vector.load %arg11[%c5, %c0_122] : memref<6x8xf32, #tpu.memory_space<vmem>>, vector<1x8xf32>
    %cst_123 = arith.constant 9.99999974E-6 : f32
    %193 = vector.broadcast %cst_123 : f32 to vector<1x8xf32>
    %194 = arith.addf %191, %193 : vector<1x8xf32>
    %195 = math.rsqrt %194 : vector<1x8xf32>
    %196 = arith.mulf %192, %195 : vector<1x8xf32>
    %c5_124 = arith.constant 5 : index
    %c0_125 = arith.constant 0 : index
    %197 = vector.load %arg12[%c5_124, %c0_125] : memref<6x8xf32, #tpu.memory_space<vmem>>, vector<1x8xf32>
    %198 = arith.mulf %187, %196 : vector<1x8xf32>
    %199 = arith.subf %197, %198 : vector<1x8xf32>
    %c0_126 = arith.constant 0 : index
    %c0_127 = arith.constant 0 : index
    %200 = vector.load %arg10[%c0_126, %c0_127] : memref<8x128xf32, #tpu.memory_space<vmem>>, vector<8x128xf32>
    %cst_128 = arith.constant dense<0.000000e+00> : vector<1x128xf32>
    %201 = tpu.matmul %196, %200, %cst_128 {dimension_numbers = #tpu.dot_dimension_numbers<[1], [0], [0], [1], [0, 0, 1, 1], [], []>, precision = #tpu.contract_precision<fp32>} : vector<1x8xf32>, vector<8x128xf32>, vector<1x128xf32> -> vector<1x128xf32>
    %c0_129 = arith.constant 0 : index
    %c0_130 = arith.constant 0 : index
    %202 = vector.load %arg10[%c0_129, %c0_130] : memref<8x128xf32, #tpu.memory_space<vmem>>, vector<8x128xf32>
    %cst_131 = arith.constant dense<0.000000e+00> : vector<1x128xf32>
    %203 = tpu.matmul %199, %202, %cst_131 {dimension_numbers = #tpu.dot_dimension_numbers<[1], [0], [0], [1], [0, 0, 1, 1], [], []>, precision = #tpu.contract_precision<fp32>} : vector<1x8xf32>, vector<8x128xf32>, vector<1x128xf32> -> vector<1x128xf32>
    %204 = vector.broadcast %201 : vector<1x128xf32> to vector<4x128xf32>
    %205 = arith.mulf %177, %204 : vector<4x128xf32>
    %206 = vector.broadcast %203 : vector<1x128xf32> to vector<4x128xf32>
    %207 = arith.addf %205, %206 : vector<4x128xf32>
    %cst_132 = arith.constant 0.000000e+00 : f32
    %208 = vector.broadcast %cst_132 : f32 to vector<4x128xf32>
    %209 = arith.maximumf %207, %208 : vector<4x128xf32>
    %210 = arith.truncf %209 : vector<4x128xf32> to vector<4x128xbf16>
    %c0_133 = arith.constant 0 : index
    %c0_134 = arith.constant 0 : index
    %211 = vector.load %arg13[%c0_133, %c0_134] : memref<128x16xbf16, #tpu.memory_space<vmem>>, vector<128x16xbf16>
    %cst_135 = arith.constant dense<0.000000e+00> : vector<4x16xf32>
    %212 = tpu.matmul %210, %211, %cst_135 {dimension_numbers = #tpu.dot_dimension_numbers<[1], [0], [0], [1], [0, 0, 1, 1], [], []>} : vector<4x128xbf16>, vector<128x16xbf16>, vector<4x16xf32> -> vector<4x16xf32>
    %c0_136 = arith.constant 0 : index
    %c0_137 = arith.constant 0 : index
    %213 = vector.load %arg14[%c0_136, %c0_137] : memref<1x16xf32, #tpu.memory_space<vmem>>, vector<1x16xf32>
    %214 = vector.broadcast %213 : vector<1x16xf32> to vector<4x16xf32>
    %215 = arith.addf %212, %214 : vector<4x16xf32>
    %cst_138 = arith.constant 0.000000e+00 : f32
    %216 = vector.broadcast %cst_138 : f32 to vector<4x16xf32>
    %217 = arith.maximumf %215, %216 : vector<4x16xf32>
    %218 = arith.truncf %217 : vector<4x16xf32> to vector<4x16xbf16>
    %c0_139 = arith.constant 0 : index
    %c0_140 = arith.constant 0 : index
    %219 = vector.load %arg15[%c0_139, %c0_140] : memref<16x128xbf16, #tpu.memory_space<vmem>>, vector<16x128xbf16>
    %cst_141 = arith.constant dense<0.000000e+00> : vector<4x128xf32>
    %220 = tpu.matmul %218, %219, %cst_141 {dimension_numbers = #tpu.dot_dimension_numbers<[1], [0], [0], [1], [0, 0, 1, 1], [], []>} : vector<4x16xbf16>, vector<16x128xbf16>, vector<4x128xf32> -> vector<4x128xf32>
    %c0_142 = arith.constant 0 : index
    %c0_143 = arith.constant 0 : index
    %221 = vector.load %arg16[%c0_142, %c0_143] : memref<1x128xf32, #tpu.memory_space<vmem>>, vector<1x128xf32>
    %222 = vector.broadcast %221 : vector<1x128xf32> to vector<4x128xf32>
    %223 = arith.addf %220, %222 : vector<4x128xf32>
    %c0_144 = arith.constant 0 : index
    %c0_145 = arith.constant 0 : index
    %224 = vector.load %arg17[%c0_144, %c0_145] : memref<4x128xf32, #tpu.memory_space<vmem>>, vector<4x128xf32>
    tpu.vector_store %arg17[%c0_144, %c0_145], %223 {strides = array<i32>} : memref<4x128xf32, #tpu.memory_space<vmem>>, vector<4x128xf32>,
    return
  }
}

</mosaic_0001>

<bundles_post_ra>
// kernel: cifar10net_forward.1
= control target key start
LH: loop header
LB: loop body
LE: loop exit
PB: predicated region body
PF: predicated region fallthrough
CT: control target
= control target key end

     0   :  { %s25658_s0 = inlined_call_operand.vmem [shape: bf16[4,96], index: 0, kind: input, shape index: {}]   ;;  %s25659_s1 = inlined_call_operand.hbm [shape: bf16[96,256], index: 1, kind: input, shape index: {}]   ;;  %s25660_s2 = inlined_call_operand.vmem [shape: bf16[256,256], index: 2, kind: input, shape index: {}]   ;;  %s25661_s3 = inlined_call_operand.vmem [shape: bf16[256,256], index: 3, kind: input, shape index: {}]   ;;  %s25662_s4 = inlined_call_operand.vmem [shape: bf16[256,128], index: 4, kind: input, shape index: {}]   ;;  %s25663_s5 = inlined_call_operand.hbm [shape: bf16[128,128], index: 5, kind: input, shape index: {}]   ;;  %s25664_s6 = inlined_call_operand.vmem [shape: bf16[128,128], index: 6, kind: input, shape index: {}]   ;;  %s25665_s7 = inlined_call_operand.vmem [shape: f32[256,8], index: 7, kind: input, shape index: {}]   ;;  %s25666_s8 = inlined_call_operand.hbm [shape: f32[8,256], index: 8, kind: input, shape index: {}]   ;;  %s25667_s9 = inlined_call_operand.vmem [shape: f32[128,8], index: 9, kind: input, shape index: {}]   ;;  %s25668_s10 = inlined_call_operand.hbm [shape: f32[8,128], index: 10, kind: input, shape index: {}]   ;;  %s25669_s11 = inlined_call_operand.hbm [shape: f32[6,8], index: 11, kind: input, shape index: {}]   ;;  %s25670_s12 = inlined_call_operand.hbm [shape: f32[6,8], index: 12, kind: input, shape index: {}]   ;;  %s25671_s13 = inlined_call_operand.vmem [shape: bf16[128,16], index: 13, kind: input, shape index: {}]   ;;  %s25672_s14 = inlined_call_operand.vmem [shape: f32[1,16], index: 14, kind: input, shape index: {}]   ;;  %s25673_s15 = inlined_call_operand.hbm [shape: bf16[16,128], index: 15, kind: input, shape index: {}]   ;;  %s25674_s16 = inlined_call_operand.vmem [shape: f32[1,128], index: 16, kind: input, shape index: {}]   ;;  %s25675_s17 = inlined_call_operand.hbm [shape: f32[4,128], index: 17, kind: output, shape index: {}]  }
   0x1   :  { %25882 = sst [smem:[#allocation63_spill]] %s25658_s0 }
   0x2   :  { %25883 = sst [smem:[#allocation64_spill]] %s25659_s1 }
   0x3   :  { %25884 = sst [smem:[#allocation65_spill]] %s25675_s17 }
   0x4   :  { %22 = vsyncpa [#allocation3], 0 }
   0x5   :  { %23 = vsyncpa [#allocation6], 0 }
   0x6   :  { %24 = vsyncpa [#allocation9], 0 }
   0x7   :  { %25 = vsyncpa [#allocation12], 0 }
   0x8   :  { %26 = vsyncpa [#allocation4], 0  ;;  %s22365_s24 = smov [#allocation5]   ;;  %s22179_s28 = scalar_lea.hbm %s25663_s5, 1024 }
   0x9   :  { %s52_s25 = sshll.u32 %s22365_s24, 4  ;;  %p22180_p0 = scmp.ne.s32.totalorder %s25663_s5, %s22179_s28  ;;  %s53_s25 = int_to_ptr.vmem [resolvable:$true] %s52_s25 }
   0xa   :  { %p22183_p1 = scmp.lt.u32.totalorder %s22179_s28, %s25663_s5 }
   0xc   :  { %p22185_p2 = pnand %p22183_p1, %p22180_p0 }
   0xe   :  { %22188 = shalt.err (!%p22185_p2)
}
   0xf   :  { %s22189_s19 = scalar_lea.vmem %s53_s25, 1024  ;;  %p22194_p4 = scmp.lt.s32.totalorder %s53_s25, %s53_s25 }
  0x10   :  { %p22190_p3 = scmp.ne.s32.totalorder %s53_s25, %s22189_s19  ;;  %p22195_p5 = scmp.lt.s32.totalorder %s22189_s19, %s22189_s19 }
  0x12   :  { %p22196_p6 = por %p22195_p5, %p22194_p4 }
  0x14   :  { %p22197_p7 = pnand %p22196_p6, %p22190_p3 }
  0x16   :  { %22200 = shalt.err (!%p22197_p7)
}
  0x17   :  { %s22366_s1 = smov 64   ;;  %s22367_s20 = smov 4  }
  0x18   :  { %58 = dma.hbm_to_vmem [thread:$0]  %s25663_s5, 1024, %s53_s25, [#allocation6], %s22366_s1, %s22366_s1, %s22367_s20  }
  0x19   :  { %s22368_s23 = smov [#allocation8]   ;;  %s22369_s26 = smov [#allocation11]  }
  0x1a   :  { %s81_s24 = sshll.u32 %s22368_s23, 4  ;;  %s101_s27 = sshll.u32 %s22369_s26, 4  ;;  %s82_s24 = int_to_ptr.vmem [resolvable:$true] %s81_s24  ;;  %s102_s27 = int_to_ptr.vmem [resolvable:$true] %s101_s27 }
  0x1b   :  { %s22201_s0 = scalar_lea.hbm %s25668_s10, 128 }
  0x1c   :  { %p22202_p8 = scmp.ne.s32.totalorder %s25668_s10, %s22201_s0  ;;  %p22205_p9 = scmp.lt.u32.totalorder %s22201_s0, %s25668_s10 }
  0x1e   :  { %p22207_p10 = pnand %p22205_p9, %p22202_p8 }
  0x20   :  { %22210 = shalt.err (!%p22207_p10)
}
  0x21   :  { %s22211_s5 = scalar_lea.vmem %s82_s24, 128  ;;  %p22216_p12 = scmp.lt.s32.totalorder %s82_s24, %s82_s24 }
  0x22   :  { %p22212_p11 = scmp.ne.s32.totalorder %s82_s24, %s22211_s5  ;;  %p22217_p13 = scmp.lt.s32.totalorder %s22211_s5, %s22211_s5 }
  0x24   :  { %p22218_p0 = por %p22217_p13, %p22216_p12 }
  0x26   :  { %p22219_p1 = pnand %p22218_p0, %p22212_p11 }
  0x28   :  { %22222 = shalt.err (!%p22219_p1)
}
  0x29   :  { %84 = dma.hbm_to_vmem [thread:$0]  %s25668_s10, 128, %s82_s24, [#allocation9]  }
  0x2a   :  { %s22223_s26 = scalar_lea.hbm %s25670_s12, 128 }
  0x2b   :  { %p22224_p2 = scmp.ne.s32.totalorder %s25670_s12, %s22223_s26  ;;  %p22227_p3 = scmp.lt.u32.totalorder %s22223_s26, %s25670_s12 }
  0x2d   :  { %p22229_p4 = pnand %p22227_p3, %p22224_p2 }
  0x2f   :  { %22232 = shalt.err (!%p22229_p4)
}
  0x30   :  { %s22233_s30 = scalar_lea.vmem %s102_s27, 128  ;;  %p22238_p6 = scmp.lt.s32.totalorder %s102_s27, %s102_s27 }
  0x31   :  { %p22234_p5 = scmp.ne.s32.totalorder %s102_s27, %s22233_s30  ;;  %p22239_p7 = scmp.lt.s32.totalorder %s22233_s30, %s22233_s30 }
  0x33   :  { %p22240_p8 = por %p22239_p7, %p22238_p6 }
  0x35   :  { %p22241_p9 = pnand %p22240_p8, %p22234_p5 }
  0x37   :  { %22244 = shalt.err (!%p22241_p9)
}
  0x38   :  { %104 = dma.hbm_to_vmem [thread:$0]  %s25670_s12, 128, %s102_s27, [#allocation12]  }
  0x39   :  { %s22370_s18 = smov [#allocation2]   ;;  %s25885_s21 = sld [smem:[#allocation64_spill]] }
  0x3a   :  { %s34_s19 = sshll.u32 %s22370_s18, 4  ;;  %s35_s19 = int_to_ptr.vmem [resolvable:$true] %s34_s19 }
  0x3f   :  { %s22245_s22 = scalar_lea.hbm %s25885_s21, 1536 }
  0x40   :  { %p22246_p10 = scmp.ne.s32.totalorder %s25885_s21, %s22245_s22  ;;  %p22249_p11 = scmp.lt.u32.totalorder %s22245_s22, %s25885_s21 }
  0x42   :  { %p22251_p12 = pnand %p22249_p11, %p22246_p10 }
  0x44   :  { %22254 = shalt.err (!%p22251_p12)
}
  0x45   :  { %s22255_s29 = scalar_lea.vmem %s35_s19, 1536  ;;  %p22260_p0 = scmp.lt.s32.totalorder %s35_s19, %s35_s19 }
  0x46   :  { %p22256_p13 = scmp.ne.s32.totalorder %s35_s19, %s22255_s29  ;;  %p22261_p1 = scmp.lt.s32.totalorder %s22255_s29, %s22255_s29 }
  0x48   :  { %p22262_p2 = por %p22261_p1, %p22260_p0 }
  0x4a   :  { %p22263_p3 = pnand %p22262_p2, %p22256_p13 }
  0x4c   :  { %22266 = shalt.err (!%p22263_p3)
}
  0x4d   :  { %s22371_s12 = smov 128   ;;  %s22372_s27 = smov 8  }
  0x4e   :  { %40 = dma.hbm_to_vmem [thread:$0]  %s25885_s21, 1536, %s35_s19, [#allocation3], %s22371_s12, %s22371_s12, %s22372_s27  }
  0x4f   :  { %s22373_s10 = smov [#allocation7]   ;;  %s22374_s18 = smov [#allocation10]  }
  0x50   :  { %s69_s24 = sshll.u32 %s22373_s10, 4  ;;  %s91_s5 = sshll.u32 %s22374_s18, 4  ;;  %s70_s24 = int_to_ptr.vmem [resolvable:$true] %s69_s24  ;;  %s92_s5 = int_to_ptr.vmem [resolvable:$true] %s91_s5 }
  0x51   :  { %s22267_s23 = scalar_lea.hbm %s25666_s8, 256 }
  0x52   :  { %p22268_p4 = scmp.ne.s32.totalorder %s25666_s8, %s22267_s23  ;;  %p22271_p5 = scmp.lt.u32.totalorder %s22267_s23, %s25666_s8 }
  0x54   :  { %p22273_p6 = pnand %p22271_p5, %p22268_p4 }
  0x56   :  { %22276 = shalt.err (!%p22273_p6)
}
  0x57   :  { %s22277_s19 = scalar_lea.vmem %s70_s24, 256  ;;  %p22282_p8 = scmp.lt.s32.totalorder %s70_s24, %s70_s24 }
  0x58   :  { %p22278_p7 = scmp.ne.s32.totalorder %s70_s24, %s22277_s19  ;;  %p22283_p9 = scmp.lt.s32.totalorder %s22277_s19, %s22277_s19 }
  0x5a   :  { %p22284_p10 = por %p22283_p9, %p22282_p8 }
  0x5c   :  { %p22285_p11 = pnand %p22284_p10, %p22278_p7 }
  0x5e   :  { %22288 = shalt.err (!%p22285_p11)
}
  0x5f   :  { %72 = dma.hbm_to_vmem [thread:$0]  %s25666_s8, 256, %s70_s24, [#allocation6]  }
  0x60   :  { %s22289_s30 = scalar_lea.hbm %s25669_s11, 128 }
  0x61   :  { %p22290_p12 = scmp.ne.s32.totalorder %s25669_s11, %s22289_s30  ;;  %p22293_p13 = scmp.lt.u32.totalorder %s22289_s30, %s25669_s11 }
  0x63   :  { %p22295_p0 = pnand %p22293_p13, %p22290_p12 }
  0x65   :  { %22298 = shalt.err (!%p22295_p0)
}
  0x66   :  { %s22299_s23 = scalar_lea.vmem %s92_s5, 128  ;;  %p22304_p2 = scmp.lt.s32.totalorder %s92_s5, %s92_s5 }
  0x67   :  { %p22300_p1 = scmp.ne.s32.totalorder %s92_s5, %s22299_s23  ;;  %p22305_p3 = scmp.lt.s32.totalorder %s22299_s23, %s22299_s23 }
  0x69   :  { %p22306_p4 = por %p22305_p3, %p22304_p2 }
  0x6b   :  { %p22307_p5 = pnand %p22306_p4, %p22300_p1 }
  0x6d   :  { %22310 = shalt.err (!%p22307_p5)
}
  0x6e   :  { %94 = dma.hbm_to_vmem [thread:$0]  %s25669_s11, 128, %s92_s5, [#allocation9]  }
  0x6f   :  { %s22375_s26 = smov [#allocation13]   ;;  %s22311_s19 = scalar_lea.hbm %s25673_s15, 128 }
  0x70   :  { %s114_s17 = sshll.u32 %s22375_s26, 4  ;;  %p22312_p6 = scmp.ne.s32.totalorder %s25673_s15, %s22311_s19  ;;  %s115_s17 = int_to_ptr.vmem [resolvable:$true] %s114_s17 }
  0x71   :  { %p22315_p7 = scmp.lt.u32.totalorder %s22311_s19, %s25673_s15 }
  0x73   :  { %p22317_p8 = pnand %p22315_p7, %p22312_p6 }
  0x75   :  { %22320 = shalt.err (!%p22317_p8)
}
  0x76   :  { %s22321_s30 = scalar_lea.vmem %s115_s17, 128  ;;  %p22326_p10 = scmp.lt.s32.totalorder %s115_s17, %s115_s17 }
  0x77   :  { %p22322_p9 = scmp.ne.s32.totalorder %s115_s17, %s22321_s30  ;;  %p22327_p11 = scmp.lt.s32.totalorder %s22321_s30, %s22321_s30 }
  0x79   :  { %p22328_p12 = por %p22327_p11, %p22326_p10 }
  0x7b   :  { %p22329_p13 = pnand %p22328_p12, %p22322_p9 }
  0x7d   :  { %22332 = shalt.err (!%p22329_p13)
}
  0x7e   :  { %120 = dma.hbm_to_vmem [thread:$0]  %s25673_s15, 128, %s115_s17, [#allocation12], %s22366_s1, %s22366_s1, %s22367_s20  }
  0x7f   :  { %22355 = dma.done.wait [#allocation3], 1536  }
  0x80   :  { %22356 = vsyncadd [#allocation3], 4294965760 }
  0x81   :  { %22357 = dma.done.wait [#allocation6], 1280  }
  0x82   :  { %22358 = vsyncadd [#allocation6], 4294966016 }
  0x83   :  { %22359 = dma.done.wait [#allocation9], 256  }
  0x84   :  { %22360 = vsyncadd [#allocation9], 4294967040 }
  0x85   :  { %22361 = dma.done.wait [#allocation12], 256  }
  0x86   :  { %22362 = vsyncadd [#allocation12], 4294967040  ;;  %v22376_v0 = vmov 0   ;;  %v22012_v1 = vld [vmem:[#allocation2 + $0x4] ss:$8 sps:$4 sm:$0xff]   ;;  %v281_v14 = vld [vmem:[%s25665_s7 + $0x90] sm:$0xff] }
  0x87   :  { %254 = vmatprep.mubr.bf16.mxu0 %v22376_v0  ;;  %v22014_v2 = vld [vmem:[#allocation2] ss:$8 sps:$4 sm:$0xff]   ;;  %222 = vmatprep.subr.bf16.mxu0 %v22012_v1  ;;  %v22015_v3 = vld [vmem:[#allocation2 + $0x14] ss:$8 sps:$4 sm:$0xff]   ;;  %v22017_v4 = vld [vmem:[#allocation2 + $0x10] ss:$8 sps:$4 sm:$0xff]  }
  0x88   :  { %223 = vmatpush1.bf16.msra.mxu0 %v22014_v2  ;;  %v22018_v5 = vld [vmem:[#allocation2 + $0x24] ss:$8 sps:$4 sm:$0xff]   ;;  %v22020_v6 = vld [vmem:[#allocation2 + $0x20] ss:$8 sps:$4 sm:$0xff]   ;;  %v22021_v7 = vld [vmem:[#allocation2 + $0x34] ss:$8 sps:$4 sm:$0xff]  }
  0x89   :  { %224 = vmatprep.subr.bf16.mxu0 %v22015_v3  ;;  %v279_v8 = vld [vmem:[%s25665_s7 + $0x80] sm:$0xff]  ;;  %v280_v9 = vld [vmem:[%s25665_s7 + $0x88] sm:$0xff]  ;;  %v282_v17 = vld [vmem:[%s25665_s7 + $0x98] sm:$0xff]  ;;  %v365_v18 = vand.u32 4294901760, %v281_v14  ;;  %vm218_vm0 = vcmask 785408   ;;  %s25888_s26 = sld [smem:[#allocation63_spill]] }
  0x8a   :  { %v359_v10 = vand.u32 4294901760, %v279_v8  ;;  %v362_v11 = vand.u32 4294901760, %v280_v9  ;;  %v263_v12 = vld [vmem:[%s25665_s7] sm:$0xff]  ;;  %v264_v13 = vld [vmem:[%s25665_s7 + $0x8] sm:$0xff]  ;;  %v22023_v19 = vld [vmem:[#allocation2 + $0x30] ss:$8 sps:$4 sm:$0xff]  }
  0x8b   :  { %v311_v15 = vand.u32 4294901760, %v263_v12  ;;  %v314_v16 = vand.u32 4294901760, %v264_v13  ;;  %v368_v23 = vand.u32 4294901760, %v282_v17  ;;  %v265_v24 = vld [vmem:[%s25665_s7 + $0x10] sm:$0xff]  ;;  %v22024_v25 = vld [vmem:[#allocation2 + $0x44] ss:$8 sps:$4 sm:$0xff]   ;;  %v22594_v29 = vsub.f32 %v281_v14, %v365_v18 }
  0x8c   :  { %225 = vmatpush1.bf16.msra.mxu0 %v22017_v4  ;;  %v22579_v20 = vpack.c.bf16 %v362_v11, %v359_v10  ;;  %v22581_v21 = vsub.f32 %v279_v8, %v359_v10  ;;  %v22583_v22 = vsub.f32 %v280_v9, %v362_v11  ;;  %v266_v30 = vld [vmem:[%s25665_s7 + $0x18] sm:$0xff]  ;;  %v22026_v31 = vld [vmem:[#allocation2 + $0x40] ss:$8 sps:$4 sm:$0xff]   ;;  %v317_v40 = vand.u32 4294901760, %v265_v24  ;;  %v285_v2 = vld [vmem:[%s25665_s7 + $0xb0] sm:$0xff]  ;;  %s22380_s10 = smov [#allocation14]  }
  0x8d   :  { %226 = vmatprep.subr.bf16.mxu0 %v22018_v5  ;;  %v22588_v26 = vpack.c.bf16 %v314_v16, %v311_v15  ;;  %v22590_v27 = vsub.f32 %v263_v12, %v311_v15  ;;  %v22592_v28 = vsub.f32 %v264_v13, %v314_v16  ;;  %v22601_v34 = vpack.c.bf16 %v368_v23, %v365_v18  ;;  %v22027_v36 = vld [vmem:[#allocation2 + $0x54] ss:$8 sps:$4 sm:$0xff]   ;;  %v283_v41 = vld [vmem:[%s25665_s7 + $0xa0] sm:$0xff]  ;;  %v284_v46 = vld [vmem:[%s25665_s7 + $0xa8] sm:$0xff]  ;;  %s16166_s18 = sshll.u32 %s22380_s10, 4  ;;  %s16167_s18 = int_to_ptr.vmem [resolvable:$true] %s16166_s18 }
  0x8e   :  { %v25696_v32 = vand.u32 4294901760, %v22581_v21  ;;  %v25694_v33 = vand.u32 4294901760, %v22583_v22  ;;  %v22603_v35 = vsub.f32 %v282_v17, %v368_v23  ;;  %19801 = vmatprep.subr.bf16.mxu1 %v22579_v20  ;;  %v25689_v39 = vand.u32 4294901760, %v22594_v29  ;;  %v267_v47 = vld [vmem:[%s25665_s7 + $0x20] sm:$0xff]  ;;  %v268_v52 = vld [vmem:[%s25665_s7 + $0x28] sm:$0xff]  ;;  %v286_v3 = vld [vmem:[%s25665_s7 + $0xb8] sm:$0xff]  ;;  %p22338_p1 = scmp.lt.s32.totalorder %s16167_s18, %s16167_s18 }
  0x8f   :  { %v25693_v37 = vand.u32 4294901760, %v22590_v27  ;;  %v25690_v38 = vand.u32 4294901760, %v22592_v28  ;;  %19803 = vmatpush3.bf16.msra.mxu1 %v22588_v26  ;;  %v320_v45 = vand.u32 4294901760, %v266_v30  ;;  %v22636_v51 = vsub.f32 %v265_v24, %v317_v40  ;;  %v22029_v53 = vld [vmem:[#allocation2 + $0x50] ss:$8 sps:$4 sm:$0xff]  }
  0x90   :  { %227 = vmatpush1.bf16.msra.mxu0 %v22020_v6  ;;  %v538_v42 = vsub.f32 %v22581_v21, %v25696_v32  ;;  %v545_v43 = vsub.f32 %v22583_v22, %v25694_v33  ;;  %v25688_v44 = vand.u32 4294901760, %v22603_v35  ;;  %19805 = vmatprep.subr.bf16.mxu1 %v22601_v34  ;;  %v552_v50 = vsub.f32 %v22594_v29, %v25689_v39  ;;  %v269_v8 = vld [vmem:[%s25665_s7 + $0x30] sm:$0xff]  ;;  %v145_v9 = vld [vmem:[%s25888_s26] sm:$0x3] }
  0x91   :  { %228 = vmatprep.subr.bf16.mxu0 %v22021_v7  ;;  %v426_v48 = vsub.f32 %v22590_v27, %v25693_v37  ;;  %v433_v49 = vsub.f32 %v22592_v28, %v25690_v38  ;;  %v22644_v57 = vpack.c.bf16 %v320_v45, %v317_v40  ;;  %v25687_v61 = vand.u32 4294901760, %v22636_v51  ;;  %v22864_v33 = vld [vmem:[%s25665_s7 + $0xe0] sm:$0xff] }
  0x92   :  { %v539_v54 = vand.u32 4294901760, %v538_v42  ;;  %v546_v55 = vand.u32 4294901760, %v545_v43  ;;  %v559_v56 = vsub.f32 %v22603_v35, %v25688_v44  ;;  %v553_v60 = vand.u32 4294901760, %v552_v50 }
  0x93   :  { %v427_v58 = vand.u32 4294901760, %v426_v48  ;;  %v434_v59 = vand.u32 4294901760, %v433_v49  ;;  %v22649_v0 = vsub.f32 %v266_v30, %v320_v45  ;;  %v371_v1 = vand.u32 4294901760, %v283_v41  ;;  %19807 = vmatpush3.bf16.msra.mxu1 %v22644_v57 }
  0x94   :  { %229 = vmatpush1.bf16.msra.mxu0 %v22023_v19  ;;  %v22647_v62 = vpack.c.bf16 %v546_v55, %v539_v54  ;;  %v560_v63 = vand.u32 4294901760, %v559_v56  ;;  %v440_v5 = vsub.f32 %v22636_v51, %v25687_v61  ;;  %v374_v6 = vand.u32 4294901760, %v284_v46 }
  0x95   :  { %230 = vmatprep.subr.bf16.mxu0 %v22024_v25  ;;  %v22658_v4 = vpack.c.bf16 %v434_v59, %v427_v58  ;;  %v323_v7 = vand.u32 4294901760, %v267_v47  ;;  %v25686_v11 = vand.u32 4294901760, %v22649_v0  ;;  %v22672_v12 = vsub.f32 %v283_v41, %v371_v1  ;;  %v270_v25 = vld [vmem:[%s25665_s7 + $0x38] sm:$0xff] }
  0x96   :  { %25886 = vst [vmem:[#allocation20_spill] sm:$0xff] %v22647_v62  ;;  %v22669_v10 = vpack.c.bf16 %v560_v63, %v553_v60  ;;  %v326_v13 = vand.u32 4294901760, %v268_v52  ;;  %v441_v14 = vand.u32 4294901760, %v440_v5  ;;  %v22674_v15 = vpack.c.bf16 %v374_v6, %v371_v1 }
  0x97   :  { %25887 = vst [vmem:[#allocation21_spill] sm:$0xff] %v22658_v4  ;;  %v22676_v16 = vsub.f32 %v284_v46, %v374_v6  ;;  %v22678_v17 = vsub.f32 %v267_v47, %v323_v7  ;;  %v447_v18 = vsub.f32 %v22649_v0, %v25686_v11  ;;  %v25685_v19 = vand.u32 4294901760, %v22672_v12 }
  0x98   :  { %231 = vmatpush1.bf16.msra.mxu0 %v22026_v31  ;;  %25889 = vst [vmem:[#allocation22_spill] sm:$0xff] %v22669_v10  ;;  %v22684_v23 = vpack.c.bf16 %v326_v13, %v323_v7  ;;  %v22686_v24 = vsub.f32 %v268_v52, %v326_v13  ;;  %v380_v40 = vand.u32 4294901760, %v286_v3  ;;  %19809 = vmatprep.subr.bf16.mxu1 %v22674_v15  ;;  %v329_v45 = vand.u32 4294901760, %v269_v8 }
  0x99   :  { %232 = vmatprep.subr.bf16.mxu0 %v22027_v36  ;;  %v25684_v30 = vand.u32 4294901760, %v22676_v16  ;;  %v25683_v31 = vand.u32 4294901760, %v22678_v17  ;;  %v377_v36 = vand.u32 4294901760, %v285_v2  ;;  %v448_v41 = vand.u32 4294901760, %v447_v18 }
  0x9a   :  { %25890 = vst [vmem:[#allocation23_spill] sm:$0xff] %v22686_v24  ;;  %v566_v42 = vsub.f32 %v22672_v12, %v25685_v19  ;;  %v25682_v43 = vand.u32 4294901760, %v22686_v24  ;;  %19811 = vmatpush3.bf16.msra.mxu1 %v22684_v23  ;;  %v22717_v54 = vsub.f32 %v286_v3, %v380_v40  ;;  %v332_v59 = vand.u32 4294901760, %v270_v25 }
  0x9b   :  { %v573_v46 = vsub.f32 %v22676_v16, %v25684_v30  ;;  %v454_v47 = vsub.f32 %v22678_v17, %v25683_v31  ;;  %v22707_v48 = vpack.c.bf16 %v380_v40, %v377_v36  ;;  %v22709_v49 = vsub.f32 %v285_v2, %v377_v36 }
  0x9c   :  { %233 = vmatpush1.bf16.msra.mxu0 %v22029_v53  ;;  %v22712_v50 = vpack.c.bf16 %v448_v41, %v441_v14  ;;  %v567_v52 = vand.u32 4294901760, %v566_v42  ;;  %v461_v53 = vsub.f32 %v22686_v24, %v25682_v43  ;;  %25893 = vst [vmem:[#allocation26_spill] sm:$0xff] %v22717_v54  ;;  %v25680_v63 = vand.u32 4294901760, %v22717_v54 }
  0x9d   :  { %19833 = vmatprep.subr.bf16.mxu0 %v22647_v62  ;;  %25891 = vst [vmem:[#allocation24_spill] sm:$0xff] %v22709_v49  ;;  %v574_v55 = vand.u32 4294901760, %v573_v46  ;;  %v455_v56 = vand.u32 4294901760, %v454_v47  ;;  %v25681_v58 = vand.u32 4294901760, %v22709_v49  ;;  %19813 = vmatprep.subr.bf16.mxu1 %v22707_v48  ;;  %v22723_v1 = vsub.f32 %v269_v8, %v329_v45  ;;  %v22760_v46 = vld [vmem:[%s25665_s7 + $0xc0] sm:$0xff]  ;;  %v22765_v47 = vld [vmem:[%s25665_s7 + $0xc8] sm:$0xff] }
  0x9e   :  { %25892 = vst [vmem:[#allocation25_spill] sm:$0xff] %v22712_v50  ;;  %v462_v60 = vand.u32 4294901760, %v461_v53  ;;  %v22730_v5 = vpack.c.bf16 %v332_v59, %v329_v45  ;;  %v22732_v6 = vsub.f32 %v270_v25, %v332_v59  ;;  %v25704_v53 = vand.u32 4294901760, %v22765_v47 }
  0x9f   :  { %16190 = vmatmul.mubr.msk.bf16.vlgmr.msra.gmra.mrb[0].mxu0 %vm218_vm0, %v145_v9  ;;  %25894 = vst [vmem:[#allocation27_spill] sm:$0xff] %v22723_v1  ;;  %v22725_v2 = vpack.c.bf16 %v574_v55, %v567_v52  ;;  %v580_v3 = vsub.f32 %v22709_v49, %v25681_v58  ;;  %v587_v9 = vsub.f32 %v22717_v54, %v25680_v63  ;;  %v25679_v8 = vand.u32 4294901760, %v22723_v1  ;;  %v22772_v55 = vld [vmem:[%s25665_s7 + $0x40] sm:$0xff]  ;;  %v22818_v63 = vld [vmem:[%s25665_s7 + $0x50] sm:$0xff]  ;;  %v22823_v58 = vld [vmem:[%s25665_s7 + $0x58] sm:$0xff] }
  0xa0   :  { %19835 = vmatpush3.bf16.msra.mxu0 %v22658_v4  ;;  %25896 = vst [vmem:[#allocation29_spill] sm:$0xff] %v22732_v6  ;;  %v22735_v7 = vpack.c.bf16 %v462_v60, %v455_v56  ;;  %v25678_v14 = vand.u32 4294901760, %v22732_v6  ;;  %19815 = vmatpush3.bf16.msra.mxu1 %v22730_v5  ;;  %v25707_v52 = vand.u32 4294901760, %v22760_v46  ;;  %v22777_v56 = vld [vmem:[%s25665_s7 + $0x48] sm:$0xff]  ;;  %v25702_v59 = vand.u32 4294901760, %v22772_v55 }
  0xa1   :  { %19837 = vmatprep.subr.bf16.mxu0 %v22669_v10  ;;  %25895 = vst [vmem:[#allocation28_spill] sm:$0xff] %v22725_v2  ;;  %v581_v13 = vand.u32 4294901760, %v580_v3  ;;  %v588_v18 = vand.u32 4294901760, %v587_v9  ;;  %v468_v25 = vsub.f32 %v22723_v1, %v25679_v8  ;;  %v25700_v60 = vand.u32 4294901760, %v22777_v56 }
  0xa2   :  { %25897 = vst [vmem:[#allocation30_spill] sm:$0xff] %v22735_v7  ;;  %v475_v36 = vsub.f32 %v22732_v6, %v25678_v14  ;;  %v22784_v3 = vsub.f32 %v22760_v46, %v25707_v52  ;;  %v22789_v9 = vsub.f32 %v22765_v47, %v25704_v53  ;;  %v25701_v30 = vand.u32 4294901760, %v22818_v63  ;;  %v22905_v52 = vld [vmem:[%s25665_s7 + $0xf0] sm:$0xff] }
  0xa3   :  { %v22751_v40 = vpack.c.bf16 %v588_v18, %v581_v13  ;;  %v469_v41 = vand.u32 4294901760, %v468_v25  ;;  %v22794_v13 = vsub.f32 %v22772_v55, %v25702_v59  ;;  %v22799_v18 = vsub.f32 %v22777_v56, %v25700_v60  ;;  %v22804_v25 = vld [vmem:[%s25665_s7 + $0xd0] sm:$0xff] }
  0xa4   :  { %19839 = vmatpush3.bf16.msra.mxu0 %v22712_v50  ;;  %v476_v42 = vand.u32 4294901760, %v475_v36  ;;  %v22809_v36 = vld [vmem:[%s25665_s7 + $0xd8] sm:$0xff]  ;;  %v25699_v14 = vand.u32 4294901760, %v22804_v25  ;;  %v25703_v19 = vand.u32 4294901760, %v22823_v58  ;;  %v401_v10 = vand.u32 4294901760, %v22905_v52 }
  0xa5   :  { %19841 = vmatprep.subr.bf16.mxu0 %v22725_v2  ;;  %25898 = vst [vmem:[#allocation31_spill] sm:$0xff] %v22751_v40  ;;  %v25697_v8 = vand.u32 4294901760, %v22809_v36  ;;  %v25695_v43 = vand.u32 4294901760, %v22794_v13  ;;  %v25698_v31 = vand.u32 4294901760, %v22799_v18  ;;  %v25910_v1 = vand.u32 4294901760, %v22765_v47 }
  0xa6   :  { %v22754_v45 = vpack.c.bf16 %v476_v42, %v469_v41  ;;  %v25691_v41 = vand.u32 4294901760, %v22784_v3  ;;  %v25692_v42 = vand.u32 4294901760, %v22789_v9  ;;  %v22838_v44 = vsub.f32 %v22804_v25, %v25699_v14 }
  0xa7   :  { %v22843_v39 = vsub.f32 %v22809_v36, %v25697_v8  ;;  %v482_v38 = vsub.f32 %v22794_v13, %v25695_v43  ;;  %v22859_v37 = vsub.f32 %v22823_v58, %v25703_v19  ;;  %v22873_v19 = vld [vmem:[%s25665_s7 + $0xe8] sm:$0xff]  ;;  %v22947_v62 = vsub.f32 %v22905_v52, %v401_v10 }
  0xa8   :  { %19843 = vmatpush3.bf16.msra.mxu0 %v22735_v7  ;;  %25899 = vst [vmem:[#allocation32_spill] sm:$0xff] %v22754_v45  ;;  %v594_v11 = vsub.f32 %v22784_v3, %v25691_v41  ;;  %v601_v61 = vsub.f32 %v22789_v9, %v25692_v42  ;;  %v489_v41 = vsub.f32 %v22799_v18, %v25698_v31  ;;  %v25705_v8 = vand.u32 4294901760, %v22838_v44 }
  0xa9   :  { %19845 = vmatprep.subr.bf16.mxu0 %v22751_v40  ;;  %v22854_v42 = vsub.f32 %v22818_v63, %v25701_v30  ;;  %v25706_v31 = vand.u32 4294901760, %v22843_v39  ;;  %v483_v14 = vand.u32 4294901760, %v482_v38  ;;  %v25712_v59 = vand.u32 4294901760, %v22859_v37  ;;  %25907 = vst [vmem:[#allocation39_spill] sm:$0xff] %v22947_v62 }
  0xaa   :  { %v595_v43 = vand.u32 4294901760, %v594_v11  ;;  %v602_v32 = vand.u32 4294901760, %v601_v61  ;;  %v490_v60 = vand.u32 4294901760, %v489_v41  ;;  %v608_v61 = vsub.f32 %v22838_v44, %v25705_v8  ;;  %v22887_v41 = vld [vmem:[%s25665_s7 + $0x60] sm:$0xff] }
  0xab   :  { %v25713_v30 = vand.u32 4294901760, %v22854_v42  ;;  %v615_v38 = vsub.f32 %v22843_v39, %v25706_v31  ;;  %v503_v31 = vsub.f32 %v22859_v37, %v25712_v59  ;;  %v294_v59 = vld [vmem:[%s25665_s7 + $0xf8] sm:$0xff]  ;;  %v347_v2 = vand.u32 4294901760, %v22887_v41 }
  0xac   :  { %19847 = vmatpush3.bf16.msra.mxu0 %v22754_v45  ;;  %v22875_v53 = vpack.c.bf16 %v602_v32, %v595_v43  ;;  %v22892_v32 = vld [vmem:[%s25665_s7 + $0x68] sm:$0xff]  ;;  %v22894_v43 = vpack.c.bf16 %v490_v60, %v483_v14  ;;  %v609_v11 = vand.u32 4294901760, %v608_v61  ;;  %v398_v14 = vand.u32 4294901760, %v22873_v19 }
  0xad   :  { %v496_v8 = vsub.f32 %v22854_v42, %v25713_v30  ;;  %v616_v45 = vand.u32 4294901760, %v615_v38  ;;  %v25902_v60 = vand.u32 4294901760, %v22864_v33  ;;  %v504_v7 = vand.u32 4294901760, %v503_v31  ;;  %v277_v38 = vld [vmem:[%s25665_s7 + $0x70] sm:$0xff]  ;;  %v278_v31 = vld [vmem:[%s25665_s7 + $0x78] sm:$0xff] }
  0xae   :  { %25900 = vst [vmem:[#allocation33_spill] sm:$0xff] %v22875_v53  ;;  %25901 = vst [vmem:[#allocation34_spill] sm:$0xff] %v22894_v43  ;;  %19849 = vmatprep.subr.bf16.mxu0 %v22875_v53  ;;  %v350_v61 = vand.u32 4294901760, %v22892_v32  ;;  %v22927_v50 = vsub.f32 %v22873_v19, %v398_v14  ;;  %v356_v6 = vand.u32 4294901760, %v278_v31  ;;  %vm295_vm1 = vcmask 1043456  }
  0xaf   :  { %v22912_v40 = vsub.f32 %v22864_v33, %v25902_v60  ;;  %v497_v30 = vand.u32 4294901760, %v496_v8  ;;  %v22923_v53 = vpack.c.bf16 %v616_v45, %v609_v11  ;;  %v404_v45 = vand.u32 4294901760, %v294_v59 }
  0xb0   :  { %19851 = vmatpush3.bf16.msra.mxu0 %v22894_v43  ;;  %v22936_v43 = vsub.f32 %v22887_v41, %v347_v2  ;;  %v22939_v4 = vsub.f32 %v22892_v32, %v350_v61  ;;  %v25912_v52 = vand.u32 4294901760, %v22927_v50  ;;  %v25914_v41 = vand.u32 4294901760, %v22777_v56 }
  0xb1   :  { %25903 = vst [vmem:[#allocation35_spill] sm:$0xff] %v22923_v53  ;;  %v25736_v60 = vand.u32 4294901760, %v22912_v40  ;;  %v22933_v8 = vpack.c.bf16 %v504_v7, %v497_v30  ;;  %19853 = vmatprep.subr.bf16.mxu0 %v22923_v53  ;;  %v353_v30 = vand.u32 4294901760, %v277_v38  ;;  %v22952_v32 = vsub.f32 %v294_v59, %v404_v45 }
  0xb2   :  { %25905 = vst [vmem:[#allocation37_spill] sm:$0xff] %v22936_v43  ;;  %25906 = vst [vmem:[#allocation38_spill] sm:$0xff] %v22939_v4  ;;  %v25909_v53 = vand.u32 4294901760, %v22760_v46  ;;  %v629_v54 = vsub.f32 %v22927_v50, %v25912_v52  ;;  %v25913_v7 = vand.u32 4294901760, %v22772_v55  ;;  %v25916_v49 = vand.u32 4294901760, %v22936_v43 }
  0xb3   :  { %25904 = vst [vmem:[#allocation36_spill] sm:$0xff] %v22933_v8  ;;  %v622_v19 = vsub.f32 %v22912_v40, %v25736_v60  ;;  %25908 = vst [vmem:[#allocation40_spill] sm:$0xff] %v22952_v32  ;;  %v22981_v56 = vsub.f32 %v277_v38, %v353_v30  ;;  %vm2063_vm2 = vcmask 64512   ;;  %vm22379_vm3 = vmmov 0  }
  0xb4   :  { %19855 = vmatpush3.bf16.msra.mxu0 %v22933_v8  ;;  %v22958_v60 = vpack.c.bf16 %v25910_v1, %v25909_v53  ;;  %v25747_v8 = vand.u32 4294901760, %v22947_v62  ;;  %v22968_v59 = vpack.c.bf16 %v25914_v41, %v25913_v7  ;;  %v510_v46 = vsub.f32 %v22936_v43, %v25916_v49 }
  0xb5   :  { %v623_v11 = vand.u32 4294901760, %v622_v19  ;;  %v25917_v1 = vand.u32 4294901760, %v22939_v4  ;;  %v25750_v53 = vand.u32 4294901760, %v22952_v32  ;;  %v630_v19 = vand.u32 4294901760, %v629_v54  ;;  %25918 = vst [vmem:[#allocation43_spill] sm:$0xff] %v22981_v56 }
  0xb6   :  { %25911 = vst [vmem:[#allocation41_spill] sm:$0xff] %v22958_v60  ;;  %25915 = vst [vmem:[#allocation42_spill] sm:$0xff] %v22968_v59  ;;  %19817 = vmatprep.subr.bf16.mxu1 %v22958_v60  ;;  %v636_v55 = vsub.f32 %v22947_v62, %v25747_v8  ;;  %v22983_v7 = vsub.f32 %v278_v31, %v356_v6  ;;  %v511_v49 = vand.u32 4294901760, %v510_v46  ;;  %v25921_v54 = vand.u32 4294901760, %v22809_v36 }
  0xb7   :  { %v517_v47 = vsub.f32 %v22939_v4, %v25917_v1  ;;  %19819 = vmatpush3.bf16.msra.mxu1 %v22968_v59  ;;  %v643_v52 = vsub.f32 %v22952_v32, %v25750_v53  ;;  %v25920_v1 = vand.u32 4294901760, %v22804_v25  ;;  %v22995_v24 = vpack.c.bf16 %v630_v19, %v623_v11 }
  0xb8   :  { %25919 = vst [vmem:[#allocation44_spill] sm:$0xff] %v22983_v7  ;;  %v637_v38 = vand.u32 4294901760, %v636_v55  ;;  %v25752_v31 = vand.u32 4294901760, %v22981_v56  ;;  %v25923_v8 = vand.u32 4294901760, %v22818_v63  ;;  %v25924_v46 = vand.u32 4294901760, %v22823_v58 }
  0xb9   :  { %v518_v41 = vand.u32 4294901760, %v517_v47  ;;  %v22993_v60 = vpack.c.bf16 %v25921_v54, %v25920_v1  ;;  %25922 = vst [vmem:[#allocation45_spill] sm:$0xff] %v22995_v24  ;;  %v644_v53 = vand.u32 4294901760, %v643_v52  ;;  %v25751_v25 = vand.u32 4294901760, %v22983_v7  ;;  %19857 = vmatprep.subr.bf16.mxu0 %v22995_v24 }
  0xba   :  { %v23002_v47 = vpack.c.bf16 %v25924_v46, %v25923_v8  ;;  %v25926_v36 = vand.u32 4294901760, %v22864_v33  ;;  %v23013_v11 = vpack.c.bf16 %v350_v61, %v347_v2  ;;  %v524_v63 = vsub.f32 %v22981_v56, %v25752_v31 }
  0xbb   :  { %v23004_v59 = vpack.c.bf16 %v518_v41, %v511_v49  ;;  %19821 = vmatprep.subr.bf16.mxu1 %v22993_v60  ;;  %v23016_v58 = vpack.c.bf16 %v644_v53, %v637_v38  ;;  %v23022_v8 = vpack.c.bf16 %v404_v45, %v401_v10  ;;  %v531_v33 = vsub.f32 %v22983_v7, %v25751_v25 }
  0xbc   :  { %v23009_v1 = vpack.c.bf16 %v398_v14, %v25926_v36  ;;  %19823 = vmatpush3.bf16.msra.mxu1 %v23002_v47  ;;  %v525_v2 = vand.u32 4294901760, %v524_v63  ;;  %v23029_v61 = vpack.c.bf16 %v356_v6, %v353_v30  ;;  %v23040_v10 = vpack.c.bf16 %v22583_v22, %v22581_v21 }
  0xbd   :  { %25925 = vst [vmem:[#allocation46_spill] sm:$0xff] %v23004_v59  ;;  %19859 = vmatpush3.bf16.msra.mxu0 %v23004_v59  ;;  %25927 = vst [vmem:[#allocation47_spill] sm:$0xff] %v23016_v58  ;;  %v532_v14 = vand.u32 4294901760, %v531_v33  ;;  %v23045_v6 = vpack.c.bf16 %v22789_v9, %v22784_v3  ;;  %v23049_v45 = vpack.c.bf16 %v22799_v18, %v22794_v13  ;;  %vm16115_vm4 = vcmask 130048  }
  0xbe   :  { %19825 = vmatprep.subr.bf16.mxu1 %v23009_v1  ;;  %19861 = vmatprep.subr.bf16.mxu0 %v23016_v58  ;;  %25929 = vst [vmem:[#allocation49_spill] sm:$0xff] %v23040_v10  ;;  %v23053_v30 = vpack.c.bf16 %v22843_v39, %v22838_v44  ;;  %v23057_v19 = vpack.c.bf16 %v22859_v37, %v22854_v42 }
  0xbf   :  { %v23032_v53 = vpack.c.bf16 %v532_v14, %v525_v2  ;;  %25930 = vst [vmem:[#allocation50_spill] sm:$0xff] %v23045_v6  ;;  %v23061_v55 = vpack.c.bf16 %v22927_v50, %v22912_v40  ;;  %v23065_v49 = vpack.c.bf16 %v22939_v4, %v22936_v43  ;;  %v23069_v41 = vpack.c.bf16 %v22952_v32, %v22947_v62 }
  0xc0   :  { %19827 = vmatpush3.bf16.msra.mxu1 %v23013_v11  ;;  %25931 = vst [vmem:[#allocation51_spill] sm:$0xff] %v23053_v30  ;;  %25932 = vst [vmem:[#allocation52_spill] sm:$0xff] %v23057_v19  ;;  %v23073_v52 = vpack.c.bf16 %v22983_v7, %v22981_v56 }
  0xc1   :  { %25928 = vst [vmem:[#allocation48_spill] sm:$0xff] %v23032_v53  ;;  %19829 = vmatprep.subr.bf16.mxu1 %v23022_v8  ;;  %19863 = vmatpush3.bf16.msra.mxu0 %v23032_v53  ;;  %25933 = vst [vmem:[#allocation53_spill] sm:$0xff] %v23061_v55 }
  0xc2   :  { %19897 = vmatprep.subr.bf16.mxu0 %v22579_v20  ;;  %25934 = vst [vmem:[#allocation54_spill] sm:$0xff] %v23065_v49 }
  0xc4   :  { %19831 = vmatpush3.bf16.msra.mxu1 %v23029_v61 }
  0xc5   :  { %19865 = vmatprep.subr.bf16.mxu1 %v23040_v10 }
 0x172   :  { %v23075_v54 = vpop.f32.mrb[0].mxu0 }
 0x173   :  { %v296_v38 = vsel %vm295_vm1, %v23075_v54, 0.0  ;;  %v23079_v46 = vpop.f32.mrb[1].mxu0 }
 0x174   :  { %25935 = vst [vmem:[#allocation55_spill] sm:$0xff] %v23079_v46  ;;  %v297_v36 = vrot.slane %v296_v38, 4  ;;  %v303_v63 = vsel %vm295_vm1, %v23079_v46, 0.0  ;;  %v260_v33 = vpop.f32.mrb[2].mxu0 }
 0x175   :  { %v304_v2 = vrot.slane %v303_v63, 4  ;;  %v261_v14 = vpop.f32.mrb[3].mxu0  ;;  %v25937_v33 = vld [vmem:[#allocation41_spill] sm:$0xff] }
 0x176   :  { %v298_v25 = vadd.f32 %v297_v36, %v296_v38  ;;  %v25936_v36 = vld [vmem:[#allocation23_spill] sm:$0xff]  ;;  %v25939_v14 = vld [vmem:[#allocation26_spill] sm:$0xff] }
 0x177   :  { %v305_v31 = vadd.f32 %v304_v2, %v303_v63  ;;  %v23123_v63 = vpack.c.bf16 %v25936_v36, %v22678_v17  ;;  %v25938_v2 = vld [vmem:[#allocation24_spill] sm:$0xff] }
 0x178   :  { %v299_v10 = vrot.slane %v298_v25, 2 }
 0x179   :  { %v306_v53 = vrot.slane %v305_v31, 2 }
 0x17a   :  { %v300_v58 = vadd.f32 %v299_v10, %v298_v25  ;;  %v23116_v10 = vpack.c.bf16 %v22676_v16, %v22672_v12 }
 0x17b   :  { %v307_v59 = vadd.f32 %v306_v53, %v305_v31  ;;  %v23111_v53 = vpack.c.bf16 %v22649_v0, %v22636_v51 }
 0x17c   :  { %v301_v24 = vrot.slane %v300_v58, 1 }
 0x17d   :  { %v308_v7 = vrot.slane %v307_v59, 1 }
 0x17e   :  { %v302_v56 = vadd.f32 %v301_v24, %v300_v58  ;;  %v23105_v58 = vpack.c.bf16 %v22603_v35, %v22594_v29 }
 0x17f   :  { %v309_v32 = vadd.f32 %v308_v7, %v307_v59  ;;  %v23100_v7 = vpack.c.bf16 %v22592_v28, %v22590_v27 }
 0x180   :  { %v23083_v62 = vand.u32 4294901760, %v302_v56 }
 0x181   :  { %v23085_v4 = vand.u32 4294901760, %v309_v32 }
 0x182   :  { %v23088_v43 = vsub.f32 %v302_v56, %v23083_v62 }
 0x183   :  { %647 = vmatprep.mubr.f32.mxu0 %v23085_v4  ;;  %v407_v38 = vsub.f32 %v309_v32, %v23085_v4 }
 0x184   :  { %649 = vmatmul.mubr.f32.vlgmr.msra.gmra.mrb[4].mxu0 %v23083_v62  ;;  %v414_v25 = vand.u32 4294901760, %v23088_v43 }
 0x185   :  { %19899 = vmatpush3.bf16.msra.mxu0 %v22588_v26  ;;  %v408_v31 = vand.u32 4294901760, %v407_v38 }
 0x186   :  { %19901 = vmatprep.subr.bf16.mxu0 %v22601_v34  ;;  %v415_v24 = vsub.f32 %v23088_v43, %v414_v25 }
 0x187   :  { %891 = vmatprep.mubr.f32.mxu0 %v408_v31  ;;  %v409_v59 = vsub.f32 %v407_v38, %v408_v31  ;;  %v25941_v31 = vld [vmem:[#allocation42_spill] sm:$0xff] }
 0x188   :  { %v416_v32 = vand.u32 4294901760, %v415_v24  ;;  %v25942_v24 = vld [vmem:[#allocation27_spill] sm:$0xff] }
 0x189   :  { %19903 = vmatpush3.bf16.msra.mxu0 %v22644_v57  ;;  %v410_v56 = vand.u32 4294901760, %v409_v59  ;;  %v25943_v59 = vld [vmem:[#allocation29_spill] sm:$0xff] }
 0x18a   :  { %19905 = vmatprep.subr.bf16.mxu0 %v22674_v15 }
 0x18b   :  { %411 = vmatprep.mubr.f32.mxu1 %v410_v56  ;;  %v23135_v56 = vpack.c.bf16 %v25943_v59, %v25942_v24 }
 0x18c   :  { %417 = vmatmul.mubr.f32.vlgmr.msra.gmra.mrb[0].mxu1 %v416_v32  ;;  %v1173_v32 = vmul.f32 %v23079_v46, %v23079_v46  ;;  %v25945_v46 = vand.u32 4294901760, %v22583_v22  ;;  %v25951_v22 = vand.u32 4294901760, %v22603_v35  ;;  %v25957_v35 = vand.u32 4294901760, %v22676_v16 }
 0x18d   :  { %19867 = vmatpush3.bf16.msra.mxu1 %v23100_v7  ;;  %19907 = vmatpush3.bf16.msra.mxu0 %v22684_v23  ;;  %v25963_v16 = vand.u32 4294901760, %v25939_v14 }
 0x18e   :  { %784 = vmatprep.mubr.f32.mxu1 %v407_v38  ;;  %19869 = vmatprep.subr.bf16.mxu1 %v23105_v58  ;;  %v23129_v38 = vpack.c.bf16 %v25939_v14, %v25938_v2  ;;  %v25969_v14 = vand.u32 4294901760, %v22789_v9  ;;  %v25975_v9 = vand.u32 4294901760, %v22843_v39  ;;  %v25980_v39 = vand.u32 4294901760, %v22912_v40 }
 0x18f   :  { %19909 = vmatprep.subr.bf16.mxu0 %v22707_v48 }
 0x190   :  { %25940 = vst [vmem:[#allocation23_spill] sm:$0xff] %v23129_v38 }
 0x191   :  { %19871 = vmatpush3.bf16.msra.mxu1 %v23111_v53  ;;  %19911 = vmatpush3.bf16.msra.mxu0 %v22730_v5 }
 0x192   :  { %19873 = vmatprep.subr.bf16.mxu1 %v23116_v10  ;;  %19913 = vmatprep.subr.bf16.mxu0 %v25937_v33 }
 0x195   :  { %19875 = vmatpush3.bf16.msra.mxu1 %v23123_v63  ;;  %19915 = vmatpush3.bf16.msra.mxu0 %v25941_v31 }
 0x196   :  { %19877 = vmatprep.subr.bf16.mxu1 %v23129_v38  ;;  %19917 = vmatprep.subr.bf16.mxu0 %v22993_v60  ;;  %v1181_v38 = vsel %vm295_vm1, %v1173_v32, 0.0  ;;  %v25944_v32 = vand.u32 4294901760, %v22581_v21  ;;  %v25950_v21 = vand.u32 4294901760, %v22594_v29  ;;  %v25956_v29 = vand.u32 4294901760, %v22672_v12 }
 0x197   :  { %v25962_v12 = vand.u32 4294901760, %v25938_v2  ;;  %v25968_v2 = vand.u32 4294901760, %v22784_v3  ;;  %v25974_v3 = vand.u32 4294901760, %v22838_v44  ;;  %v25981_v44 = vand.u32 4294901760, %v22927_v50  ;;  %v25988_v50 = vld [vmem:[#allocation20_spill] sm:$0xff] }
 0x199   :  { %19879 = vmatpush3.bf16.msra.mxu1 %v23135_v56  ;;  %19919 = vmatpush3.bf16.msra.mxu0 %v23002_v47 }
 0x19a   :  { %19881 = vmatprep.subr.bf16.mxu1 %v23045_v6  ;;  %19921 = vmatprep.subr.bf16.mxu0 %v23009_v1  ;;  %v1182_v6 = vrot.slane %v1181_v38, 4 }
 0x19d   :  { %19883 = vmatpush3.bf16.msra.mxu1 %v23049_v45  ;;  %19923 = vmatpush3.bf16.msra.mxu0 %v23013_v11 }
 0x19e   :  { %19885 = vmatprep.subr.bf16.mxu1 %v23053_v30  ;;  %19925 = vmatprep.subr.bf16.mxu0 %v23022_v8  ;;  %v1183_v30 = vadd.f32 %v1182_v6, %v1181_v38  ;;  %v23179_v6 = vpack.c.bf16 %v25951_v22, %v25950_v21  ;;  %v23196_v38 = vpack.c.bf16 %v25957_v35, %v25956_v29  ;;  %v25978_v29 = vand.u32 4294901760, %v22859_v37  ;;  %v25983_v37 = vld [vmem:[#allocation37_spill] sm:$0xff] }
 0x19f   :  { %v23228_v21 = vpack.c.bf16 %v25969_v14, %v25968_v2  ;;  %v25991_v2 = vld [vmem:[#allocation40_spill] sm:$0xff] }
 0x1a0   :  { %25952 = vst [vmem:[#allocation26_spill] sm:$0xff] %v23179_v6  ;;  %25958 = vst [vmem:[#allocation27_spill] sm:$0xff] %v23196_v38  ;;  %v25992_v14 = vand.u32 4294901760, %v25991_v2 }
 0x1a1   :  { %19887 = vmatpush3.bf16.msra.mxu1 %v23057_v19  ;;  %19927 = vmatpush3.bf16.msra.mxu0 %v23029_v61  ;;  %v23162_v19 = vpack.c.bf16 %v25945_v46, %v25944_v32  ;;  %v1184_v46 = vrot.slane %v1183_v30, 2  ;;  %v23212_v32 = vpack.c.bf16 %v25963_v16, %v25962_v12  ;;  %25970 = vst [vmem:[#allocation58_spill] sm:$0xff] %v23228_v21  ;;  %v25985_v12 = vld [vmem:[#allocation38_spill] sm:$0xff] }
 0x1a2   :  { %19889 = vmatprep.subr.bf16.mxu1 %v23061_v55  ;;  %19961 = vmatprep.subr.bf16.mxu0 %v22579_v20  ;;  %v25986_v16 = vand.u32 4294901760, %v25985_v12  ;;  %v26001_v12 = vld [vmem:[#allocation25_spill] sm:$0xff] }
 0x1a3   :  { %25946 = vst [vmem:[#allocation41_spill] sm:$0xff] %v23162_v19  ;;  %25964 = vst [vmem:[#allocation56_spill] sm:$0xff] %v23212_v32 }
 0x1a4   :  { %895 = vmatmul.mubr.f32.vlgmr.msra.gmra.mrb[6].mxu0 %v414_v25  ;;  %v25947_v25 = vand.u32 4294901760, %v22590_v27  ;;  %v25953_v27 = vand.u32 4294901760, %v22636_v51  ;;  %v25959_v51 = vand.u32 4294901760, %v22678_v17  ;;  %v25965_v17 = vand.u32 4294901760, %v25942_v24 }
 0x1a5   :  { %19891 = vmatpush3.bf16.msra.mxu1 %v23065_v49  ;;  %19963 = vmatpush3.bf16.msra.mxu0 %v22588_v26  ;;  %v25948_v49 = vand.u32 4294901760, %v22592_v28  ;;  %v25954_v28 = vand.u32 4294901760, %v22649_v0  ;;  %v25960_v0 = vand.u32 4294901760, %v25936_v36  ;;  %v25966_v36 = vand.u32 4294901760, %v25943_v59 }
 0x1a6   :  { %1165 = vmatprep.mubr.f32.mxu0 %v23085_v4  ;;  %19893 = vmatprep.subr.bf16.mxu1 %v23069_v41  ;;  %v25971_v24 = vand.u32 4294901760, %v22794_v13  ;;  %v25972_v59 = vand.u32 4294901760, %v22799_v18  ;;  %v25977_v18 = vand.u32 4294901760, %v22854_v42 }
 0x1a7   :  { %19965 = vmatprep.subr.bf16.mxu0 %v22601_v34  ;;  %v23171_v55 = vpack.c.bf16 %v25948_v49, %v25947_v25  ;;  %v23188_v49 = vpack.c.bf16 %v25954_v28, %v25953_v27  ;;  %v23220_v25 = vpack.c.bf16 %v25966_v36, %v25965_v17  ;;  %v23244_v27 = vpack.c.bf16 %v25975_v9, %v25974_v3  ;;  %v25989_v17 = vld [vmem:[#allocation39_spill] sm:$0xff]  ;;  %v25996_v9 = vld [vmem:[#allocation44_spill] sm:$0xff] }
 0x1a8   :  { %v1172_v28 = vmul.f32 %v23075_v54, %v23075_v54  ;;  %v23256_v35 = vpack.c.bf16 %v25978_v29, %v25977_v18  ;;  %v25990_v36 = vand.u32 4294901760, %v25989_v17  ;;  %v26003_v17 = vld [vmem:[#allocation30_spill] sm:$0xff] }
 0x1a9   :  { %19895 = vmatpush3.bf16.msra.mxu1 %v23073_v52  ;;  %19967 = vmatpush3.bf16.msra.mxu0 %v22644_v57  ;;  %25949 = vst [vmem:[#allocation24_spill] sm:$0xff] %v23171_v55  ;;  %25955 = vst [vmem:[#allocation42_spill] sm:$0xff] %v23188_v49 }
 0x1aa   :  { %19929 = vmatprep.subr.bf16.mxu1 %v23162_v19  ;;  %19969 = vmatprep.subr.bf16.mxu0 %v22674_v15  ;;  %25967 = vst [vmem:[#allocation57_spill] sm:$0xff] %v23220_v25  ;;  %25976 = vst [vmem:[#allocation60_spill] sm:$0xff] %v23244_v27 }
 0x1ab   :  { %25979 = vst [vmem:[#allocation61_spill] sm:$0xff] %v23256_v35 }
 0x1ac   :  { %787 = vmatmul.mubr.f32.vlgmr.msra.gmra.mrb[2].mxu1 %v23088_v43  ;;  %v1185_v43 = vadd.f32 %v1184_v46, %v1183_v30  ;;  %v23236_v46 = vpack.c.bf16 %v25972_v59, %v25971_v24  ;;  %v25994_v59 = vld [vmem:[#allocation43_spill] sm:$0xff] }
 0x1ad   :  { %19931 = vmatpush3.bf16.msra.mxu1 %v23171_v55  ;;  %1061 = vmatprep.mubr.f32.mxu1 %v23085_v4  ;;  %v23204_v4 = vpack.c.bf16 %v25960_v0, %v25959_v51  ;;  %v1174_v51 = vsel %vm295_vm1, %v1172_v28, 0.0  ;;  %v25984_v0 = vand.u32 4294901760, %v25983_v37  ;;  %v25995_v3 = vand.u32 4294901760, %v25994_v59  ;;  %v26006_v59 = vld [vmem:[#allocation33_spill] sm:$0xff] }
 0x1ae   :  { %19971 = vmatpush3.bf16.msra.mxu0 %v22684_v23  ;;  %19933 = vmatprep.subr.bf16.mxu1 %v23179_v6  ;;  %v1186_v30 = vrot.slane %v1185_v43, 1  ;;  %25973 = vst [vmem:[#allocation59_spill] sm:$0xff] %v23236_v46  ;;  %v1175_v40 = vrot.slane %v1174_v51, 4  ;;  %v25997_v28 = vand.u32 4294901760, %v25996_v9  ;;  %v26008_v9 = vld [vmem:[#allocation35_spill] sm:$0xff] }
 0x1af   :  { %19973 = vmatprep.subr.bf16.mxu0 %v22707_v48  ;;  %25961 = vst [vmem:[#allocation29_spill] sm:$0xff] %v23204_v4 }
 0x1b0   :  { %v1187_v22 = vadd.f32 %v1186_v30, %v1185_v43  ;;  %v23264_v43 = vpack.c.bf16 %v25981_v44, %v25980_v39  ;;  %v23276_v30 = vpack.c.bf16 %v25986_v16, %v25984_v0  ;;  %v23294_v18 = vpack.c.bf16 %v25997_v28, %v25995_v3  ;;  %v25999_v39 = vld [vmem:[#allocation21_spill] sm:$0xff]  ;;  %v26000_v44 = vld [vmem:[#allocation22_spill] sm:$0xff]  ;;  %v26002_v16 = vld [vmem:[#allocation28_spill] sm:$0xff] }
 0x1b1   :  { %19935 = vmatpush3.bf16.msra.mxu1 %v23188_v49  ;;  %v1176_v29 = vadd.f32 %v1175_v40, %v1174_v51  ;;  %v26009_v28 = vld [vmem:[#allocation36_spill] sm:$0xff] }
 0x1b2   :  { %19975 = vmatpush3.bf16.msra.mxu0 %v22730_v5  ;;  %19937 = vmatprep.subr.bf16.mxu1 %v23196_v38  ;;  %v23249_v13 = vand.u32 4294901760, %v1187_v22  ;;  %25982 = vst [vmem:[#allocation62_spill] sm:$0xff] %v23264_v43  ;;  %25987 = vst [vmem:[#allocation37_spill] sm:$0xff] %v23276_v30 }
 0x1b3   :  { %19977 = vmatprep.subr.bf16.mxu0 %v25937_v33  ;;  %25998 = vst [vmem:[#allocation20_spill] sm:$0xff] %v23294_v18  ;;  %v1177_v0 = vrot.slane %v1176_v29, 2 }
 0x1b4   :  { %v23269_v42 = vsub.f32 %v1187_v22, %v23249_v13  ;;  %v23285_v22 = vpack.c.bf16 %v25992_v14, %v25990_v36  ;;  %v26004_v36 = vld [vmem:[#allocation31_spill] sm:$0xff]  ;;  %v26005_v14 = vld [vmem:[#allocation32_spill] sm:$0xff] }
 0x1b5   :  { %19939 = vmatpush3.bf16.msra.mxu1 %v23204_v4  ;;  %v1178_v40 = vadd.f32 %v1177_v0, %v1176_v29  ;;  %v26011_v0 = vld [vmem:[#allocation46_spill] sm:$0xff] }
 0x1b6   :  { %19979 = vmatpush3.bf16.msra.mxu0 %v25941_v31  ;;  %19941 = vmatprep.subr.bf16.mxu1 %v23212_v32  ;;  %25993 = vst [vmem:[#allocation38_spill] sm:$0xff] %v23285_v22  ;;  %v1286_v24 = vand.u32 4294901760, %v23269_v42 }
 0x1b7   :  { %19981 = vmatprep.subr.bf16.mxu0 %v22993_v60  ;;  %v1179_v2 = vrot.slane %v1178_v40, 1 }
 0x1b8   :  { %v1287_v37 = vsub.f32 %v23269_v42, %v1286_v24 }
 0x1b9   :  { %19943 = vmatpush3.bf16.msra.mxu1 %v23220_v25  ;;  %v1180_v3 = vadd.f32 %v1179_v2, %v1178_v40  ;;  %v26012_v40 = vld [vmem:[#allocation47_spill] sm:$0xff]  ;;  %v26013_v2 = vld [vmem:[#allocation48_spill] sm:$0xff] }
 0x1ba   :  { %19983 = vmatpush3.bf16.msra.mxu0 %v23002_v47  ;;  %19945 = vmatprep.subr.bf16.mxu1 %v23228_v21  ;;  %v1288_v51 = vand.u32 4294901760, %v1287_v37  ;;  %v26010_v37 = vld [vmem:[#allocation45_spill] sm:$0xff] }
 0x1bb   :  { %19985 = vmatprep.subr.bf16.mxu0 %v23009_v1  ;;  %v23321_v29 = vand.u32 4294901760, %v1180_v3 }
 0x1bd   :  { %19947 = vmatpush3.bf16.msra.mxu1 %v23236_v46 }
 0x1be   :  { %19987 = vmatpush3.bf16.msra.mxu0 %v23013_v11  ;;  %19949 = vmatprep.subr.bf16.mxu1 %v23244_v27 }
 0x1bf   :  { %19989 = vmatprep.subr.bf16.mxu0 %v23022_v8 }
 0x1c1   :  { %19951 = vmatpush3.bf16.msra.mxu1 %v23256_v35 }
 0x1c2   :  { %19991 = vmatpush3.bf16.msra.mxu0 %v23029_v61  ;;  %19953 = vmatprep.subr.bf16.mxu1 %v23264_v43 }
 0x1c3   :  { %20025 = vmatprep.subr.bf16.mxu0 %v25988_v50 }
 0x1c5   :  { %1167 = vmatmul.mubr.f32.vlgmr.msra.gmra.mrb[8].mxu0 %v23083_v62  ;;  %19955 = vmatpush3.bf16.msra.mxu1 %v23276_v30 }
 0x1c6   :  { %20027 = vmatpush3.bf16.msra.mxu0 %v25999_v39  ;;  %1525 = vmatprep.mubr.f32.mxu0 %v23249_v13 }
 0x1c7   :  { %19957 = vmatprep.subr.bf16.mxu1 %v23285_v22  ;;  %20029 = vmatprep.subr.bf16.mxu0 %v26000_v44 }
 0x1c9   :  { %19959 = vmatpush3.bf16.msra.mxu1 %v23294_v18 }
 0x1ca   :  { %20031 = vmatpush3.bf16.msra.mxu0 %v26001_v12  ;;  %19993 = vmatprep.subr.bf16.mxu1 %v22579_v20 }
 0x1cb   :  { %20033 = vmatprep.subr.bf16.mxu0 %v26002_v16  ;;  %v25800_v16 = vmov 0.0  }
 0x1cc   :  { %1063 = vmatmul.mubr.f32.vlgmr.msra.gmra.mrb[4].mxu1 %v23083_v62  ;;  %v26007_v62 = vld [vmem:[#allocation34_spill] sm:$0xff] }
 0x1cd   :  { %19995 = vmatpush3.bf16.msra.mxu1 %v22588_v26  ;;  %1289 = vmatprep.mubr.f32.mxu1 %v1288_v51  ;;  %v1291_v51 = vsub.f32 %v1180_v3, %v23321_v29 }
 0x1ce   :  { %20035 = vmatpush3.bf16.msra.mxu0 %v26003_v17  ;;  %19997 = vmatprep.subr.bf16.mxu1 %v22601_v34 }
 0x1cf   :  { %20037 = vmatprep.subr.bf16.mxu0 %v26004_v36 }
 0x1d1   :  { %19999 = vmatpush3.bf16.msra.mxu1 %v22644_v57 }
 0x1d2   :  { %20039 = vmatpush3.bf16.msra.mxu0 %v26005_v14  ;;  %20001 = vmatprep.subr.bf16.mxu1 %v22674_v15 }
 0x1d3   :  { %20041 = vmatprep.subr.bf16.mxu0 %v26006_v59 }
 0x1d5   :  { %20003 = vmatpush3.bf16.msra.mxu1 %v22684_v23 }
 0x1d6   :  { %20043 = vmatpush3.bf16.msra.mxu0 %v26007_v62  ;;  %20005 = vmatprep.subr.bf16.mxu1 %v22707_v48 }
 0x1d7   :  { %20045 = vmatprep.subr.bf16.mxu0 %v26008_v9 }
 0x1d9   :  { %20007 = vmatpush3.bf16.msra.mxu1 %v22730_v5 }
 0x1da   :  { %20047 = vmatpush3.bf16.msra.mxu0 %v26009_v28  ;;  %20009 = vmatprep.subr.bf16.mxu1 %v25937_v33  ;;  %v1292_v28 = vand.u32 4294901760, %v1291_v51 }
 0x1db   :  { %20049 = vmatprep.subr.bf16.mxu0 %v26010_v37  ;;  %v26020_v37 = vld [vmem:[#allocation54_spill] sm:$0xff] }
 0x1dd   :  { %20011 = vmatpush3.bf16.msra.mxu1 %v25941_v31 }
 0x1de   :  { %20051 = vmatpush3.bf16.msra.mxu0 %v26011_v0  ;;  %20013 = vmatprep.subr.bf16.mxu1 %v22993_v60  ;;  %v1293_v0 = vsub.f32 %v1291_v51, %v1292_v28 }
 0x1df   :  { %20053 = vmatprep.subr.bf16.mxu0 %v26012_v40  ;;  %v26019_v40 = vld [vmem:[#allocation53_spill] sm:$0xff] }
 0x1e0   :  { %v1294_v3 = vand.u32 4294901760, %v1293_v0  ;;  %v26017_v0 = vld [vmem:[#allocation51_spill] sm:$0xff] }
 0x1e1   :  { %20015 = vmatpush3.bf16.msra.mxu1 %v23002_v47 }
 0x1e2   :  { %20055 = vmatpush3.bf16.msra.mxu0 %v26013_v2  ;;  %20017 = vmatprep.subr.bf16.mxu1 %v23009_v1  ;;  %v26014_v2 = vld [vmem:[#allocation49_spill] sm:$0xff] }
 0x1e3   :  { %20089 = vmatprep.subr.bf16.mxu0 %v22579_v20 }
 0x1e5   :  { %1527 = vmatmul.mubr.f32.vlgmr.msra.gmra.mrb[10].mxu0 %v23321_v29  ;;  %20019 = vmatpush3.bf16.msra.mxu1 %v23013_v11 }
 0x1e6   :  { %20091 = vmatpush3.bf16.msra.mxu0 %v22588_v26  ;;  %1769 = vmatprep.mubr.f32.mxu0 %v1286_v24  ;;  %v26015_v24 = vld [vmem:[#allocation23_spill] sm:$0xff] }
 0x1e7   :  { %20021 = vmatprep.subr.bf16.mxu1 %v23022_v8  ;;  %20093 = vmatprep.subr.bf16.mxu0 %v22601_v34 }
 0x1e9   :  { %20023 = vmatpush3.bf16.msra.mxu1 %v23029_v61 }
 0x1ea   :  { %20095 = vmatpush3.bf16.msra.mxu0 %v22644_v57  ;;  %20057 = vmatprep.subr.bf16.mxu1 %v26014_v2 }
 0x1eb   :  { %20097 = vmatprep.subr.bf16.mxu0 %v22674_v15 }
 0x1ec   :  { %1295 = vmatmul.mubr.f32.vlgmr.msra.gmra.mrb[6].mxu1 %v1294_v3  ;;  %v26018_v3 = vld [vmem:[#allocation52_spill] sm:$0xff] }
 0x1ed   :  { %20059 = vmatpush3.bf16.msra.mxu1 %v23100_v7  ;;  %1662 = vmatprep.mubr.f32.mxu1 %v23269_v42  ;;  %v26016_v42 = vld [vmem:[#allocation50_spill] sm:$0xff] }
 0x1ee   :  { %20099 = vmatpush3.bf16.msra.mxu0 %v22684_v23  ;;  %20061 = vmatprep.subr.bf16.mxu1 %v23105_v58 }
 0x1ef   :  { %20101 = vmatprep.subr.bf16.mxu0 %v22707_v48 }
 0x1f1   :  { %20063 = vmatpush3.bf16.msra.mxu1 %v23111_v53 }
 0x1f2   :  { %20103 = vmatpush3.bf16.msra.mxu0 %v22730_v5  ;;  %20065 = vmatprep.subr.bf16.mxu1 %v23116_v10 }
 0x1f3   :  { %20105 = vmatprep.subr.bf16.mxu0 %v25937_v33 }
 0x1f5   :  { %20067 = vmatpush3.bf16.msra.mxu1 %v23123_v63 }
 0x1f6   :  { %20107 = vmatpush3.bf16.msra.mxu0 %v25941_v31  ;;  %20069 = vmatprep.subr.bf16.mxu1 %v26015_v24 }
 0x1f7   :  { %20109 = vmatprep.subr.bf16.mxu0 %v22993_v60 }
 0x1f9   :  { %20071 = vmatpush3.bf16.msra.mxu1 %v23135_v56 }
 0x1fa   :  { %20111 = vmatpush3.bf16.msra.mxu0 %v23002_v47  ;;  %20073 = vmatprep.subr.bf16.mxu1 %v26016_v42 }
 0x1fb   :  { %20113 = vmatprep.subr.bf16.mxu0 %v23009_v1 }
 0x1fd   :  { %20075 = vmatpush3.bf16.msra.mxu1 %v23049_v45 }
 0x1fe   :  { %20115 = vmatpush3.bf16.msra.mxu0 %v23013_v11  ;;  %20077 = vmatprep.subr.bf16.mxu1 %v26017_v0 }
 0x1ff   :  { %20117 = vmatprep.subr.bf16.mxu0 %v23022_v8 }
 0x201   :  { %20079 = vmatpush3.bf16.msra.mxu1 %v26018_v3 }
 0x202   :  { %20119 = vmatpush3.bf16.msra.mxu0 %v23029_v61  ;;  %20081 = vmatprep.subr.bf16.mxu1 %v26019_v40 }
 0x203   :  { %20153 = vmatprep.subr.bf16.mxu0 %v22579_v20 }
 0x205   :  { %1773 = vmatmul.mubr.f32.vlgmr.msra.gmra.mrb[12].mxu0 %v1292_v28  ;;  %20083 = vmatpush3.bf16.msra.mxu1 %v26020_v37 }
 0x206   :  { %20155 = vmatpush3.bf16.msra.mxu0 %v22588_v26  ;;  %2043 = vmatprep.mubr.f32.mxu0 %v23249_v13 }
 0x207   :  { %20085 = vmatprep.subr.bf16.mxu1 %v23069_v41  ;;  %20157 = vmatprep.subr.bf16.mxu0 %v22601_v34 }
 0x209   :  { %20087 = vmatpush3.bf16.msra.mxu1 %v23073_v52 }
 0x20a   :  { %20159 = vmatpush3.bf16.msra.mxu0 %v22644_v57  ;;  %20121 = vmatprep.subr.bf16.mxu1 %v23162_v19 }
 0x20b   :  { %20161 = vmatprep.subr.bf16.mxu0 %v22674_v15 }
 0x20c   :  { %1665 = vmatmul.mubr.f32.vlgmr.msra.gmra.mrb[8].mxu1 %v1291_v51 }
 0x20d   :  { %20123 = vmatpush3.bf16.msra.mxu1 %v23171_v55  ;;  %1939 = vmatprep.mubr.f32.mxu1 %v23249_v13 }
 0x20e   :  { %20163 = vmatpush3.bf16.msra.mxu0 %v22684_v23  ;;  %20125 = vmatprep.subr.bf16.mxu1 %v23179_v6 }
 0x20f   :  { %20165 = vmatprep.subr.bf16.mxu0 %v22707_v48 }
 0x211   :  { %20127 = vmatpush3.bf16.msra.mxu1 %v23188_v49 }
 0x212   :  { %20167 = vmatpush3.bf16.msra.mxu0 %v22730_v5  ;;  %20129 = vmatprep.subr.bf16.mxu1 %v23196_v38 }
 0x213   :  { %20169 = vmatprep.subr.bf16.mxu0 %v25937_v33 }
 0x215   :  { %20131 = vmatpush3.bf16.msra.mxu1 %v23204_v4 }
 0x216   :  { %20171 = vmatpush3.bf16.msra.mxu0 %v25941_v31  ;;  %20133 = vmatprep.subr.bf16.mxu1 %v23212_v32 }
 0x217   :  { %20173 = vmatprep.subr.bf16.mxu0 %v22993_v60 }
 0x219   :  { %20135 = vmatpush3.bf16.msra.mxu1 %v23220_v25  ;;  %v2061_v25 = vld [vmem:[#allocation7] sm:$0xff] }
 0x21a   :  { %20175 = vmatpush3.bf16.msra.mxu0 %v23002_v47  ;;  %20137 = vmatprep.subr.bf16.mxu1 %v23228_v21 }
 0x21b   :  { %20177 = vmatprep.subr.bf16.mxu0 %v23009_v1 }
 0x21d   :  { %20139 = vmatpush3.bf16.msra.mxu1 %v23236_v46 }
 0x21e   :  { %20179 = vmatpush3.bf16.msra.mxu0 %v23013_v11  ;;  %20141 = vmatprep.subr.bf16.mxu1 %v23244_v27 }
 0x21f   :  { %20181 = vmatprep.subr.bf16.mxu0 %v23022_v8 }
 0x221   :  { %20143 = vmatpush3.bf16.msra.mxu1 %v23256_v35 }
 0x222   :  { %20183 = vmatpush3.bf16.msra.mxu0 %v23029_v61  ;;  %20145 = vmatprep.subr.bf16.mxu1 %v23264_v43 }
 0x225   :  { %2045 = vmatmul.mubr.f32.vlgmr.msra.gmra.mrb[14].mxu0 %v23321_v29  ;;  %20147 = vmatpush3.bf16.msra.mxu1 %v23276_v30 }
 0x226   :  { %20149 = vmatprep.subr.bf16.mxu1 %v23285_v22  ;;  %v2062_v22 = vld [vmem:[#allocation7 + $0x8] sm:$0xff]  ;;  %2763 = vmatprep.mubr.f32.mxu0 %v25800_v16 }
 0x229   :  { %20151 = vmatpush3.bf16.msra.mxu1 %v23294_v18  ;;  %v23405_v18 = vand.u32 4294901760, %v2062_v22 }
 0x22b   :  { %26021 = vst [vmem:[#allocation39_spill] sm:$0xff] %v23405_v18  ;;  %2068 = vmatprep.subr.mxu1 %v23405_v18 }
 0x22c   :  { %1941 = vmatmul.mubr.f32.vlgmr.msra.gmra.mrb[10].mxu1 %v23321_v29  ;;  %v23407_v29 = vand.u32 4294901760, %v2061_v25 }
 0x22d   :  { %2133 = vmatprep.mubr.f32.mxu1 %v25800_v16 }
 0x22e   :  { %26022 = vst [vmem:[#allocation40_spill] sm:$0xff] %v23407_v29  ;;  %2070 = vmatpush1.msra.mxu1 %v23407_v29 }
 0x257   :  { %v16366_v13 = vpop.f32.mrb[4].mxu0 }
 0x258   :  { %v16367_v28 = vpop.f32.mrb[5].mxu0 }
 0x259   :  { %v16368_v51 = vadd.f32 %v16367_v28, %v16366_v13 }
 0x25f   :  { %v16331_v9 = vpop.f32.mrb[0].mxu1 }
 0x260   :  { %v16332_v62 = vpop.f32.mrb[1].mxu1 }
 0x261   :  { %v16333_v35 = vadd.f32 %v16332_v62, %v16331_v9 }
 0x263   :  { %v651_v59 = vadd.f32 %v16368_v51, %v16333_v35 }
 0x277   :  { %v16436_v14 = vpop.f32.mrb[6].mxu0 }
 0x278   :  { %v16437_v27 = vpop.f32.mrb[7].mxu0 }
 0x279   :  { %v16438_v43 = vadd.f32 %v16437_v27, %v16436_v14  ;;  %v23413_v27 = vsub.f32 %v2062_v22, %v23405_v18 }
 0x27b   :  { %26023 = vst [vmem:[#allocation43_spill] sm:$0xff] %v23413_v27  ;;  %2697 = vmatprep.subr.mxu0 %v23413_v27  ;;  %v23423_v22 = vand.u32 4294901760, %v23413_v27 }
 0x27d   :  { %26025 = vst [vmem:[#allocation49_spill] sm:$0xff] %v23423_v22  ;;  %v2148_v62 = vsub.f32 %v23413_v27, %v23423_v22 }
 0x27f   :  { %v16401_v46 = vpop.f32.mrb[2].mxu1  ;;  %v23427_v9 = vand.u32 4294901760, %v2148_v62 }
 0x280   :  { %v16402_v36 = vpop.f32.mrb[3].mxu1 }
 0x281   :  { %v16403_v17 = vadd.f32 %v16402_v36, %v16401_v46  ;;  %v23416_v46 = vsub.f32 %v2061_v25, %v23407_v29  ;;  %26026 = vst [vmem:[#allocation23_spill] sm:$0xff] %v23427_v9  ;;  %2150 = vmatprep.subr.mxu1 %v23427_v9 }
 0x283   :  { %v789_v30 = vadd.f32 %v16403_v17, %v651_v59  ;;  %26024 = vst [vmem:[#allocation44_spill] sm:$0xff] %v23416_v46  ;;  %2700 = vmatpush1.msra.mxu0 %v23416_v46 }
 0x284   :  { %2773 = vmatprep.subr.mxu0 %v23405_v18 }
 0x285   :  { %v897_v21 = vadd.f32 %v16438_v43, %v789_v30 }
 0x298   :  { %v16506_v35 = vpop.f32.mrb[8].mxu0 }
 0x299   :  { %v16507_v43 = vpop.f32.mrb[9].mxu0 }
 0x29a   :  { %v16508_v30 = vadd.f32 %v16507_v43, %v16506_v35 }
 0x29f   :  { %v16471_v17 = vpop.f32.mrb[4].mxu1 }
 0x2a0   :  { %v16472_v36 = vpop.f32.mrb[5].mxu1 }
 0x2a1   :  { %v16473_v14 = vadd.f32 %v16472_v36, %v16471_v17 }
 0x2a3   :  { %v1065_v59 = vadd.f32 %v16473_v14, %v897_v21 }
 0x2a5   :  { %v1169_v25 = vadd.f32 %v16508_v30, %v1065_v59 }
 0x2a7   :  { %v2050_v55 = vmul.f32 0.0078125, %v1169_v25 }
 0x2a9   :  { %v2052_v19 = vmul.f32 %v2050_v55, %v2050_v55 }
 0x2b8   :  { %v16576_v13 = vpop.f32.mrb[10].mxu0 }
 0x2b9   :  { %v16577_v28 = vpop.f32.mrb[11].mxu0 }
 0x2ba   :  { %v16578_v51 = vadd.f32 %v16577_v28, %v16576_v13 }
 0x2bf   :  { %v16541_v16 = vpop.f32.mrb[6].mxu1 }
 0x2c0   :  { %v16542_v35 = vpop.f32.mrb[7].mxu1 }
 0x2c1   :  { %v16543_v43 = vadd.f32 %v16542_v35, %v16541_v16 }
 0x2c3   :  { %v1529_v12 = vadd.f32 %v16578_v51, %v16543_v43  ;;  %v2054_v43 = vld [vmem:[#allocation10] sm:$0x1] }
 0x2d8   :  { %v16646_v17 = vpop.f32.mrb[12].mxu0 }
 0x2d9   :  { %v16647_v21 = vpop.f32.mrb[13].mxu0 }
 0x2da   :  { %v16648_v36 = vadd.f32 %v16647_v21, %v16646_v17 }
 0x2df   :  { %v16611_v14 = vpop.f32.mrb[8].mxu1 }
 0x2e0   :  { %v16612_v32 = vpop.f32.mrb[9].mxu1 }
 0x2e1   :  { %v16613_v30 = vadd.f32 %v16612_v32, %v16611_v14 }
 0x2e3   :  { %v1667_v59 = vadd.f32 %v16613_v30, %v1529_v12  ;;  %v2058_v12 = vld [vmem:[#allocation11] sm:$0x1] }
 0x2e5   :  { %v1775_v4 = vadd.f32 %v16648_v36, %v1667_v59 }
 0x2f8   :  { %v16716_v44 = vpop.f32.mrb[14].mxu0 }
 0x2f9   :  { %v16717_v62 = vpop.f32.mrb[15].mxu0 }
 0x2fa   :  { %v16718_v39 = vadd.f32 %v16717_v62, %v16716_v44  ;;  %v23432_v44 = vand.u32 4294901760, %v23416_v46  ;;  %v26029_v62 = vmov 0.0  }
 0x2fc   :  { %26027 = vst [vmem:[#allocation50_spill] sm:$0xff] %v23432_v44 }
 0x2ff   :  { %v16681_v38 = vpop.f32.mrb[10].mxu1 }
 0x300   :  { %v16682_v49 = vpop.f32.mrb[11].mxu1 }
 0x301   :  { %v16683_v6 = vadd.f32 %v16682_v49, %v16681_v38 }
 0x303   :  { %v1943_v13 = vadd.f32 %v16683_v6, %v1775_v4 }
 0x305   :  { %v2047_v28 = vadd.f32 %v16718_v39, %v1943_v13 }
 0x307   :  { %v2051_v16 = vmul.f32 0.0078125, %v2047_v28 }
 0x309   :  { %v2053_v51 = vsub.f32 %v2051_v16, %v2052_v19  ;;  %v2154_v19 = vsub.f32 %v23416_v46, %v23432_v44 }
 0x30b   :  { %v2055_v35 = vadd.f32 1e-05, %v2053_v51  ;;  %v22032_v51 = vld [vmem:[%s25660_s2 + $0x4] ss:$8 sps:$4 sm:$0xff]  }
 0x30d   :  { %22167 = vrsqrt.f32 %v2055_v35  ;;  %v22030_v35 = vld [vmem:[%s25660_s2] ss:$8 sps:$4 sm:$0xff]  }
 0x317   :  { %v22168_v17 = vpop.eup %22167 }
 0x318   :  { %v2057_v32 = vmul.f32 %v22168_v17, %v2054_v43  ;;  %v22035_v43 = vld [vmem:[%s25660_s2 + $0x14] ss:$8 sps:$4 sm:$0xff]   ;;  %v22033_v17 = vld [vmem:[%s25660_s2 + $0x10] ss:$8 sps:$4 sm:$0xff]  }
 0x31a   :  { %v2059_v21 = vmul.f32 %v2057_v32, %v2050_v55  ;;  %v2065_v36 = vsel %vm2063_vm2, %v2057_v32, 0  ;;  %v23440_v55 = vand.u32 4294901760, %v2154_v19  ;;  %v22038_v32 = vld [vmem:[%s25660_s2 + $0x24] ss:$8 sps:$4 sm:$0xff]   ;;  %v22048_v19 = vld [vmem:[%s25660_s2 + $0x60] ss:$8 sps:$4 sm:$0xff]  }
 0x31b   :  { %v2134_v49 = vand.u32 4294901760, %v2065_v36 }
 0x31c   :  { %v2060_v38 = vsub.f32 %v2058_v12, %v2059_v21  ;;  %26028 = vst [vmem:[#allocation51_spill] sm:$0xff] %v23440_v55  ;;  %v22036_v12 = vld [vmem:[%s25660_s2 + $0x20] ss:$8 sps:$4 sm:$0xff]   ;;  %v22041_v21 = vld [vmem:[%s25660_s2 + $0x34] ss:$8 sps:$4 sm:$0xff]  }
 0x31d   :  { %v2135_v6 = vsub.f32 %v2065_v36, %v2134_v49  ;;  %v22039_v36 = vld [vmem:[%s25660_s2 + $0x30] ss:$8 sps:$4 sm:$0xff]  }
 0x31e   :  { %v2533_v4 = vsel %vm2063_vm2, %v2060_v38, 0  ;;  %v22042_v38 = vld [vmem:[%s25660_s2 + $0x40] ss:$8 sps:$4 sm:$0xff]  }
 0x31f   :  { %v23437_v39 = vand.u32 4294901760, %v2533_v4  ;;  %v2136_v25 = vand.u32 4294901760, %v2135_v6 }
 0x321   :  { %v2603_v14 = vsub.f32 %v2533_v4, %v23437_v39  ;;  %v2137_v30 = vsub.f32 %v2135_v6, %v2136_v25  ;;  %v22045_v4 = vld [vmem:[%s25660_s2 + $0x50] ss:$8 sps:$4 sm:$0xff]  }
 0x323   :  { %2766 = vmatmul.mubr.f32.vlgmr.msra.gmra.mrb[16].mxu0 %v2603_v14  ;;  %v2138_v59 = vand.u32 4294901760, %v2137_v30  ;;  %v2604_v13 = vand.u32 4294901760, %v2603_v14  ;;  %v22056_v30 = vld [vmem:[%s25660_s2 + $0x84] ss:$8 sps:$4 sm:$0xff]  }
 0x324   :  { %2775 = vmatpush1.msra.mxu0 %v23407_v29  ;;  %2838 = vmatprep.mubr.f32.mxu0 %v26029_v62 }
 0x325   :  { %2139 = vmatmul.mubr.f32.vlgmr.msra.gmra.mrb[12].mxu1 %v2138_v59  ;;  %2851 = vmatprep.subr.mxu0 %v23423_v22  ;;  %v2605_v28 = vsub.f32 %v2603_v14, %v2604_v13  ;;  %v22051_v14 = vld [vmem:[%s25660_s2 + $0x70] ss:$8 sps:$4 sm:$0xff]   ;;  %v22054_v59 = vld [vmem:[%s25660_s2 + $0x80] ss:$8 sps:$4 sm:$0xff]  }
 0x326   :  { %2156 = vmatpush1.msra.mxu1 %v23440_v55  ;;  %2219 = vmatprep.mubr.f32.mxu1 %v26029_v62 }
 0x327   :  { %2229 = vmatprep.subr.mxu1 %v23413_v27  ;;  %v2606_v16 = vand.u32 4294901760, %v2605_v28  ;;  %v22057_v28 = vld [vmem:[%s25660_s2 + $0x90] ss:$8 sps:$4 sm:$0xff]  }
 0x328   :  { %v26049_v27 = vld [vmem:[#allocation59_spill] sm:$0xff] }
 0x32b   :  { %2842 = vmatmul.mubr.f32.vlgmr.msra.gmra.mrb[16].mxu0 %v2604_v13  ;;  %v22059_v13 = vld [vmem:[%s25660_s2 + $0x94] ss:$8 sps:$4 sm:$0xff]  }
 0x32c   :  { %2855 = vmatpush1.msra.mxu0 %v23432_v44  ;;  %2918 = vmatprep.mubr.f32.mxu0 %v26029_v62 }
 0x32d   :  { %2221 = vmatmul.mubr.f32.vlgmr.msra.gmra.mrb[12].mxu1 %v2134_v49  ;;  %2927 = vmatprep.subr.mxu0 %v23405_v18 }
 0x32e   :  { %2232 = vmatpush1.msra.mxu1 %v23416_v46  ;;  %2295 = vmatprep.mubr.f32.mxu1 %v26029_v62  ;;  %v26048_v46 = vld [vmem:[#allocation31_spill] sm:$0xff] }
 0x32f   :  { %2305 = vmatprep.subr.mxu1 %v23405_v18 }
 0x333   :  { %2920 = vmatmul.mubr.f32.vlgmr.msra.gmra.mrb[16].mxu0 %v23437_v39 }
 0x334   :  { %2929 = vmatpush1.msra.mxu0 %v23407_v29  ;;  %2992 = vmatprep.mubr.f32.mxu0 %v26029_v62 }
 0x335   :  { %2298 = vmatmul.mubr.f32.vlgmr.msra.gmra.mrb[12].mxu1 %v2135_v6  ;;  %20185 = vmatprep.subr.bf16.mxu0 %v22579_v20  ;;  %v22047_v6 = vld [vmem:[%s25660_s2 + $0x54] ss:$8 sps:$4 sm:$0xff]  }
 0x336   :  { %2307 = vmatpush1.msra.mxu1 %v23407_v29  ;;  %2370 = vmatprep.mubr.f32.mxu1 %v26029_v62 }
 0x337   :  { %2383 = vmatprep.subr.mxu1 %v23423_v22  ;;  %v26047_v22 = vld [vmem:[#allocation30_spill] sm:$0xff] }
 0x33b   :  { %2994 = vmatmul.mubr.f32.vlgmr.msra.gmra.mrb[16].mxu0 %v23437_v39 }
 0x33c   :  { %20187 = vmatpush3.bf16.msra.mxu0 %v22588_v26 }
 0x33d   :  { %2374 = vmatmul.mubr.f32.vlgmr.msra.gmra.mrb[12].mxu1 %v2136_v25  ;;  %20189 = vmatprep.subr.bf16.mxu0 %v22601_v34  ;;  %v22053_v25 = vld [vmem:[%s25660_s2 + $0x74] ss:$8 sps:$4 sm:$0xff]  }
 0x33e   :  { %2387 = vmatpush1.msra.mxu1 %v23432_v44  ;;  %2450 = vmatprep.mubr.f32.mxu1 %v26029_v62 }
 0x33f   :  { %2459 = vmatprep.subr.mxu1 %v23405_v18 }
 0x340   :  { %20191 = vmatpush3.bf16.msra.mxu0 %v22644_v57 }
 0x341   :  { %20193 = vmatprep.subr.bf16.mxu0 %v22674_v15 }
 0x344   :  { %20195 = vmatpush3.bf16.msra.mxu0 %v22684_v23 }
 0x345   :  { %2452 = vmatmul.mubr.f32.vlgmr.msra.gmra.mrb[12].mxu1 %v2134_v49  ;;  %20197 = vmatprep.subr.bf16.mxu0 %v22707_v48 }
 0x346   :  { %2461 = vmatpush1.msra.mxu1 %v23407_v29  ;;  %2524 = vmatprep.mubr.f32.mxu1 %v26029_v62 }
 0x347   :  { %2536 = vmatprep.subr.mxu1 %v23405_v18  ;;  %v26054_v18 = vld [vmem:[#allocation62_spill] sm:$0xff] }
 0x348   :  { %20199 = vmatpush3.bf16.msra.mxu0 %v22730_v5 }
 0x349   :  { %20201 = vmatprep.subr.bf16.mxu0 %v25937_v33 }
 0x34c   :  { %20203 = vmatpush3.bf16.msra.mxu0 %v25941_v31 }
 0x34d   :  { %2526 = vmatmul.mubr.f32.vlgmr.msra.gmra.mrb[12].mxu1 %v2134_v49  ;;  %20205 = vmatprep.subr.bf16.mxu0 %v22993_v60  ;;  %v22044_v49 = vld [vmem:[%s25660_s2 + $0x44] ss:$8 sps:$4 sm:$0xff]  }
 0x34e   :  { %2538 = vmatpush1.msra.mxu1 %v23407_v29  ;;  %2601 = vmatprep.mubr.f32.mxu1 %v26029_v62 }
 0x34f   :  { %2618 = vmatprep.subr.mxu1 %v23427_v9 }
 0x350   :  { %20207 = vmatpush3.bf16.msra.mxu0 %v23002_v47 }
 0x351   :  { %2607 = vmatmul.mubr.f32.vlgmr.msra.gmra.mrb[14].mxu1 %v2606_v16  ;;  %20209 = vmatprep.subr.bf16.mxu0 %v23009_v1  ;;  %v22062_v16 = vld [vmem:[%s25660_s2 + $0xa4] ss:$8 sps:$4 sm:$0xff]  }
 0x352   :  { %2624 = vmatpush1.msra.mxu1 %v23440_v55  ;;  %2687 = vmatprep.mubr.f32.mxu1 %v26029_v62  ;;  %v26051_v55 = vld [vmem:[#allocation32_spill] sm:$0xff]  ;;  %v26052_v62 = vld [vmem:[#allocation33_spill] sm:$0xff] }
 0x353   :  { %3216 = vmatprep.subr.bf16.mxu1 %v22032_v51  ;;  %v22060_v51 = vld [vmem:[%s25660_s2 + $0xa0] ss:$8 sps:$4 sm:$0xff]  }
 0x354   :  { %20211 = vmatpush3.bf16.msra.mxu0 %v23013_v11 }
 0x355   :  { %20213 = vmatprep.subr.bf16.mxu0 %v23022_v8 }
 0x358   :  { %20215 = vmatpush3.bf16.msra.mxu0 %v23029_v61 }
 0x359   :  { %2689 = vmatmul.mubr.f32.vlgmr.msra.gmra.mrb[14].mxu1 %v23437_v39  ;;  %20217 = vmatprep.subr.bf16.mxu0 %v25988_v50  ;;  %v22050_v39 = vld [vmem:[%s25660_s2 + $0x64] ss:$8 sps:$4 sm:$0xff]  }
 0x35a   :  { %3217 = vmatpush1.bf16.msra.mxu1 %v22030_v35  ;;  %v22063_v35 = vld [vmem:[%s25660_s2 + $0xb0] ss:$8 sps:$4 sm:$0xff]  }
 0x35b   :  { %3218 = vmatprep.subr.bf16.mxu1 %v22035_v43  ;;  %v22065_v43 = vld [vmem:[%s25660_s2 + $0xb4] ss:$8 sps:$4 sm:$0xff]  }
 0x35e   :  { %3219 = vmatpush1.bf16.msra.mxu1 %v22033_v17  ;;  %v22068_v17 = vld [vmem:[%s25660_s2 + $0xc4] ss:$8 sps:$4 sm:$0xff]  }
 0x35f   :  { %3220 = vmatprep.subr.bf16.mxu1 %v22038_v32  ;;  %v22066_v32 = vld [vmem:[%s25660_s2 + $0xc0] ss:$8 sps:$4 sm:$0xff]  }
 0x362   :  { %3221 = vmatpush1.bf16.msra.mxu1 %v22036_v12  ;;  %v22071_v12 = vld [vmem:[%s25660_s2 + $0xd4] ss:$8 sps:$4 sm:$0xff]  }
 0x363   :  { %3222 = vmatprep.subr.bf16.mxu1 %v22041_v21  ;;  %v22069_v21 = vld [vmem:[%s25660_s2 + $0xd0] ss:$8 sps:$4 sm:$0xff]  }
 0x366   :  { %3223 = vmatpush1.bf16.msra.mxu1 %v22039_v36  ;;  %v22074_v36 = vld [vmem:[%s25660_s2 + $0xe4] ss:$8 sps:$4 sm:$0xff]  }
 0x367   :  { %3224 = vmatprep.subr.bf16.mxu1 %v22044_v49  ;;  %v22072_v49 = vld [vmem:[%s25660_s2 + $0xe0] ss:$8 sps:$4 sm:$0xff]  }
 0x36a   :  { %3225 = vmatpush1.bf16.msra.mxu1 %v22042_v38  ;;  %v22077_v38 = vld [vmem:[%s25660_s2 + $0xf4] ss:$8 sps:$4 sm:$0xff]  }
 0x36b   :  { %3226 = vmatprep.subr.bf16.mxu1 %v22047_v6  ;;  %v22075_v6 = vld [vmem:[%s25660_s2 + $0xf0] ss:$8 sps:$4 sm:$0xff]  }
 0x36e   :  { %3227 = vmatpush1.bf16.msra.mxu1 %v22045_v4 }
 0x36f   :  { %3228 = vmatprep.subr.bf16.mxu1 %v22050_v39  ;;  %v3000_v39 = vlaneseq }
 0x372   :  { %3229 = vmatpush1.bf16.msra.mxu1 %v22048_v19 }
 0x373   :  { %3230 = vmatprep.subr.bf16.mxu1 %v22053_v25  ;;  %v3001_v25 = vshrl.u32 %v3000_v39, 7 }
 0x376   :  { %3231 = vmatpush1.bf16.msra.mxu1 %v22051_v14  ;;  %v23587_v14 = vsub.s32 0, %v3001_v25 }
 0x377   :  { %3232 = vmatprep.subr.bf16.mxu1 %v22056_v30 }
 0x378   :  { %26030 = vst [vmem:[#allocation52_spill] sm:$0xff] %v23587_v14 }
 0x37a   :  { %3233 = vmatpush1.bf16.msra.mxu1 %v22054_v59 }
 0x37b   :  { %3234 = vmatprep.subr.bf16.mxu1 %v22059_v13 }
 0x37e   :  { %3235 = vmatpush1.bf16.msra.mxu1 %v22057_v28 }
 0x37f   :  { %3236 = vmatprep.subr.bf16.mxu1 %v22062_v16 }
 0x382   :  { %3237 = vmatpush1.bf16.msra.mxu1 %v22060_v51  ;;  %v26031_v51 = vld [vmem:[#allocation55_spill] sm:$0xff] }
 0x383   :  { %3238 = vmatprep.subr.bf16.mxu1 %v22065_v43 }
 0x386   :  { %3239 = vmatpush1.bf16.msra.mxu1 %v22063_v35 }
 0x387   :  { %3240 = vmatprep.subr.bf16.mxu1 %v22068_v17 }
 0x38a   :  { %3241 = vmatpush1.bf16.msra.mxu1 %v22066_v32 }
 0x38b   :  { %3242 = vmatprep.subr.bf16.mxu1 %v22071_v12 }
 0x38e   :  { %3243 = vmatpush1.bf16.msra.mxu1 %v22069_v21 }
 0x38f   :  { %3244 = vmatprep.subr.bf16.mxu1 %v22074_v36 }
 0x392   :  { %3245 = vmatpush1.bf16.msra.mxu1 %v22072_v49 }
 0x393   :  { %3246 = vmatprep.subr.bf16.mxu1 %v22077_v38 }
 0x396   :  { %3247 = vmatpush1.bf16.msra.mxu1 %v22075_v6 }
 0x397   :  { %20249 = vmatprep.subr.bf16.mxu1 %v26014_v2 }
 0x40e   :  { %v2995_v4 = vpop.f32.mrb[16].mxu0 }
 0x40f   :  { %v2997_v19 = vpop.f32.mrb[17].mxu0 }
 0x420   :  { %v2527_v30 = vpop.f32.mrb[12].mxu1 }
 0x421   :  { %v3003_v59 = vrot.slane %v2527_v30, %v23587_v14  ;;  %v2529_v13 = vpop.f32.mrb[13].mxu1 }
 0x422   :  { %v3007_v28 = vrot.slane %v2529_v13, %v23587_v14 }
 0x423   :  { %v3008_v16 = vmul.f32 %v3003_v59, %v23075_v54  ;;  %v26032_v54 = vld [vmem:[#allocation41_spill] sm:$0xff] }
 0x424   :  { %v3009_v35 = vmul.f32 %v3007_v28, %v26031_v51 }
 0x42c   :  { %v2690_v43 = vpop.f32.mrb[14].mxu1 }
 0x42d   :  { %v21816_v17 = vadd.f32 %v2995_v4, %v2690_v43  ;;  %v2692_v32 = vpop.f32.mrb[15].mxu1 }
 0x42e   :  { %v21817_v12 = vadd.f32 %v2997_v19, %v2692_v32 }
 0x42f   :  { %v3013_v21 = vrot.slane %v21816_v17, %v23587_v14 }
 0x430   :  { %v3017_v36 = vrot.slane %v21817_v12, %v23587_v14 }
 0x431   :  { %v3018_v49 = vadd.f32 %v3013_v21, %v3008_v16 }
 0x432   :  { %v3019_v38 = vadd.f32 %v3017_v36, %v3009_v35 }
 0x433   :  { %v3020_v6 = vmax.f32 %v3018_v49, 0.0 }
 0x434   :  { %v3021_v39 = vmax.f32 %v3019_v38, 0.0 }
 0x435   :  { %v3022_v30 = vpack.c.bf16 %v3020_v6, %v3020_v6 }
 0x436   :  { %v3023_v25 = vpack.c.bf16 %v3021_v39, %v3021_v39 }
 0x438   :  { %3248 = vmatprep.mubr.bf16.mxu1 %v3023_v25 }
 0x439   :  { %3249 = vmatmul.mubr.bf16.vlgmr.msra.gmra.mrb[16].mxu1 %v3022_v30 }
 0x43a   :  { %20251 = vmatpush3.bf16.msra.mxu1 %v23100_v7 }
 0x43b   :  { %20253 = vmatprep.subr.bf16.mxu1 %v23105_v58 }
 0x43e   :  { %20255 = vmatpush3.bf16.msra.mxu1 %v23111_v53 }
 0x43f   :  { %20257 = vmatprep.subr.bf16.mxu1 %v23116_v10 }
 0x442   :  { %20259 = vmatpush3.bf16.msra.mxu1 %v23123_v63 }
 0x443   :  { %20261 = vmatprep.subr.bf16.mxu1 %v26015_v24 }
 0x446   :  { %20263 = vmatpush3.bf16.msra.mxu1 %v23135_v56 }
 0x447   :  { %20265 = vmatprep.subr.bf16.mxu1 %v26016_v42 }
 0x44a   :  { %20267 = vmatpush3.bf16.msra.mxu1 %v23049_v45 }
 0x44b   :  { %20269 = vmatprep.subr.bf16.mxu1 %v26017_v0 }
 0x44e   :  { %20271 = vmatpush3.bf16.msra.mxu1 %v26018_v3 }
 0x44f   :  { %20273 = vmatprep.subr.bf16.mxu1 %v26019_v40 }
 0x452   :  { %20275 = vmatpush3.bf16.msra.mxu1 %v26020_v37 }
 0x453   :  { %20277 = vmatprep.subr.bf16.mxu1 %v23069_v41 }
 0x456   :  { %20279 = vmatpush3.bf16.msra.mxu1 %v23073_v52 }
 0x457   :  { %20313 = vmatprep.subr.bf16.mxu1 %v26032_v54 }
 0x50c   :  { %v23611_v4 = vpop.f32.mrb[16].mxu1 }
 0x50d   :  { %26033 = vst [vmem:[#allocation53_spill] sm:$0xff] %v23611_v4  ;;  %v3257_v19 = vsel %vm295_vm1, %v23611_v4, 0.0  ;;  %v23615_v59 = vpop.f32.mrb[17].mxu1 }
 0x50e   :  { %26034 = vst [vmem:[#allocation54_spill] sm:$0xff] %v23615_v59  ;;  %v3258_v13 = vrot.slane %v3257_v19, 4  ;;  %v3264_v28 = vsel %vm295_vm1, %v23615_v59, 0.0  ;;  %v3254_v16 = vpop.f32.mrb[18].mxu1  ;;  %v4134_v17 = vmul.f32 %v23615_v59, %v23615_v59 }
 0x50f   :  { %v3265_v51 = vrot.slane %v3264_v28, 4  ;;  %v3255_v35 = vpop.f32.mrb[19].mxu1 }
 0x510   :  { %v3259_v43 = vadd.f32 %v3258_v13, %v3257_v19  ;;  %v4142_v49 = vsel %vm295_vm1, %v4134_v17, 0.0 }
 0x511   :  { %v3266_v32 = vadd.f32 %v3265_v51, %v3264_v28  ;;  %v4143_v39 = vrot.slane %v4142_v49, 4 }
 0x512   :  { %v3260_v12 = vrot.slane %v3259_v43, 2 }
 0x513   :  { %v3267_v21 = vrot.slane %v3266_v32, 2  ;;  %v4144_v16 = vadd.f32 %v4143_v39, %v4142_v49 }
 0x514   :  { %v3261_v36 = vadd.f32 %v3260_v12, %v3259_v43  ;;  %v26036_v12 = vld [vmem:[#allocation26_spill] sm:$0xff] }
 0x515   :  { %v3268_v38 = vadd.f32 %v3267_v21, %v3266_v32  ;;  %v4145_v51 = vrot.slane %v4144_v16, 2  ;;  %v26035_v32 = vld [vmem:[#allocation24_spill] sm:$0xff] }
 0x516   :  { %v3262_v6 = vrot.slane %v3261_v36, 1 }
 0x517   :  { %v3269_v25 = vrot.slane %v3268_v38, 1  ;;  %v4146_v21 = vadd.f32 %v4145_v51, %v4144_v16  ;;  %v26043_v51 = vld [vmem:[#allocation25_spill] sm:$0xff] }
 0x518   :  { %v3263_v30 = vadd.f32 %v3262_v6, %v3261_v36  ;;  %v26038_v6 = vld [vmem:[#allocation27_spill] sm:$0xff] }
 0x519   :  { %v3270_v14 = vadd.f32 %v3269_v25, %v3268_v38  ;;  %v26037_v38 = vld [vmem:[#allocation42_spill] sm:$0xff]  ;;  %v4147_v39 = vrot.slane %v4146_v21, 1  ;;  %v26039_v25 = vld [vmem:[#allocation21_spill] sm:$0xff] }
 0x51a   :  { %v23622_v44 = vand.u32 4294901760, %v3263_v30 }
 0x51b   :  { %v23624_v35 = vand.u32 4294901760, %v3270_v14  ;;  %v4148_v16 = vadd.f32 %v4147_v39, %v4146_v21  ;;  %v26050_v21 = vld [vmem:[#allocation60_spill] sm:$0xff] }
 0x51c   :  { %v23627_v19 = vsub.f32 %v3263_v30, %v23622_v44  ;;  %v26040_v30 = vld [vmem:[#allocation22_spill] sm:$0xff] }
 0x51d   :  { %v23630_v13 = vsub.f32 %v3270_v14, %v23624_v35  ;;  %v23658_v59 = vand.u32 4294901760, %v4148_v16 }
 0x51e   :  { %v25820_v28 = vand.u32 4294901760, %v23627_v19 }
 0x51f   :  { %3745 = vmatprep.mubr.f32.mxu1 %v23630_v13  ;;  %v25821_v43 = vand.u32 4294901760, %v23630_v13  ;;  %v23667_v9 = vsub.f32 %v4148_v16, %v23658_v59  ;;  %v26059_v16 = vld [vmem:[#allocation36_spill] sm:$0xff] }
 0x520   :  { %3748 = vmatmul.mubr.f32.vlgmr.msra.gmra.mrb[20].mxu1 %v23627_v19  ;;  %v3376_v17 = vsub.f32 %v23627_v19, %v25820_v28  ;;  %v26041_v28 = vld [vmem:[#allocation29_spill] sm:$0xff] }
 0x521   :  { %20315 = vmatpush3.bf16.msra.mxu1 %v26035_v32  ;;  %4022 = vmatprep.mubr.f32.mxu1 %v23624_v35  ;;  %v3370_v14 = vsub.f32 %v23630_v13, %v25821_v43  ;;  %v26042_v43 = vld [vmem:[#allocation56_spill] sm:$0xff] }
 0x522   :  { %20317 = vmatprep.subr.bf16.mxu1 %v26036_v12  ;;  %v3377_v49 = vand.u32 4294901760, %v3376_v17  ;;  %v26044_v17 = vld [vmem:[#allocation28_spill] sm:$0xff] }
 0x523   :  { %v3371_v36 = vand.u32 4294901760, %v3370_v14  ;;  %v26045_v14 = vld [vmem:[#allocation57_spill] sm:$0xff] }
 0x525   :  { %20319 = vmatpush3.bf16.msra.mxu1 %v26037_v38  ;;  %3372 = vmatprep.mubr.f32.mxu0 %v3371_v36  ;;  %v26046_v36 = vld [vmem:[#allocation58_spill] sm:$0xff] }
 0x526   :  { %3378 = vmatmul.mubr.f32.vlgmr.msra.gmra.mrb[18].mxu0 %v3377_v49  ;;  %20321 = vmatprep.subr.bf16.mxu1 %v26038_v6  ;;  %v4133_v49 = vmul.f32 %v23611_v4, %v23611_v4  ;;  %v26053_v4 = vld [vmem:[#allocation61_spill] sm:$0xff] }
 0x527   :  { %20219 = vmatpush3.bf16.msra.mxu0 %v26039_v25  ;;  %3608 = vmatprep.mubr.f32.mxu0 %v23624_v35 }
 0x528   :  { %20221 = vmatprep.subr.bf16.mxu0 %v26040_v30  ;;  %v4135_v39 = vsel %vm295_vm1, %v4133_v49, 0.0 }
 0x529   :  { %20323 = vmatpush3.bf16.msra.mxu1 %v26041_v28  ;;  %v4136_v29 = vrot.slane %v4135_v39, 4 }
 0x52a   :  { %20325 = vmatprep.subr.bf16.mxu1 %v26042_v43 }
 0x52b   :  { %20223 = vmatpush3.bf16.msra.mxu0 %v26043_v51  ;;  %v4137_v49 = vadd.f32 %v4136_v29, %v4135_v39  ;;  %v26063_v29 = vld [vmem:[#allocation47_spill] sm:$0xff] }
 0x52c   :  { %20225 = vmatprep.subr.bf16.mxu0 %v26044_v17 }
 0x52d   :  { %20327 = vmatpush3.bf16.msra.mxu1 %v26045_v14 }
 0x52e   :  { %20329 = vmatprep.subr.bf16.mxu1 %v26046_v36  ;;  %v26062_v36 = vld [vmem:[#allocation46_spill] sm:$0xff] }
 0x52f   :  { %20227 = vmatpush3.bf16.msra.mxu0 %v26047_v22  ;;  %v26055_v22 = vld [vmem:[#allocation34_spill] sm:$0xff] }
 0x530   :  { %20229 = vmatprep.subr.bf16.mxu0 %v26048_v46  ;;  %v26056_v46 = vld [vmem:[#allocation35_spill] sm:$0xff] }
 0x531   :  { %20331 = vmatpush3.bf16.msra.mxu1 %v26049_v27  ;;  %v25839_v27 = vand.u32 4294901760, %v23667_v9 }
 0x532   :  { %20333 = vmatprep.subr.bf16.mxu1 %v26050_v21  ;;  %v26057_v21 = vld [vmem:[#allocation37_spill] sm:$0xff] }
 0x533   :  { %20231 = vmatpush3.bf16.msra.mxu0 %v26051_v55  ;;  %v26058_v55 = vld [vmem:[#allocation38_spill] sm:$0xff] }
 0x534   :  { %20233 = vmatprep.subr.bf16.mxu0 %v26052_v62  ;;  %v26060_v62 = vld [vmem:[#allocation45_spill] sm:$0xff] }
 0x535   :  { %20335 = vmatpush3.bf16.msra.mxu1 %v26053_v4  ;;  %v4248_v4 = vsub.f32 %v23667_v9, %v25839_v27  ;;  %v26064_v27 = vld [vmem:[#allocation48_spill] sm:$0xff] }
 0x536   :  { %20337 = vmatprep.subr.bf16.mxu1 %v26054_v18  ;;  %v26061_v18 = vld [vmem:[#allocation20_spill] sm:$0xff] }
 0x537   :  { %20235 = vmatpush3.bf16.msra.mxu0 %v26055_v22  ;;  %v4138_v22 = vrot.slane %v4137_v49, 2 }
 0x538   :  { %20237 = vmatprep.subr.bf16.mxu0 %v26056_v46  ;;  %v4249_v46 = vand.u32 4294901760, %v4248_v4  ;;  %v26065_v4 = vand.u32 4294901760, %v23630_v13 }
 0x539   :  { %20339 = vmatpush3.bf16.msra.mxu1 %v26057_v21  ;;  %v4139_v39 = vadd.f32 %v4138_v22, %v4137_v49 }
 0x53a   :  { %20341 = vmatprep.subr.bf16.mxu1 %v26058_v55 }
 0x53b   :  { %20239 = vmatpush3.bf16.msra.mxu0 %v26059_v16 }
 0x53c   :  { %20241 = vmatprep.subr.bf16.mxu0 %v26060_v62 }
 0x53d   :  { %20343 = vmatpush3.bf16.msra.mxu1 %v26061_v18  ;;  %v4140_v18 = vrot.slane %v4139_v39, 1 }
 0x53e   :  { %20377 = vmatprep.subr.bf16.mxu1 %v22579_v20 }
 0x53f   :  { %20243 = vmatpush3.bf16.msra.mxu0 %v26062_v36 }
 0x540   :  { %4024 = vmatmul.mubr.f32.vlgmr.msra.gmra.mrb[22].mxu1 %v23622_v44  ;;  %20245 = vmatprep.subr.bf16.mxu0 %v26063_v29 }
 0x541   :  { %20379 = vmatpush3.bf16.msra.mxu1 %v22588_v26  ;;  %4250 = vmatprep.mubr.f32.mxu1 %v4249_v46  ;;  %v4141_v46 = vadd.f32 %v4140_v18, %v4139_v39 }
 0x542   :  { %20381 = vmatprep.subr.bf16.mxu1 %v22601_v34 }
 0x543   :  { %20247 = vmatpush3.bf16.msra.mxu0 %v26064_v27  ;;  %v23703_v22 = vand.u32 4294901760, %v4141_v46 }
 0x544   :  { %20281 = vmatprep.subr.bf16.mxu0 %v22579_v20 }
 0x545   :  { %20383 = vmatpush3.bf16.msra.mxu1 %v22644_v57  ;;  %v23711_v18 = vsub.f32 %v4141_v46, %v23703_v22  ;;  %v26070_v46 = vld [vmem:[#allocation59_spill] sm:$0xff] }
 0x546   :  { %3610 = vmatmul.mubr.f32.vlgmr.msra.gmra.mrb[20].mxu0 %v23622_v44  ;;  %20385 = vmatprep.subr.bf16.mxu1 %v22674_v15 }
 0x547   :  { %20283 = vmatpush3.bf16.msra.mxu0 %v22588_v26  ;;  %3852 = vmatprep.mubr.f32.mxu0 %v26065_v4  ;;  %v25840_v13 = vand.u32 4294901760, %v23711_v18  ;;  %v26066_v4 = vand.u32 4294901760, %v23627_v19  ;;  %v26069_v19 = vld [vmem:[#allocation31_spill] sm:$0xff] }
 0x548   :  { %20285 = vmatprep.subr.bf16.mxu0 %v22601_v34 }
 0x549   :  { %20387 = vmatpush3.bf16.msra.mxu1 %v22684_v23  ;;  %v4254_v49 = vsub.f32 %v23711_v18, %v25840_v13  ;;  %v26074_v13 = vld [vmem:[#allocation61_spill] sm:$0xff] }
 0x54a   :  { %20389 = vmatprep.subr.bf16.mxu1 %v22707_v48 }
 0x54b   :  { %20287 = vmatpush3.bf16.msra.mxu0 %v22644_v57  ;;  %v4255_v39 = vand.u32 4294901760, %v4254_v49  ;;  %v26071_v49 = vld [vmem:[#allocation60_spill] sm:$0xff] }
 0x54c   :  { %20289 = vmatprep.subr.bf16.mxu0 %v22674_v15 }
 0x54d   :  { %20391 = vmatpush3.bf16.msra.mxu1 %v22730_v5 }
 0x54e   :  { %20393 = vmatprep.subr.bf16.mxu1 %v25937_v33 }
 0x54f   :  { %20291 = vmatpush3.bf16.msra.mxu0 %v22684_v23 }
 0x550   :  { %20293 = vmatprep.subr.bf16.mxu0 %v22707_v48 }
 0x551   :  { %20395 = vmatpush3.bf16.msra.mxu1 %v25941_v31 }
 0x552   :  { %20397 = vmatprep.subr.bf16.mxu1 %v22993_v60 }
 0x553   :  { %20295 = vmatpush3.bf16.msra.mxu0 %v22730_v5 }
 0x554   :  { %20297 = vmatprep.subr.bf16.mxu0 %v25937_v33 }
 0x555   :  { %20399 = vmatpush3.bf16.msra.mxu1 %v23002_v47 }
 0x556   :  { %20401 = vmatprep.subr.bf16.mxu1 %v23009_v1 }
 0x557   :  { %20299 = vmatpush3.bf16.msra.mxu0 %v25941_v31 }
 0x558   :  { %20301 = vmatprep.subr.bf16.mxu0 %v22993_v60 }
 0x559   :  { %20403 = vmatpush3.bf16.msra.mxu1 %v23013_v11 }
 0x55a   :  { %20405 = vmatprep.subr.bf16.mxu1 %v23022_v8 }
 0x55b   :  { %20303 = vmatpush3.bf16.msra.mxu0 %v23002_v47 }
 0x55c   :  { %20305 = vmatprep.subr.bf16.mxu0 %v23009_v1 }
 0x55d   :  { %20407 = vmatpush3.bf16.msra.mxu1 %v23029_v61 }
 0x55e   :  { %20441 = vmatprep.subr.bf16.mxu1 %v26014_v2 }
 0x55f   :  { %20307 = vmatpush3.bf16.msra.mxu0 %v23013_v11 }
 0x560   :  { %4256 = vmatmul.mubr.f32.vlgmr.msra.gmra.mrb[24].mxu1 %v4255_v39  ;;  %20309 = vmatprep.subr.bf16.mxu0 %v23022_v8  ;;  %v26072_v39 = vld [vmem:[#allocation32_spill] sm:$0xff] }
 0x561   :  { %20443 = vmatpush3.bf16.msra.mxu1 %v23100_v7  ;;  %4623 = vmatprep.mubr.f32.mxu1 %v23667_v9 }
 0x562   :  { %20445 = vmatprep.subr.bf16.mxu1 %v23105_v58 }
 0x563   :  { %20311 = vmatpush3.bf16.msra.mxu0 %v23029_v61 }
 0x564   :  { %20345 = vmatprep.subr.bf16.mxu0 %v22579_v20 }
 0x565   :  { %20447 = vmatpush3.bf16.msra.mxu1 %v23111_v53 }
 0x566   :  { %3856 = vmatmul.mubr.f32.vlgmr.msra.gmra.mrb[22].mxu0 %v26066_v4  ;;  %20449 = vmatprep.subr.bf16.mxu1 %v23116_v10  ;;  %v26073_v4 = vld [vmem:[#allocation33_spill] sm:$0xff] }
 0x567   :  { %20347 = vmatpush3.bf16.msra.mxu0 %v22588_v26  ;;  %4126 = vmatprep.mubr.f32.mxu0 %v23624_v35  ;;  %v26067_v35 = vld [vmem:[#allocation58_spill] sm:$0xff] }
 0x568   :  { %20349 = vmatprep.subr.bf16.mxu0 %v22601_v34 }
 0x569   :  { %20451 = vmatpush3.bf16.msra.mxu1 %v23123_v63 }
 0x56a   :  { %20453 = vmatprep.subr.bf16.mxu1 %v26015_v24 }
 0x56b   :  { %20351 = vmatpush3.bf16.msra.mxu0 %v22644_v57 }
 0x56c   :  { %20353 = vmatprep.subr.bf16.mxu0 %v22674_v15 }
 0x56d   :  { %20455 = vmatpush3.bf16.msra.mxu1 %v23135_v56 }
 0x56e   :  { %20457 = vmatprep.subr.bf16.mxu1 %v26016_v42 }
 0x56f   :  { %20355 = vmatpush3.bf16.msra.mxu0 %v22684_v23 }
 0x570   :  { %20357 = vmatprep.subr.bf16.mxu0 %v22707_v48 }
 0x571   :  { %20459 = vmatpush3.bf16.msra.mxu1 %v23049_v45 }
 0x572   :  { %20461 = vmatprep.subr.bf16.mxu1 %v26017_v0 }
 0x573   :  { %20359 = vmatpush3.bf16.msra.mxu0 %v22730_v5 }
 0x574   :  { %20361 = vmatprep.subr.bf16.mxu0 %v25937_v33 }
 0x575   :  { %20463 = vmatpush3.bf16.msra.mxu1 %v26018_v3 }
 0x576   :  { %20465 = vmatprep.subr.bf16.mxu1 %v26019_v40 }
 0x577   :  { %20363 = vmatpush3.bf16.msra.mxu0 %v25941_v31 }
 0x578   :  { %20365 = vmatprep.subr.bf16.mxu0 %v22993_v60 }
 0x579   :  { %20467 = vmatpush3.bf16.msra.mxu1 %v26020_v37 }
 0x57a   :  { %20469 = vmatprep.subr.bf16.mxu1 %v23069_v41 }
 0x57b   :  { %20367 = vmatpush3.bf16.msra.mxu0 %v23002_v47 }
 0x57c   :  { %20369 = vmatprep.subr.bf16.mxu0 %v23009_v1 }
 0x57d   :  { %20471 = vmatpush3.bf16.msra.mxu1 %v23073_v52 }
 0x57e   :  { %20505 = vmatprep.subr.bf16.mxu1 %v26032_v54 }
 0x57f   :  { %20371 = vmatpush3.bf16.msra.mxu0 %v23013_v11 }
 0x580   :  { %4626 = vmatmul.mubr.f32.vlgmr.msra.gmra.mrb[26].mxu1 %v23711_v18  ;;  %20373 = vmatprep.subr.bf16.mxu0 %v23022_v8 }
 0x581   :  { %20507 = vmatpush3.bf16.msra.mxu1 %v26035_v32  ;;  %4900 = vmatprep.mubr.f32.mxu1 %v23658_v59 }
 0x582   :  { %20509 = vmatprep.subr.bf16.mxu1 %v26036_v12 }
 0x583   :  { %20375 = vmatpush3.bf16.msra.mxu0 %v23029_v61 }
 0x584   :  { %20409 = vmatprep.subr.bf16.mxu0 %v25988_v50 }
 0x585   :  { %20511 = vmatpush3.bf16.msra.mxu1 %v26037_v38 }
 0x586   :  { %4128 = vmatmul.mubr.f32.vlgmr.msra.gmra.mrb[24].mxu0 %v23622_v44  ;;  %20513 = vmatprep.subr.bf16.mxu1 %v26038_v6  ;;  %v26068_v44 = vld [vmem:[#allocation30_spill] sm:$0xff] }
 0x587   :  { %20411 = vmatpush3.bf16.msra.mxu0 %v26039_v25  ;;  %4486 = vmatprep.mubr.f32.mxu0 %v23658_v59 }
 0x588   :  { %20413 = vmatprep.subr.bf16.mxu0 %v26040_v30 }
 0x589   :  { %20515 = vmatpush3.bf16.msra.mxu1 %v26041_v28 }
 0x58a   :  { %20517 = vmatprep.subr.bf16.mxu1 %v26042_v43 }
 0x58b   :  { %20415 = vmatpush3.bf16.msra.mxu0 %v26043_v51  ;;  %v26075_v51 = vld [vmem:[#allocation62_spill] sm:$0xff] }
 0x58c   :  { %20417 = vmatprep.subr.bf16.mxu0 %v26044_v17  ;;  %v26076_v17 = vld [vmem:[#allocation34_spill] sm:$0xff] }
 0x58d   :  { %20519 = vmatpush3.bf16.msra.mxu1 %v26045_v14  ;;  %v26077_v14 = vld [vmem:[#allocation35_spill] sm:$0xff] }
 0x58e   :  { %20521 = vmatprep.subr.bf16.mxu1 %v26067_v35 }
 0x58f   :  { %20419 = vmatpush3.bf16.msra.mxu0 %v26068_v44 }
 0x590   :  { %20421 = vmatprep.subr.bf16.mxu0 %v26069_v19 }
 0x591   :  { %20523 = vmatpush3.bf16.msra.mxu1 %v26070_v46 }
 0x592   :  { %20525 = vmatprep.subr.bf16.mxu1 %v26071_v49  ;;  %v26078_v49 = vld [vmem:[#allocation20_spill] sm:$0xff] }
 0x593   :  { %20423 = vmatpush3.bf16.msra.mxu0 %v26072_v39  ;;  %v26079_v39 = vld [vmem:[#allocation39_spill] sm:$0xff] }
 0x594   :  { %20425 = vmatprep.subr.bf16.mxu0 %v26073_v4 }
 0x595   :  { %20527 = vmatpush3.bf16.msra.mxu1 %v26074_v13 }
 0x596   :  { %20529 = vmatprep.subr.bf16.mxu1 %v26075_v51 }
 0x597   :  { %20427 = vmatpush3.bf16.msra.mxu0 %v26076_v17  ;;  %v26080_v17 = vld [vmem:[#allocation40_spill] sm:$0xff] }
 0x598   :  { %20429 = vmatprep.subr.bf16.mxu0 %v26077_v14  ;;  %v26081_v14 = vmov 0.0  }
 0x599   :  { %20531 = vmatpush3.bf16.msra.mxu1 %v26057_v21  ;;  %v26082_v21 = vld [vmem:[#allocation23_spill] sm:$0xff] }
 0x59a   :  { %20533 = vmatprep.subr.bf16.mxu1 %v26058_v55 }
 0x59b   :  { %20431 = vmatpush3.bf16.msra.mxu0 %v26059_v16 }
 0x59c   :  { %20433 = vmatprep.subr.bf16.mxu0 %v26060_v62 }
 0x59d   :  { %20535 = vmatpush3.bf16.msra.mxu1 %v26078_v49 }
 0x59e   :  { %5026 = vmatprep.subr.mxu1 %v26079_v39 }
 0x59f   :  { %20435 = vmatpush3.bf16.msra.mxu0 %v26062_v36  ;;  %v26083_v36 = vand.u32 4294901760, %v23667_v9  ;;  %v26084_v9 = vand.u32 4294901760, %v23711_v18 }
 0x5a0   :  { %4902 = vmatmul.mubr.f32.vlgmr.msra.gmra.mrb[28].mxu1 %v23703_v22  ;;  %20437 = vmatprep.subr.bf16.mxu0 %v26063_v29 }
 0x5a1   :  { %5028 = vmatpush1.msra.mxu1 %v26080_v17  ;;  %5091 = vmatprep.mubr.f32.mxu1 %v26081_v14 }
 0x5a2   :  { %5108 = vmatprep.subr.mxu1 %v26082_v21 }
 0x5a3   :  { %20439 = vmatpush3.bf16.msra.mxu0 %v26064_v27 }
 0x5a4   :  { %20473 = vmatprep.subr.bf16.mxu0 %v22579_v20 }
 0x5a6   :  { %4488 = vmatmul.mubr.f32.vlgmr.msra.gmra.mrb[26].mxu0 %v23703_v22 }
 0x5a7   :  { %20475 = vmatpush3.bf16.msra.mxu0 %v22588_v26  ;;  %4730 = vmatprep.mubr.f32.mxu0 %v26083_v36 }
 0x5a8   :  { %20477 = vmatprep.subr.bf16.mxu0 %v22601_v34 }
 0x5ab   :  { %20479 = vmatpush3.bf16.msra.mxu0 %v22644_v57 }
 0x5ac   :  { %20481 = vmatprep.subr.bf16.mxu0 %v22674_v15 }
 0x5af   :  { %20483 = vmatpush3.bf16.msra.mxu0 %v22684_v23 }
 0x5b0   :  { %20485 = vmatprep.subr.bf16.mxu0 %v22707_v48 }
 0x5b3   :  { %20487 = vmatpush3.bf16.msra.mxu0 %v22730_v5 }
 0x5b4   :  { %20489 = vmatprep.subr.bf16.mxu0 %v25937_v33 }
 0x5b7   :  { %20491 = vmatpush3.bf16.msra.mxu0 %v25941_v31 }
 0x5b8   :  { %20493 = vmatprep.subr.bf16.mxu0 %v22993_v60 }
 0x5bb   :  { %20495 = vmatpush3.bf16.msra.mxu0 %v23002_v47 }
 0x5bc   :  { %20497 = vmatprep.subr.bf16.mxu0 %v23009_v1 }
 0x5bf   :  { %20499 = vmatpush3.bf16.msra.mxu0 %v23013_v11 }
 0x5c0   :  { %20501 = vmatprep.subr.bf16.mxu0 %v23022_v8 }
 0x5c3   :  { %20503 = vmatpush3.bf16.msra.mxu0 %v23029_v61 }
 0x5c4   :  { %20537 = vmatprep.subr.bf16.mxu0 %v22579_v20 }
 0x5c6   :  { %4734 = vmatmul.mubr.f32.vlgmr.msra.gmra.mrb[28].mxu0 %v26084_v9 }
 0x5c7   :  { %20539 = vmatpush3.bf16.msra.mxu0 %v22588_v26  ;;  %5004 = vmatprep.mubr.f32.mxu0 %v23658_v59 }
 0x5c8   :  { %20541 = vmatprep.subr.bf16.mxu0 %v22601_v34 }
 0x5cb   :  { %20543 = vmatpush3.bf16.msra.mxu0 %v22644_v57 }
 0x5cc   :  { %20545 = vmatprep.subr.bf16.mxu0 %v22674_v15 }
 0x5cf   :  { %20547 = vmatpush3.bf16.msra.mxu0 %v22684_v23 }
 0x5d0   :  { %20549 = vmatprep.subr.bf16.mxu0 %v22707_v48 }
 0x5d3   :  { %20551 = vmatpush3.bf16.msra.mxu0 %v22730_v5 }
 0x5d4   :  { %20553 = vmatprep.subr.bf16.mxu0 %v25937_v33 }
 0x5d7   :  { %20555 = vmatpush3.bf16.msra.mxu0 %v25941_v31 }
 0x5d8   :  { %20557 = vmatprep.subr.bf16.mxu0 %v22993_v60 }
 0x5db   :  { %20559 = vmatpush3.bf16.msra.mxu0 %v23002_v47 }
 0x5dc   :  { %20561 = vmatprep.subr.bf16.mxu0 %v23009_v1 }
 0x5df   :  { %20563 = vmatpush3.bf16.msra.mxu0 %v23013_v11 }
 0x5e0   :  { %20565 = vmatprep.subr.bf16.mxu0 %v23022_v8 }
 0x5e3   :  { %20567 = vmatpush3.bf16.msra.mxu0 %v23029_v61 }
 0x5e4   :  { %5494 = vmatprep.subr.mxu0 %v26079_v39 }
 0x5e6   :  { %5006 = vmatmul.mubr.f32.vlgmr.msra.gmra.mrb[30].mxu0 %v23703_v22 }
 0x5e7   :  { %5496 = vmatpush1.msra.mxu0 %v26080_v17  ;;  %5559 = vmatprep.mubr.f32.mxu0 %v26081_v14 }
 0x5e8   :  { %5576 = vmatprep.subr.mxu0 %v26082_v21 }
 0x5f3   :  { %v16821_v59 = vpop.f32.mrb[20].mxu1 }
 0x5f4   :  { %v16822_v36 = vpop.f32.mrb[21].mxu1 }
 0x5f5   :  { %v16823_v18 = vadd.f32 %v16822_v36, %v16821_v59 }
 0x5f9   :  { %v16751_v9 = vpop.f32.mrb[18].mxu0 }
 0x5fa   :  { %v16752_v27 = vpop.f32.mrb[19].mxu0 }
 0x5fb   :  { %v16753_v29 = vadd.f32 %v16752_v27, %v16751_v9 }
 0x613   :  { %v16891_v49 = vpop.f32.mrb[22].mxu1 }
 0x614   :  { %v16892_v62 = vpop.f32.mrb[23].mxu1 }
 0x615   :  { %v16893_v16 = vadd.f32 %v16892_v62, %v16891_v49 }
 0x619   :  { %v16786_v55 = vpop.f32.mrb[20].mxu0 }
 0x61a   :  { %v16787_v51 = vpop.f32.mrb[21].mxu0 }
 0x61b   :  { %v16788_v13 = vadd.f32 %v16787_v51, %v16786_v55 }
 0x61d   :  { %v3612_v4 = vadd.f32 %v16788_v13, %v16753_v29 }
 0x61f   :  { %v3750_v22 = vadd.f32 %v16823_v18, %v3612_v4 }
 0x633   :  { %v16961_v46 = vpop.f32.mrb[24].mxu1 }
 0x634   :  { %v16962_v19 = vpop.f32.mrb[25].mxu1 }
 0x635   :  { %v16963_v44 = vadd.f32 %v16962_v19, %v16961_v46 }
 0x639   :  { %v16856_v35 = vpop.f32.mrb[22].mxu0 }
 0x63a   :  { %v16857_v43 = vpop.f32.mrb[23].mxu0 }
 0x63b   :  { %v16858_v21 = vadd.f32 %v16857_v43, %v16856_v35 }
 0x63d   :  { %v3858_v28 = vadd.f32 %v16858_v21, %v3750_v22 }
 0x63f   :  { %v4026_v30 = vadd.f32 %v16893_v16, %v3858_v28 }
 0x653   :  { %v17031_v59 = vpop.f32.mrb[26].mxu1 }
 0x654   :  { %v17032_v36 = vpop.f32.mrb[27].mxu1 }
 0x655   :  { %v17033_v25 = vadd.f32 %v17032_v36, %v17031_v59 }
 0x659   :  { %v16926_v27 = vpop.f32.mrb[24].mxu0 }
 0x65a   :  { %v16927_v9 = vpop.f32.mrb[25].mxu0 }
 0x65b   :  { %v16928_v6 = vadd.f32 %v16927_v9, %v16926_v27 }
 0x65d   :  { %v4130_v62 = vadd.f32 %v16928_v6, %v4026_v30 }
 0x65f   :  { %v5011_v22 = vmul.f32 0.0078125, %v4130_v62 }
 0x661   :  { %v5013_v27 = vmul.f32 %v5011_v22, %v5011_v22 }
 0x673   :  { %v17101_v49 = vpop.f32.mrb[28].mxu1 }
 0x674   :  { %v17102_v38 = vpop.f32.mrb[29].mxu1 }
 0x675   :  { %v17103_v55 = vadd.f32 %v17102_v38, %v17101_v49  ;;  %v5015_v38 = vld [vmem:[#allocation10 + $0x1] sm:$0x1] }
 0x679   :  { %v16996_v51 = vpop.f32.mrb[26].mxu0 }
 0x67a   :  { %v16997_v29 = vpop.f32.mrb[27].mxu0 }
 0x67b   :  { %v16998_v13 = vadd.f32 %v16997_v29, %v16996_v51 }
 0x67d   :  { %v4490_v4 = vadd.f32 %v16998_v13, %v16963_v44  ;;  %v5019_v44 = vld [vmem:[#allocation11 + $0x1] sm:$0x1] }
 0x67f   :  { %v4628_v19 = vadd.f32 %v17033_v25, %v4490_v4 }
 0x699   :  { %v17066_v46 = vpop.f32.mrb[28].mxu0 }
 0x69a   :  { %v17067_v18 = vpop.f32.mrb[29].mxu0 }
 0x69b   :  { %v17068_v43 = vadd.f32 %v17067_v18, %v17066_v46 }
 0x69d   :  { %v4736_v21 = vadd.f32 %v17068_v43, %v4628_v19 }
 0x69f   :  { %v4904_v28 = vadd.f32 %v17103_v55, %v4736_v21 }
 0x6b9   :  { %v17136_v16 = vpop.f32.mrb[30].mxu0 }
 0x6ba   :  { %v17137_v35 = vpop.f32.mrb[31].mxu0 }
 0x6bb   :  { %v17138_v59 = vadd.f32 %v17137_v35, %v17136_v16  ;;  %v26085_v35 = vld [vmem:[#allocation51_spill] sm:$0xff] }
 0x6bd   :  { %v5008_v36 = vadd.f32 %v17138_v59, %v4904_v28 }
 0x6bf   :  { %v5012_v6 = vmul.f32 0.0078125, %v5008_v36  ;;  %v26086_v36 = vld [vmem:[#allocation43_spill] sm:$0xff] }
 0x6c1   :  { %v5014_v30 = vsub.f32 %v5012_v6, %v5013_v27  ;;  %v26088_v27 = vld [vmem:[#allocation49_spill] sm:$0xff]  ;;  %v26089_v6 = vld [vmem:[#allocation50_spill] sm:$0xff] }
 0x6c3   :  { %v5016_v9 = vadd.f32 1e-05, %v5014_v30  ;;  %v22080_v30 = vld [vmem:[%s25661_s3 + $0x4] ss:$8 sps:$4 sm:$0xff]  }
 0x6c5   :  { %22169 = vrsqrt.f32 %v5016_v9  ;;  %v22078_v9 = vld [vmem:[%s25661_s3] ss:$8 sps:$4 sm:$0xff]  }
 0x6cf   :  { %v22170_v49 = vpop.eup %22169 }
 0x6d0   :  { %v5018_v51 = vmul.f32 %v22170_v49, %v5015_v38  ;;  %v22083_v38 = vld [vmem:[%s25661_s3 + $0x14] ss:$8 sps:$4 sm:$0xff]   ;;  %v22081_v49 = vld [vmem:[%s25661_s3 + $0x10] ss:$8 sps:$4 sm:$0xff]  }
 0x6d2   :  { %v5023_v25 = vsel %vm2063_vm2, %v5018_v51, 0  ;;  %v5020_v29 = vmul.f32 %v5018_v51, %v5011_v22  ;;  %v26087_v22 = vld [vmem:[#allocation44_spill] sm:$0xff]  ;;  %v22086_v51 = vld [vmem:[%s25661_s3 + $0x24] ss:$8 sps:$4 sm:$0xff]  }
 0x6d3   :  { %v5092_v13 = vand.u32 4294901760, %v5023_v25 }
 0x6d4   :  { %v5021_v4 = vsub.f32 %v5019_v44, %v5020_v29  ;;  %v22084_v44 = vld [vmem:[%s25661_s3 + $0x20] ss:$8 sps:$4 sm:$0xff]   ;;  %v22087_v29 = vld [vmem:[%s25661_s3 + $0x30] ss:$8 sps:$4 sm:$0xff]  }
 0x6d5   :  { %v5093_v55 = vsub.f32 %v5023_v25, %v5092_v13  ;;  %v22089_v25 = vld [vmem:[%s25661_s3 + $0x34] ss:$8 sps:$4 sm:$0xff]  }
 0x6d6   :  { %v5491_v19 = vsel %vm2063_vm2, %v5021_v4, 0  ;;  %v22090_v4 = vld [vmem:[%s25661_s3 + $0x40] ss:$8 sps:$4 sm:$0xff]  }
 0x6d7   :  { %v5094_v62 = vand.u32 4294901760, %v5093_v55  ;;  %v5560_v46 = vand.u32 4294901760, %v5491_v19 }
 0x6d9   :  { %v5095_v18 = vsub.f32 %v5093_v55, %v5094_v62  ;;  %v5561_v43 = vsub.f32 %v5491_v19, %v5560_v46  ;;  %v22093_v19 = vld [vmem:[%s25661_s3 + $0x50] ss:$8 sps:$4 sm:$0xff]  }
 0x6db   :  { %v5096_v21 = vand.u32 4294901760, %v5095_v18  ;;  %v5562_v28 = vand.u32 4294901760, %v5561_v43  ;;  %v22101_v18 = vld [vmem:[%s25661_s3 + $0x74] ss:$8 sps:$4 sm:$0xff]  }
 0x6dd   :  { %5097 = vmatmul.mubr.f32.vlgmr.msra.gmra.mrb[30].mxu1 %v5096_v21  ;;  %v5563_v16 = vsub.f32 %v5561_v43, %v5562_v28  ;;  %v22104_v21 = vld [vmem:[%s25661_s3 + $0x84] ss:$8 sps:$4 sm:$0xff]  }
 0x6de   :  { %5114 = vmatpush1.msra.mxu1 %v26085_v35  ;;  %5177 = vmatprep.mubr.f32.mxu1 %v26081_v14 }
 0x6df   :  { %v5564_v59 = vand.u32 4294901760, %v5563_v16  ;;  %5187 = vmatprep.subr.mxu1 %v26086_v36  ;;  %v22107_v16 = vld [vmem:[%s25661_s3 + $0x94] ss:$8 sps:$4 sm:$0xff]  }
 0x6e1   :  { %5565 = vmatmul.mubr.f32.vlgmr.msra.gmra.mrb[32].mxu0 %v5564_v59  ;;  %v22105_v59 = vld [vmem:[%s25661_s3 + $0x90] ss:$8 sps:$4 sm:$0xff]  }
 0x6e2   :  { %5582 = vmatpush1.msra.mxu0 %v26085_v35  ;;  %5645 = vmatprep.mubr.f32.mxu0 %v26081_v14 }
 0x6e3   :  { %5655 = vmatprep.subr.mxu0 %v26086_v36  ;;  %v26109_v36 = vld [vmem:[#allocation32_spill] sm:$0xff] }
 0x6e5   :  { %5179 = vmatmul.mubr.f32.vlgmr.msra.gmra.mrb[30].mxu1 %v5092_v13 }
 0x6e6   :  { %5190 = vmatpush1.msra.mxu1 %v26087_v22  ;;  %5253 = vmatprep.mubr.f32.mxu1 %v26081_v14 }
 0x6e7   :  { %5263 = vmatprep.subr.mxu1 %v26079_v39 }
 0x6e9   :  { %5647 = vmatmul.mubr.f32.vlgmr.msra.gmra.mrb[32].mxu0 %v5560_v46 }
 0x6ea   :  { %5658 = vmatpush1.msra.mxu0 %v26087_v22  ;;  %5721 = vmatprep.mubr.f32.mxu0 %v26081_v14  ;;  %v26107_v22 = vld [vmem:[#allocation59_spill] sm:$0xff] }
 0x6eb   :  { %5731 = vmatprep.subr.mxu0 %v26079_v39 }
 0x6ed   :  { %5256 = vmatmul.mubr.f32.vlgmr.msra.gmra.mrb[30].mxu1 %v5093_v55  ;;  %v22095_v55 = vld [vmem:[%s25661_s3 + $0x54] ss:$8 sps:$4 sm:$0xff]  }
 0x6ee   :  { %5265 = vmatpush1.msra.mxu1 %v26080_v17  ;;  %5328 = vmatprep.mubr.f32.mxu1 %v26081_v14 }
 0x6ef   :  { %5341 = vmatprep.subr.mxu1 %v26088_v27 }
 0x6f1   :  { %5724 = vmatmul.mubr.f32.vlgmr.msra.gmra.mrb[32].mxu0 %v5561_v43  ;;  %v22099_v43 = vld [vmem:[%s25661_s3 + $0x70] ss:$8 sps:$4 sm:$0xff]  }
 0x6f2   :  { %5733 = vmatpush1.msra.mxu0 %v26080_v17  ;;  %5796 = vmatprep.mubr.f32.mxu0 %v26081_v14 }
 0x6f3   :  { %5809 = vmatprep.subr.mxu0 %v26088_v27 }
 0x6f5   :  { %5332 = vmatmul.mubr.f32.vlgmr.msra.gmra.mrb[30].mxu1 %v5094_v62  ;;  %v22098_v62 = vld [vmem:[%s25661_s3 + $0x64] ss:$8 sps:$4 sm:$0xff]  }
 0x6f6   :  { %5345 = vmatpush1.msra.mxu1 %v26089_v6  ;;  %5408 = vmatprep.mubr.f32.mxu1 %v26081_v14 }
 0x6f7   :  { %5417 = vmatprep.subr.mxu1 %v26079_v39 }
 0x6f9   :  { %5800 = vmatmul.mubr.f32.vlgmr.msra.gmra.mrb[32].mxu0 %v5562_v28  ;;  %v22102_v28 = vld [vmem:[%s25661_s3 + $0x80] ss:$8 sps:$4 sm:$0xff]  }
 0x6fa   :  { %5813 = vmatpush1.msra.mxu0 %v26089_v6  ;;  %5876 = vmatprep.mubr.f32.mxu0 %v26081_v14 }
 0x6fb   :  { %5885 = vmatprep.subr.mxu0 %v26079_v39  ;;  %v26112_v39 = vld [vmem:[#allocation62_spill] sm:$0xff] }
 0x6fd   :  { %5410 = vmatmul.mubr.f32.vlgmr.msra.gmra.mrb[30].mxu1 %v5092_v13 }
 0x6fe   :  { %5419 = vmatpush1.msra.mxu1 %v26080_v17  ;;  %5482 = vmatprep.mubr.f32.mxu1 %v26081_v14 }
 0x6ff   :  { %6174 = vmatprep.subr.bf16.mxu1 %v22080_v30  ;;  %v22110_v30 = vld [vmem:[%s25661_s3 + $0xa4] ss:$8 sps:$4 sm:$0xff]  }
 0x701   :  { %5878 = vmatmul.mubr.f32.vlgmr.msra.gmra.mrb[32].mxu0 %v5560_v46 }
 0x702   :  { %5887 = vmatpush1.msra.mxu0 %v26080_v17  ;;  %5950 = vmatprep.mubr.f32.mxu0 %v26081_v14  ;;  %v26110_v14 = vld [vmem:[#allocation33_spill] sm:$0xff] }
 0x703   :  { %20569 = vmatprep.subr.bf16.mxu0 %v22579_v20 }
 0x705   :  { %5484 = vmatmul.mubr.f32.vlgmr.msra.gmra.mrb[30].mxu1 %v5092_v13  ;;  %v22092_v13 = vld [vmem:[%s25661_s3 + $0x44] ss:$8 sps:$4 sm:$0xff]  }
 0x706   :  { %6175 = vmatpush1.bf16.msra.mxu1 %v22078_v9  ;;  %v22108_v9 = vld [vmem:[%s25661_s3 + $0xa0] ss:$8 sps:$4 sm:$0xff]  }
 0x707   :  { %6176 = vmatprep.subr.bf16.mxu1 %v22083_v38  ;;  %v22113_v38 = vld [vmem:[%s25661_s3 + $0xb4] ss:$8 sps:$4 sm:$0xff]  }
 0x709   :  { %5952 = vmatmul.mubr.f32.vlgmr.msra.gmra.mrb[32].mxu0 %v5560_v46  ;;  %v22096_v46 = vld [vmem:[%s25661_s3 + $0x60] ss:$8 sps:$4 sm:$0xff]  }
 0x70a   :  { %6177 = vmatpush1.bf16.msra.mxu1 %v22081_v49  ;;  %20571 = vmatpush3.bf16.msra.mxu0 %v22588_v26  ;;  %v22111_v49 = vld [vmem:[%s25661_s3 + $0xb0] ss:$8 sps:$4 sm:$0xff]  }
 0x70b   :  { %6178 = vmatprep.subr.bf16.mxu1 %v22086_v51  ;;  %20573 = vmatprep.subr.bf16.mxu0 %v22601_v34  ;;  %v22116_v51 = vld [vmem:[%s25661_s3 + $0xc4] ss:$8 sps:$4 sm:$0xff]  }
 0x70e   :  { %6179 = vmatpush1.bf16.msra.mxu1 %v22084_v44  ;;  %20575 = vmatpush3.bf16.msra.mxu0 %v22644_v57  ;;  %v22114_v44 = vld [vmem:[%s25661_s3 + $0xc0] ss:$8 sps:$4 sm:$0xff]  }
 0x70f   :  { %6180 = vmatprep.subr.bf16.mxu1 %v22089_v25  ;;  %20577 = vmatprep.subr.bf16.mxu0 %v22674_v15  ;;  %v22119_v25 = vld [vmem:[%s25661_s3 + $0xd4] ss:$8 sps:$4 sm:$0xff]  }
 0x712   :  { %6181 = vmatpush1.bf16.msra.mxu1 %v22087_v29  ;;  %20579 = vmatpush3.bf16.msra.mxu0 %v22684_v23  ;;  %v22117_v29 = vld [vmem:[%s25661_s3 + $0xd0] ss:$8 sps:$4 sm:$0xff]  }
 0x713   :  { %6182 = vmatprep.subr.bf16.mxu1 %v22092_v13  ;;  %20581 = vmatprep.subr.bf16.mxu0 %v22707_v48  ;;  %v22122_v13 = vld [vmem:[%s25661_s3 + $0xe4] ss:$8 sps:$4 sm:$0xff]  }
 0x716   :  { %6183 = vmatpush1.bf16.msra.mxu1 %v22090_v4  ;;  %20583 = vmatpush3.bf16.msra.mxu0 %v22730_v5  ;;  %v22120_v4 = vld [vmem:[%s25661_s3 + $0xe0] ss:$8 sps:$4 sm:$0xff]  }
 0x717   :  { %6184 = vmatprep.subr.bf16.mxu1 %v22095_v55  ;;  %20585 = vmatprep.subr.bf16.mxu0 %v25937_v33  ;;  %v22125_v55 = vld [vmem:[%s25661_s3 + $0xf4] ss:$8 sps:$4 sm:$0xff]  }
 0x71a   :  { %6185 = vmatpush1.bf16.msra.mxu1 %v22093_v19  ;;  %20587 = vmatpush3.bf16.msra.mxu0 %v25941_v31  ;;  %v22123_v19 = vld [vmem:[%s25661_s3 + $0xf0] ss:$8 sps:$4 sm:$0xff]  }
 0x71b   :  { %6186 = vmatprep.subr.bf16.mxu1 %v22098_v62  ;;  %20589 = vmatprep.subr.bf16.mxu0 %v22993_v60 }
 0x71e   :  { %6187 = vmatpush1.bf16.msra.mxu1 %v22096_v46  ;;  %20591 = vmatpush3.bf16.msra.mxu0 %v23002_v47  ;;  %v26090_v46 = vld [vmem:[#allocation52_spill] sm:$0xff] }
 0x71f   :  { %6188 = vmatprep.subr.bf16.mxu1 %v22101_v18  ;;  %20593 = vmatprep.subr.bf16.mxu0 %v23009_v1 }
 0x722   :  { %6189 = vmatpush1.bf16.msra.mxu1 %v22099_v43  ;;  %20595 = vmatpush3.bf16.msra.mxu0 %v23013_v11 }
 0x723   :  { %6190 = vmatprep.subr.bf16.mxu1 %v22104_v21  ;;  %20597 = vmatprep.subr.bf16.mxu0 %v23022_v8 }
 0x726   :  { %6191 = vmatpush1.bf16.msra.mxu1 %v22102_v28  ;;  %20599 = vmatpush3.bf16.msra.mxu0 %v23029_v61  ;;  %v26091_v28 = vld [vmem:[#allocation53_spill] sm:$0xff] }
 0x727   :  { %6192 = vmatprep.subr.bf16.mxu1 %v22107_v16  ;;  %20601 = vmatprep.subr.bf16.mxu0 %v25988_v50 }
 0x72a   :  { %6193 = vmatpush1.bf16.msra.mxu1 %v22105_v59  ;;  %v26092_v59 = vld [vmem:[#allocation54_spill] sm:$0xff] }
 0x72b   :  { %6194 = vmatprep.subr.bf16.mxu1 %v22110_v30 }
 0x72e   :  { %6195 = vmatpush1.bf16.msra.mxu1 %v22108_v9 }
 0x72f   :  { %6196 = vmatprep.subr.bf16.mxu1 %v22113_v38 }
 0x732   :  { %6197 = vmatpush1.bf16.msra.mxu1 %v22111_v49 }
 0x733   :  { %6198 = vmatprep.subr.bf16.mxu1 %v22116_v51 }
 0x736   :  { %6199 = vmatpush1.bf16.msra.mxu1 %v22114_v44 }
 0x737   :  { %6200 = vmatprep.subr.bf16.mxu1 %v22119_v25 }
 0x73a   :  { %6201 = vmatpush1.bf16.msra.mxu1 %v22117_v29 }
 0x73b   :  { %6202 = vmatprep.subr.bf16.mxu1 %v22122_v13 }
 0x73e   :  { %6203 = vmatpush1.bf16.msra.mxu1 %v22120_v4 }
 0x73f   :  { %6204 = vmatprep.subr.bf16.mxu1 %v22125_v55 }
 0x742   :  { %6205 = vmatpush1.bf16.msra.mxu1 %v22123_v19 }
 0x743   :  { %20633 = vmatprep.subr.bf16.mxu1 %v26014_v2 }
 0x7d8   :  { %v5485_v62 = vpop.f32.mrb[30].mxu1 }
 0x7d9   :  { %v5961_v18 = vrot.slane %v5485_v62, %v26090_v46  ;;  %v5487_v43 = vpop.f32.mrb[31].mxu1 }
 0x7da   :  { %v5965_v21 = vrot.slane %v5487_v43, %v26090_v46 }
 0x7db   :  { %v5966_v16 = vmul.f32 %v5961_v18, %v26091_v28 }
 0x7dc   :  { %v5967_v30 = vmul.f32 %v5965_v21, %v26092_v59  ;;  %v5953_v9 = vpop.f32.mrb[32].mxu0 }
 0x7dd   :  { %v5971_v38 = vrot.slane %v5953_v9, %v26090_v46  ;;  %v5955_v49 = vpop.f32.mrb[33].mxu0 }
 0x7de   :  { %v5975_v51 = vrot.slane %v5955_v49, %v26090_v46 }
 0x7df   :  { %v5976_v44 = vadd.f32 %v5971_v38, %v5966_v16 }
 0x7e0   :  { %v5977_v25 = vadd.f32 %v5975_v51, %v5967_v30 }
 0x7e1   :  { %v5978_v29 = vmax.f32 %v5976_v44, 0.0 }
 0x7e2   :  { %v5979_v13 = vmax.f32 %v5977_v25, 0.0 }
 0x7e3   :  { %v5980_v55 = vpack.c.bf16 %v5978_v29, %v5978_v29 }
 0x7e4   :  { %v5981_v4 = vpack.c.bf16 %v5979_v13, %v5979_v13 }
 0x7e6   :  { %6206 = vmatprep.mubr.bf16.mxu1 %v5981_v4 }
 0x7e7   :  { %6207 = vmatmul.mubr.bf16.vlgmr.msra.gmra.mrb[32].mxu1 %v5980_v55 }
 0x7e8   :  { %20635 = vmatpush3.bf16.msra.mxu1 %v23100_v7 }
 0x7e9   :  { %20637 = vmatprep.subr.bf16.mxu1 %v23105_v58 }
 0x7ec   :  { %20639 = vmatpush3.bf16.msra.mxu1 %v23111_v53 }
 0x7ed   :  { %20641 = vmatprep.subr.bf16.mxu1 %v23116_v10 }
 0x7f0   :  { %20643 = vmatpush3.bf16.msra.mxu1 %v23123_v63 }
 0x7f1   :  { %20645 = vmatprep.subr.bf16.mxu1 %v26015_v24 }
 0x7f4   :  { %20647 = vmatpush3.bf16.msra.mxu1 %v23135_v56 }
 0x7f5   :  { %20649 = vmatprep.subr.bf16.mxu1 %v26016_v42 }
 0x7f8   :  { %20651 = vmatpush3.bf16.msra.mxu1 %v23049_v45 }
 0x7f9   :  { %20653 = vmatprep.subr.bf16.mxu1 %v26017_v0 }
 0x7fc   :  { %20655 = vmatpush3.bf16.msra.mxu1 %v26018_v3 }
 0x7fd   :  { %20657 = vmatprep.subr.bf16.mxu1 %v26019_v40 }
 0x800   :  { %20659 = vmatpush3.bf16.msra.mxu1 %v26020_v37 }
 0x801   :  { %20661 = vmatprep.subr.bf16.mxu1 %v23069_v41 }
 0x804   :  { %20663 = vmatpush3.bf16.msra.mxu1 %v23073_v52 }
 0x805   :  { %20697 = vmatprep.subr.bf16.mxu1 %v26032_v54 }
 0x8ba   :  { %v24017_v19 = vpop.f32.mrb[32].mxu1 }
 0x8bb   :  { %26093 = vst [vmem:[#allocation55_spill] sm:$0xff] %v24017_v19  ;;  %v6215_v62 = vsel %vm295_vm1, %v24017_v19, 0.0  ;;  %v24021_v18 = vpop.f32.mrb[33].mxu1 }
 0x8bc   :  { %26094 = vst [vmem:[#allocation41_spill] sm:$0xff] %v24021_v18  ;;  %v6216_v43 = vrot.slane %v6215_v62, 4  ;;  %v6222_v21 = vsel %vm295_vm1, %v24021_v18, 0.0  ;;  %v6212_v28 = vpop.f32.mrb[34].mxu1  ;;  %v7092_v9 = vmul.f32 %v24021_v18, %v24021_v18  ;;  %v26106_v18 = vld [vmem:[#allocation31_spill] sm:$0xff] }
 0x8bd   :  { %v6223_v16 = vrot.slane %v6222_v21, 4  ;;  %v6213_v59 = vpop.f32.mrb[35].mxu1 }
 0x8be   :  { %v6217_v30 = vadd.f32 %v6216_v43, %v6215_v62  ;;  %v7100_v25 = vsel %vm295_vm1, %v7092_v9, 0.0 }
 0x8bf   :  { %v6224_v38 = vadd.f32 %v6223_v16, %v6222_v21  ;;  %v7101_v4 = vrot.slane %v7100_v25, 4 }
 0x8c0   :  { %v6218_v49 = vrot.slane %v6217_v30, 2 }
 0x8c1   :  { %v6225_v51 = vrot.slane %v6224_v38, 2  ;;  %v7102_v28 = vadd.f32 %v7101_v4, %v7100_v25  ;;  %v26099_v4 = vld [vmem:[#allocation29_spill] sm:$0xff] }
 0x8c2   :  { %v6219_v44 = vadd.f32 %v6218_v49, %v6217_v30 }
 0x8c3   :  { %v6226_v29 = vadd.f32 %v6225_v51, %v6224_v38  ;;  %v7103_v16 = vrot.slane %v7102_v28, 2  ;;  %v26095_v51 = vld [vmem:[#allocation42_spill] sm:$0xff] }
 0x8c4   :  { %v6220_v13 = vrot.slane %v6219_v44, 1 }
 0x8c5   :  { %v6227_v55 = vrot.slane %v6226_v29, 1 }
 0x8c6   :  { %v6221_v46 = vadd.f32 %v6220_v13, %v6219_v44  ;;  %v26096_v44 = vld [vmem:[#allocation27_spill] sm:$0xff]  ;;  %v26098_v13 = vld [vmem:[#allocation22_spill] sm:$0xff] }
 0x8c7   :  { %v6228_v6 = vadd.f32 %v6227_v55, %v6226_v29  ;;  %v26097_v29 = vld [vmem:[#allocation21_spill] sm:$0xff]  ;;  %v26100_v55 = vld [vmem:[#allocation56_spill] sm:$0xff] }
 0x8c8   :  { %v24028_v27 = vand.u32 4294901760, %v6221_v46 }
 0x8c9   :  { %v24030_v59 = vand.u32 4294901760, %v6228_v6 }
 0x8ca   :  { %v24033_v62 = vsub.f32 %v6221_v46, %v24028_v27  ;;  %v7104_v46 = vadd.f32 %v7103_v16, %v7102_v28  ;;  %v26101_v16 = vld [vmem:[#allocation25_spill] sm:$0xff] }
 0x8cb   :  { %v24036_v43 = vsub.f32 %v6228_v6, %v24030_v59 }
 0x8cc   :  { %v25861_v21 = vand.u32 4294901760, %v24033_v62  ;;  %v7105_v25 = vrot.slane %v7104_v46, 1 }
 0x8cd   :  { %6703 = vmatprep.mubr.f32.mxu1 %v24036_v43  ;;  %v25862_v30 = vand.u32 4294901760, %v24036_v43 }
 0x8ce   :  { %6706 = vmatmul.mubr.f32.vlgmr.msra.gmra.mrb[36].mxu1 %v24033_v62  ;;  %v6334_v9 = vsub.f32 %v24033_v62, %v25861_v21  ;;  %v7106_v28 = vadd.f32 %v7105_v25, %v7104_v46  ;;  %v26108_v46 = vld [vmem:[#allocation60_spill] sm:$0xff] }
 0x8cf   :  { %20699 = vmatpush3.bf16.msra.mxu1 %v26035_v32  ;;  %6980 = vmatprep.mubr.f32.mxu1 %v24030_v59  ;;  %v6328_v6 = vsub.f32 %v24036_v43, %v25862_v30  ;;  %v26105_v30 = vld [vmem:[#allocation30_spill] sm:$0xff] }
 0x8d0   :  { %20701 = vmatprep.subr.bf16.mxu1 %v26036_v12  ;;  %v6335_v49 = vand.u32 4294901760, %v6334_v9  ;;  %v26102_v9 = vld [vmem:[#allocation28_spill] sm:$0xff]  ;;  %v24064_v21 = vand.u32 4294901760, %v7106_v28 }
 0x8d1   :  { %v6329_v38 = vand.u32 4294901760, %v6328_v6  ;;  %v26103_v6 = vld [vmem:[#allocation57_spill] sm:$0xff] }
 0x8d2   :  { %v24073_v35 = vsub.f32 %v7106_v28, %v24064_v21  ;;  %v26117_v28 = vld [vmem:[#allocation36_spill] sm:$0xff] }
 0x8d3   :  { %20703 = vmatpush3.bf16.msra.mxu1 %v26095_v51  ;;  %6330 = vmatprep.mubr.f32.mxu0 %v6329_v38  ;;  %v26104_v38 = vld [vmem:[#allocation58_spill] sm:$0xff] }
 0x8d4   :  { %6336 = vmatmul.mubr.f32.vlgmr.msra.gmra.mrb[34].mxu0 %v6335_v49  ;;  %20705 = vmatprep.subr.bf16.mxu1 %v26096_v44  ;;  %v7091_v49 = vmul.f32 %v24017_v19, %v24017_v19  ;;  %v26111_v19 = vld [vmem:[#allocation61_spill] sm:$0xff] }
 0x8d5   :  { %20603 = vmatpush3.bf16.msra.mxu0 %v26097_v29  ;;  %6566 = vmatprep.mubr.f32.mxu0 %v24030_v59 }
 0x8d6   :  { %20605 = vmatprep.subr.bf16.mxu0 %v26098_v13  ;;  %v7093_v25 = vsel %vm295_vm1, %v7091_v49, 0.0 }
 0x8d7   :  { %20707 = vmatpush3.bf16.msra.mxu1 %v26099_v4  ;;  %v7094_v17 = vrot.slane %v7093_v25, 4 }
 0x8d8   :  { %20709 = vmatprep.subr.bf16.mxu1 %v26100_v55 }
 0x8d9   :  { %20607 = vmatpush3.bf16.msra.mxu0 %v26101_v16  ;;  %v7095_v49 = vadd.f32 %v7094_v17, %v7093_v25  ;;  %v26121_v17 = vld [vmem:[#allocation47_spill] sm:$0xff] }
 0x8da   :  { %20609 = vmatprep.subr.bf16.mxu0 %v26102_v9 }
 0x8db   :  { %20711 = vmatpush3.bf16.msra.mxu1 %v26103_v6 }
 0x8dc   :  { %20713 = vmatprep.subr.bf16.mxu1 %v26104_v38  ;;  %v26120_v38 = vld [vmem:[#allocation46_spill] sm:$0xff] }
 0x8dd   :  { %20611 = vmatpush3.bf16.msra.mxu0 %v26105_v30  ;;  %v26113_v30 = vld [vmem:[#allocation34_spill] sm:$0xff] }
 0x8de   :  { %20613 = vmatprep.subr.bf16.mxu0 %v26106_v18  ;;  %v26114_v18 = vld [vmem:[#allocation35_spill] sm:$0xff] }
 0x8df   :  { %20715 = vmatpush3.bf16.msra.mxu1 %v26107_v22  ;;  %v25871_v22 = vand.u32 4294901760, %v24073_v35 }
 0x8e0   :  { %20717 = vmatprep.subr.bf16.mxu1 %v26108_v46  ;;  %v26115_v46 = vld [vmem:[#allocation37_spill] sm:$0xff] }
 0x8e1   :  { %20615 = vmatpush3.bf16.msra.mxu0 %v26109_v36  ;;  %v26116_v36 = vld [vmem:[#allocation38_spill] sm:$0xff] }
 0x8e2   :  { %20617 = vmatprep.subr.bf16.mxu0 %v26110_v14  ;;  %v26118_v14 = vld [vmem:[#allocation45_spill] sm:$0xff] }
 0x8e3   :  { %20719 = vmatpush3.bf16.msra.mxu1 %v26111_v19  ;;  %v7206_v19 = vsub.f32 %v24073_v35, %v25871_v22  ;;  %v26122_v22 = vld [vmem:[#allocation48_spill] sm:$0xff] }
 0x8e4   :  { %20721 = vmatprep.subr.bf16.mxu1 %v26112_v39  ;;  %v26119_v39 = vld [vmem:[#allocation20_spill] sm:$0xff] }
 0x8e5   :  { %20619 = vmatpush3.bf16.msra.mxu0 %v26113_v30  ;;  %v7096_v30 = vrot.slane %v7095_v49, 2 }
 0x8e6   :  { %20621 = vmatprep.subr.bf16.mxu0 %v26114_v18  ;;  %v7207_v18 = vand.u32 4294901760, %v7206_v19  ;;  %v26123_v19 = vand.u32 4294901760, %v24036_v43 }
 0x8e7   :  { %20723 = vmatpush3.bf16.msra.mxu1 %v26115_v46  ;;  %v7097_v25 = vadd.f32 %v7096_v30, %v7095_v49 }
 0x8e8   :  { %20725 = vmatprep.subr.bf16.mxu1 %v26116_v36 }
 0x8e9   :  { %20623 = vmatpush3.bf16.msra.mxu0 %v26117_v28 }
 0x8ea   :  { %20625 = vmatprep.subr.bf16.mxu0 %v26118_v14 }
 0x8eb   :  { %20727 = vmatpush3.bf16.msra.mxu1 %v26119_v39  ;;  %v7098_v39 = vrot.slane %v7097_v25, 1 }
 0x8ec   :  { %20761 = vmatprep.subr.bf16.mxu1 %v22579_v20 }
 0x8ed   :  { %20627 = vmatpush3.bf16.msra.mxu0 %v26120_v38 }
 0x8ee   :  { %6982 = vmatmul.mubr.f32.vlgmr.msra.gmra.mrb[38].mxu1 %v24028_v27  ;;  %20629 = vmatprep.subr.bf16.mxu0 %v26121_v17 }
 0x8ef   :  { %20763 = vmatpush3.bf16.msra.mxu1 %v22588_v26  ;;  %7208 = vmatprep.mubr.f32.mxu1 %v7207_v18  ;;  %v7099_v18 = vadd.f32 %v7098_v39, %v7097_v25 }
 0x8f0   :  { %20765 = vmatprep.subr.bf16.mxu1 %v22601_v34 }
 0x8f1   :  { %20631 = vmatpush3.bf16.msra.mxu0 %v26122_v22  ;;  %v24109_v30 = vand.u32 4294901760, %v7099_v18 }
 0x8f2   :  { %20665 = vmatprep.subr.bf16.mxu0 %v22579_v20 }
 0x8f3   :  { %20767 = vmatpush3.bf16.msra.mxu1 %v22644_v57  ;;  %v24117_v39 = vsub.f32 %v7099_v18, %v24109_v30 }
 0x8f4   :  { %6568 = vmatmul.mubr.f32.vlgmr.msra.gmra.mrb[36].mxu0 %v24028_v27  ;;  %20769 = vmatprep.subr.bf16.mxu1 %v22674_v15 }
 0x8f5   :  { %20667 = vmatpush3.bf16.msra.mxu0 %v22588_v26  ;;  %6810 = vmatprep.mubr.f32.mxu0 %v26123_v19  ;;  %v7211_v43 = vand.u32 4294901760, %v24117_v39  ;;  %v26124_v19 = vand.u32 4294901760, %v24033_v62 }
 0x8f6   :  { %20669 = vmatprep.subr.bf16.mxu0 %v22601_v34 }
 0x8f7   :  { %20771 = vmatpush3.bf16.msra.mxu1 %v22684_v23  ;;  %v7212_v49 = vsub.f32 %v24117_v39, %v7211_v43 }
 0x8f8   :  { %20773 = vmatprep.subr.bf16.mxu1 %v22707_v48 }
 0x8f9   :  { %20671 = vmatpush3.bf16.msra.mxu0 %v22644_v57  ;;  %v7213_v25 = vand.u32 4294901760, %v7212_v49 }
 0x8fa   :  { %20673 = vmatprep.subr.bf16.mxu0 %v22674_v15 }
 0x8fb   :  { %20775 = vmatpush3.bf16.msra.mxu1 %v22730_v5 }
 0x8fc   :  { %20777 = vmatprep.subr.bf16.mxu1 %v25937_v33 }
 0x8fd   :  { %20675 = vmatpush3.bf16.msra.mxu0 %v22684_v23 }
 0x8fe   :  { %20677 = vmatprep.subr.bf16.mxu0 %v22707_v48 }
 0x8ff   :  { %20779 = vmatpush3.bf16.msra.mxu1 %v25941_v31 }
 0x900   :  { %20781 = vmatprep.subr.bf16.mxu1 %v22993_v60 }
 0x901   :  { %20679 = vmatpush3.bf16.msra.mxu0 %v22730_v5 }
 0x902   :  { %20681 = vmatprep.subr.bf16.mxu0 %v25937_v33 }
 0x903   :  { %20783 = vmatpush3.bf16.msra.mxu1 %v23002_v47 }
 0x904   :  { %20785 = vmatprep.subr.bf16.mxu1 %v23009_v1 }
 0x905   :  { %20683 = vmatpush3.bf16.msra.mxu0 %v25941_v31 }
 0x906   :  { %20685 = vmatprep.subr.bf16.mxu0 %v22993_v60 }
 0x907   :  { %20787 = vmatpush3.bf16.msra.mxu1 %v23013_v11 }
 0x908   :  { %20789 = vmatprep.subr.bf16.mxu1 %v23022_v8 }
 0x909   :  { %20687 = vmatpush3.bf16.msra.mxu0 %v23002_v47 }
 0x90a   :  { %20689 = vmatprep.subr.bf16.mxu0 %v23009_v1 }
 0x90b   :  { %20791 = vmatpush3.bf16.msra.mxu1 %v23029_v61 }
 0x90c   :  { %20825 = vmatprep.subr.bf16.mxu1 %v26014_v2  ;;  %v26137_v2 = vld [vmem:[#allocation39_spill] sm:$0xff] }
 0x90d   :  { %20691 = vmatpush3.bf16.msra.mxu0 %v23013_v11 }
 0x90e   :  { %7214 = vmatmul.mubr.f32.vlgmr.msra.gmra.mrb[40].mxu1 %v7213_v25  ;;  %20693 = vmatprep.subr.bf16.mxu0 %v23022_v8 }
 0x90f   :  { %20827 = vmatpush3.bf16.msra.mxu1 %v23100_v7  ;;  %7581 = vmatprep.mubr.f32.mxu1 %v24073_v35  ;;  %v26128_v7 = vld [vmem:[#allocation59_spill] sm:$0xff] }
 0x910   :  { %20829 = vmatprep.subr.bf16.mxu1 %v23105_v58  ;;  %v26129_v58 = vld [vmem:[#allocation60_spill] sm:$0xff] }
 0x911   :  { %20695 = vmatpush3.bf16.msra.mxu0 %v23029_v61 }
 0x912   :  { %20729 = vmatprep.subr.bf16.mxu0 %v22579_v20 }
 0x913   :  { %20831 = vmatpush3.bf16.msra.mxu1 %v23111_v53  ;;  %v26130_v53 = vld [vmem:[#allocation32_spill] sm:$0xff] }
 0x914   :  { %6814 = vmatmul.mubr.f32.vlgmr.msra.gmra.mrb[38].mxu0 %v26124_v19  ;;  %20833 = vmatprep.subr.bf16.mxu1 %v23116_v10  ;;  %v26131_v10 = vld [vmem:[#allocation33_spill] sm:$0xff] }
 0x915   :  { %20731 = vmatpush3.bf16.msra.mxu0 %v22588_v26  ;;  %7084 = vmatprep.mubr.f32.mxu0 %v24030_v59 }
 0x916   :  { %20733 = vmatprep.subr.bf16.mxu0 %v22601_v34 }
 0x917   :  { %20835 = vmatpush3.bf16.msra.mxu1 %v23123_v63  ;;  %v26132_v63 = vld [vmem:[#allocation61_spill] sm:$0xff] }
 0x918   :  { %20837 = vmatprep.subr.bf16.mxu1 %v26015_v24  ;;  %v26138_v24 = vld [vmem:[#allocation40_spill] sm:$0xff] }
 0x919   :  { %20735 = vmatpush3.bf16.msra.mxu0 %v22644_v57 }
 0x91a   :  { %20737 = vmatprep.subr.bf16.mxu0 %v22674_v15 }
 0x91b   :  { %20839 = vmatpush3.bf16.msra.mxu1 %v23135_v56  ;;  %v26133_v56 = vld [vmem:[#allocation62_spill] sm:$0xff] }
 0x91c   :  { %20841 = vmatprep.subr.bf16.mxu1 %v26016_v42  ;;  %v26139_v42 = vmov 0.0  }
 0x91d   :  { %20739 = vmatpush3.bf16.msra.mxu0 %v22684_v23 }
 0x91e   :  { %20741 = vmatprep.subr.bf16.mxu0 %v22707_v48 }
 0x91f   :  { %20843 = vmatpush3.bf16.msra.mxu1 %v23049_v45  ;;  %v26125_v45 = vld [vmem:[#allocation58_spill] sm:$0xff] }
 0x920   :  { %20845 = vmatprep.subr.bf16.mxu1 %v26017_v0  ;;  %v26140_v0 = vld [vmem:[#allocation23_spill] sm:$0xff] }
 0x921   :  { %20743 = vmatpush3.bf16.msra.mxu0 %v22730_v5 }
 0x922   :  { %20745 = vmatprep.subr.bf16.mxu0 %v25937_v33 }
 0x923   :  { %20847 = vmatpush3.bf16.msra.mxu1 %v26018_v3  ;;  %v26141_v3 = vand.u32 4294901760, %v24073_v35 }
 0x924   :  { %20849 = vmatprep.subr.bf16.mxu1 %v26019_v40  ;;  %v26136_v40 = vld [vmem:[#allocation20_spill] sm:$0xff] }
 0x925   :  { %20747 = vmatpush3.bf16.msra.mxu0 %v25941_v31 }
 0x926   :  { %20749 = vmatprep.subr.bf16.mxu0 %v22993_v60 }
 0x927   :  { %20851 = vmatpush3.bf16.msra.mxu1 %v26020_v37  ;;  %v26135_v37 = vld [vmem:[#allocation35_spill] sm:$0xff] }
 0x928   :  { %20853 = vmatprep.subr.bf16.mxu1 %v23069_v41  ;;  %v26126_v41 = vld [vmem:[#allocation30_spill] sm:$0xff] }
 0x929   :  { %20751 = vmatpush3.bf16.msra.mxu0 %v23002_v47 }
 0x92a   :  { %20753 = vmatprep.subr.bf16.mxu0 %v23009_v1 }
 0x92b   :  { %20855 = vmatpush3.bf16.msra.mxu1 %v23073_v52  ;;  %v26127_v52 = vld [vmem:[#allocation31_spill] sm:$0xff] }
 0x92c   :  { %20889 = vmatprep.subr.bf16.mxu1 %v26032_v54 }
 0x92d   :  { %20755 = vmatpush3.bf16.msra.mxu0 %v23013_v11 }
 0x92e   :  { %7584 = vmatmul.mubr.f32.vlgmr.msra.gmra.mrb[42].mxu1 %v24117_v39  ;;  %20757 = vmatprep.subr.bf16.mxu0 %v23022_v8 }
 0x92f   :  { %20891 = vmatpush3.bf16.msra.mxu1 %v26035_v32  ;;  %7858 = vmatprep.mubr.f32.mxu1 %v24064_v21 }
 0x930   :  { %20893 = vmatprep.subr.bf16.mxu1 %v26036_v12 }
 0x931   :  { %20759 = vmatpush3.bf16.msra.mxu0 %v23029_v61 }
 0x932   :  { %20793 = vmatprep.subr.bf16.mxu0 %v25988_v50  ;;  %v26134_v50 = vld [vmem:[#allocation34_spill] sm:$0xff] }
 0x933   :  { %20895 = vmatpush3.bf16.msra.mxu1 %v26095_v51 }
 0x934   :  { %7086 = vmatmul.mubr.f32.vlgmr.msra.gmra.mrb[40].mxu0 %v24028_v27  ;;  %20897 = vmatprep.subr.bf16.mxu1 %v26096_v44 }
 0x935   :  { %20795 = vmatpush3.bf16.msra.mxu0 %v26097_v29  ;;  %7444 = vmatprep.mubr.f32.mxu0 %v24064_v21 }
 0x936   :  { %20797 = vmatprep.subr.bf16.mxu0 %v26098_v13 }
 0x937   :  { %20899 = vmatpush3.bf16.msra.mxu1 %v26099_v4 }
 0x938   :  { %20901 = vmatprep.subr.bf16.mxu1 %v26100_v55 }
 0x939   :  { %20799 = vmatpush3.bf16.msra.mxu0 %v26101_v16 }
 0x93a   :  { %20801 = vmatprep.subr.bf16.mxu0 %v26102_v9 }
 0x93b   :  { %20903 = vmatpush3.bf16.msra.mxu1 %v26103_v6 }
 0x93c   :  { %20905 = vmatprep.subr.bf16.mxu1 %v26125_v45 }
 0x93d   :  { %20803 = vmatpush3.bf16.msra.mxu0 %v26126_v41 }
 0x93e   :  { %20805 = vmatprep.subr.bf16.mxu0 %v26127_v52 }
 0x93f   :  { %20907 = vmatpush3.bf16.msra.mxu1 %v26128_v7 }
 0x940   :  { %20909 = vmatprep.subr.bf16.mxu1 %v26129_v58  ;;  %v7973_v58 = vld [vmem:[#allocation10 + $0x2] sm:$0x1] }
 0x941   :  { %20807 = vmatpush3.bf16.msra.mxu0 %v26130_v53 }
 0x942   :  { %20809 = vmatprep.subr.bf16.mxu0 %v26131_v10 }
 0x943   :  { %20911 = vmatpush3.bf16.msra.mxu1 %v26132_v63  ;;  %v7977_v63 = vld [vmem:[#allocation11 + $0x2] sm:$0x1] }
 0x944   :  { %20913 = vmatprep.subr.bf16.mxu1 %v26133_v56 }
 0x945   :  { %20811 = vmatpush3.bf16.msra.mxu0 %v26134_v50 }
 0x946   :  { %20813 = vmatprep.subr.bf16.mxu0 %v26135_v37 }
 0x947   :  { %20915 = vmatpush3.bf16.msra.mxu1 %v26115_v46 }
 0x948   :  { %20917 = vmatprep.subr.bf16.mxu1 %v26116_v36 }
 0x949   :  { %20815 = vmatpush3.bf16.msra.mxu0 %v26117_v28 }
 0x94a   :  { %20817 = vmatprep.subr.bf16.mxu0 %v26118_v14 }
 0x94b   :  { %20919 = vmatpush3.bf16.msra.mxu1 %v26136_v40 }
 0x94c   :  { %7984 = vmatprep.subr.mxu1 %v26137_v2 }
 0x94d   :  { %20819 = vmatpush3.bf16.msra.mxu0 %v26120_v38 }
 0x94e   :  { %7860 = vmatmul.mubr.f32.vlgmr.msra.gmra.mrb[44].mxu1 %v24109_v30  ;;  %20821 = vmatprep.subr.bf16.mxu0 %v26121_v17 }
 0x94f   :  { %7986 = vmatpush1.msra.mxu1 %v26138_v24  ;;  %8049 = vmatprep.mubr.f32.mxu1 %v26139_v42 }
 0x950   :  { %8066 = vmatprep.subr.mxu1 %v26140_v0 }
 0x951   :  { %20823 = vmatpush3.bf16.msra.mxu0 %v26122_v22 }
 0x952   :  { %20857 = vmatprep.subr.bf16.mxu0 %v22579_v20 }
 0x954   :  { %7446 = vmatmul.mubr.f32.vlgmr.msra.gmra.mrb[42].mxu0 %v24109_v30 }
 0x955   :  { %20859 = vmatpush3.bf16.msra.mxu0 %v22588_v26  ;;  %7688 = vmatprep.mubr.f32.mxu0 %v26141_v3 }
 0x956   :  { %20861 = vmatprep.subr.bf16.mxu0 %v22601_v34 }
 0x959   :  { %20863 = vmatpush3.bf16.msra.mxu0 %v22644_v57 }
 0x95a   :  { %20865 = vmatprep.subr.bf16.mxu0 %v22674_v15 }
 0x95d   :  { %20867 = vmatpush3.bf16.msra.mxu0 %v22684_v23 }
 0x95e   :  { %20869 = vmatprep.subr.bf16.mxu0 %v22707_v48 }
 0x961   :  { %20871 = vmatpush3.bf16.msra.mxu0 %v22730_v5 }
 0x962   :  { %20873 = vmatprep.subr.bf16.mxu0 %v25937_v33 }
 0x965   :  { %20875 = vmatpush3.bf16.msra.mxu0 %v25941_v31 }
 0x966   :  { %20877 = vmatprep.subr.bf16.mxu0 %v22993_v60 }
 0x969   :  { %20879 = vmatpush3.bf16.msra.mxu0 %v23002_v47 }
 0x96a   :  { %20881 = vmatprep.subr.bf16.mxu0 %v23009_v1 }
 0x96d   :  { %20883 = vmatpush3.bf16.msra.mxu0 %v23013_v11 }
 0x96e   :  { %20885 = vmatprep.subr.bf16.mxu0 %v23022_v8 }
 0x971   :  { %20887 = vmatpush3.bf16.msra.mxu0 %v23029_v61 }
 0x972   :  { %20921 = vmatprep.subr.bf16.mxu0 %v22579_v20 }
 0x974   :  { %7692 = vmatmul.mubr.f32.vlgmr.msra.gmra.mrb[44].mxu0 %v7211_v43 }
 0x975   :  { %20923 = vmatpush3.bf16.msra.mxu0 %v22588_v26  ;;  %7962 = vmatprep.mubr.f32.mxu0 %v24064_v21 }
 0x976   :  { %20925 = vmatprep.subr.bf16.mxu0 %v22601_v34 }
 0x979   :  { %20927 = vmatpush3.bf16.msra.mxu0 %v22644_v57 }
 0x97a   :  { %20929 = vmatprep.subr.bf16.mxu0 %v22674_v15 }
 0x97d   :  { %20931 = vmatpush3.bf16.msra.mxu0 %v22684_v23 }
 0x97e   :  { %20933 = vmatprep.subr.bf16.mxu0 %v22707_v48 }
 0x981   :  { %20935 = vmatpush3.bf16.msra.mxu0 %v22730_v5 }
 0x982   :  { %20937 = vmatprep.subr.bf16.mxu0 %v25937_v33 }
 0x985   :  { %20939 = vmatpush3.bf16.msra.mxu0 %v25941_v31 }
 0x986   :  { %20941 = vmatprep.subr.bf16.mxu0 %v22993_v60 }
 0x989   :  { %20943 = vmatpush3.bf16.msra.mxu0 %v23002_v47 }
 0x98a   :  { %20945 = vmatprep.subr.bf16.mxu0 %v23009_v1 }
 0x98d   :  { %20947 = vmatpush3.bf16.msra.mxu0 %v23013_v11 }
 0x98e   :  { %20949 = vmatprep.subr.bf16.mxu0 %v23022_v8 }
 0x991   :  { %20951 = vmatpush3.bf16.msra.mxu0 %v23029_v61 }
 0x992   :  { %8452 = vmatprep.subr.mxu0 %v26137_v2 }
 0x994   :  { %7964 = vmatmul.mubr.f32.vlgmr.msra.gmra.mrb[46].mxu0 %v24109_v30 }
 0x995   :  { %8454 = vmatpush1.msra.mxu0 %v26138_v24  ;;  %8517 = vmatprep.mubr.f32.mxu0 %v26139_v42 }
 0x996   :  { %8534 = vmatprep.subr.mxu0 %v26140_v0 }
 0x9a1   :  { %v17241_v20 = vpop.f32.mrb[36].mxu1 }
 0x9a2   :  { %v17242_v26 = vpop.f32.mrb[37].mxu1 }
 0x9a3   :  { %v17243_v34 = vadd.f32 %v17242_v26, %v17241_v20 }
 0x9a7   :  { %v17171_v57 = vpop.f32.mrb[34].mxu0 }
 0x9a8   :  { %v17172_v15 = vpop.f32.mrb[35].mxu0 }
 0x9a9   :  { %v17173_v23 = vadd.f32 %v17172_v15, %v17171_v57 }
 0x9c1   :  { %v17311_v48 = vpop.f32.mrb[38].mxu1 }
 0x9c2   :  { %v17312_v5 = vpop.f32.mrb[39].mxu1 }
 0x9c3   :  { %v17313_v60 = vadd.f32 %v17312_v5, %v17311_v48  ;;  %v26142_v5 = vld [vmem:[#allocation51_spill] sm:$0xff] }
 0x9c7   :  { %v17206_v47 = vpop.f32.mrb[36].mxu0 }
 0x9c8   :  { %v17207_v1 = vpop.f32.mrb[37].mxu0 }
 0x9c9   :  { %v17208_v11 = vadd.f32 %v17207_v1, %v17206_v47  ;;  %v26143_v47 = vld [vmem:[#allocation43_spill] sm:$0xff]  ;;  %v26144_v1 = vld [vmem:[#allocation44_spill] sm:$0xff] }
 0x9cb   :  { %v6570_v8 = vadd.f32 %v17208_v11, %v17173_v23  ;;  %v26145_v11 = vld [vmem:[#allocation49_spill] sm:$0xff] }
 0x9cd   :  { %v6708_v61 = vadd.f32 %v17243_v34, %v6570_v8  ;;  %v26146_v8 = vld [vmem:[#allocation50_spill] sm:$0xff] }
 0x9e1   :  { %v17381_v33 = vpop.f32.mrb[40].mxu1 }
 0x9e2   :  { %v17382_v31 = vpop.f32.mrb[41].mxu1 }
 0x9e3   :  { %v17383_v54 = vadd.f32 %v17382_v31, %v17381_v33  ;;  %v22127_v33 = vld [vmem:[%s25662_s4] sm:$0xff]   ;;  %v22129_v31 = vld [vmem:[%s25662_s4 + $0x8] sm:$0xff]  }
 0x9e7   :  { %v17276_v32 = vpop.f32.mrb[38].mxu0 }
 0x9e8   :  { %v17277_v12 = vpop.f32.mrb[39].mxu0 }
 0x9e9   :  { %v17278_v14 = vadd.f32 %v17277_v12, %v17276_v32  ;;  %v22132_v32 = vld [vmem:[%s25662_s4 + $0x58] sm:$0xff]  }
 0x9ea   :  { %v22133_v12 = vld [vmem:[%s25662_s4 + $0x18] sm:$0xff]  }
 0x9eb   :  { %v6816_v35 = vadd.f32 %v17278_v14, %v6708_v61  ;;  %v22126_v61 = vld [vmem:[%s25662_s4 + $0x40] sm:$0xff]  }
 0x9ec   :  { %v22134_v14 = vld [vmem:[%s25662_s4 + $0x60] sm:$0xff]  }
 0x9ed   :  { %v6984_v36 = vadd.f32 %v17313_v60, %v6816_v35  ;;  %v22135_v35 = vld [vmem:[%s25662_s4 + $0x20] sm:$0xff]  }
 0xa01   :  { %v17451_v22 = vpop.f32.mrb[42].mxu1 }
 0xa02   :  { %v17452_v27 = vpop.f32.mrb[43].mxu1 }
 0xa03   :  { %v17453_v59 = vadd.f32 %v17452_v27, %v17451_v22  ;;  %v22137_v22 = vld [vmem:[%s25662_s4 + $0x28] sm:$0xff]   ;;  %v22138_v27 = vld [vmem:[%s25662_s4 + $0x70] sm:$0xff]  }
 0xa07   :  { %v17346_v62 = vpop.f32.mrb[40].mxu0 }
 0xa08   :  { %v17347_v21 = vpop.f32.mrb[41].mxu0 }
 0xa09   :  { %v17348_v51 = vadd.f32 %v17347_v21, %v17346_v62  ;;  %v22140_v62 = vld [vmem:[%s25662_s4 + $0x78] sm:$0xff]  }
 0xa0a   :  { %v22141_v21 = vld [vmem:[%s25662_s4 + $0x38] sm:$0xff]  }
 0xa0b   :  { %v7088_v44 = vadd.f32 %v17348_v51, %v6984_v36  ;;  %v22136_v36 = vld [vmem:[%s25662_s4 + $0x68] sm:$0xff]   ;;  %v24338_v51 = vld [vmem:[%s25667_s9] sm:$0xff] }
 0xa0d   :  { %v7969_v49 = vmul.f32 0.0078125, %v7088_v44  ;;  %v24343_v44 = vld [vmem:[%s25667_s9 + $0x8] sm:$0xff] }
 0xa0f   :  { %v7971_v45 = vmul.f32 %v7969_v49, %v7969_v49 }
 0xa21   :  { %v17521_v29 = vpop.f32.mrb[44].mxu1 }
 0xa22   :  { %v17522_v13 = vpop.f32.mrb[45].mxu1 }
 0xa23   :  { %v17523_v4 = vadd.f32 %v17522_v13, %v17521_v29  ;;  %v22378_v29 = vmov 0.0|0.0   ;;  %v9132_v13 = vand.u32 4294901760, %v24338_v51 }
 0xa27   :  { %v17416_v55 = vpop.f32.mrb[42].mxu0 }
 0xa28   :  { %v17417_v16 = vpop.f32.mrb[43].mxu0 }
 0xa29   :  { %v17418_v9 = vadd.f32 %v17417_v16, %v17416_v55  ;;  %v24352_v55 = vld [vmem:[%s25667_s9 + $0x10] sm:$0xff]  ;;  %v24357_v16 = vld [vmem:[%s25667_s9 + $0x18] sm:$0xff] }
 0xa2b   :  { %v7448_v6 = vadd.f32 %v17418_v9, %v17383_v54  ;;  %v22131_v54 = vld [vmem:[%s25662_s4 + $0x10] sm:$0xff]   ;;  %v9138_v9 = vand.u32 4294901760, %v24352_v55 }
 0xa2d   :  { %v7586_v38 = vadd.f32 %v17453_v59, %v7448_v6  ;;  %v22139_v59 = vld [vmem:[%s25662_s4 + $0x30] sm:$0xff]   ;;  %v9141_v6 = vand.u32 4294901760, %v24357_v16 }
 0xa47   :  { %v17486_v46 = vpop.f32.mrb[44].mxu0 }
 0xa48   :  { %v17487_v28 = vpop.f32.mrb[45].mxu0 }
 0xa49   :  { %v17488_v17 = vadd.f32 %v17487_v28, %v17486_v46  ;;  %v24372_v46 = vpack.c.bf16 %v9141_v6, %v9138_v9 }
 0xa4b   :  { %v7694_v18 = vadd.f32 %v17488_v17, %v7586_v38  ;;  %v26147_v17 = vld [vmem:[#allocation52_spill] sm:$0xff] }
 0xa4d   :  { %v7862_v30 = vadd.f32 %v17523_v4, %v7694_v18  ;;  %v9135_v4 = vand.u32 4294901760, %v24343_v44 }
 0xa4f   :  { %v24365_v38 = vpack.c.bf16 %v9135_v4, %v9132_v13 }
 0xa67   :  { %v17556_v39 = vpop.f32.mrb[46].mxu0 }
 0xa68   :  { %v17557_v43 = vpop.f32.mrb[47].mxu0 }
 0xa69   :  { %v17558_v25 = vadd.f32 %v17557_v43, %v17556_v39  ;;  %v26148_v43 = vld [vmem:[#allocation55_spill] sm:$0xff] }
 0xa6b   :  { %v7966_v19 = vadd.f32 %v17558_v25, %v7862_v30  ;;  %v26149_v25 = vld [vmem:[#allocation41_spill] sm:$0xff] }
 0xa6d   :  { %v7970_v41 = vmul.f32 0.0078125, %v7966_v19 }
 0xa6f   :  { %v7972_v52 = vsub.f32 %v7970_v41, %v7971_v45 }
 0xa71   :  { %v7974_v7 = vadd.f32 1e-05, %v7972_v52 }
 0xa73   :  { %22171 = vrsqrt.f32 %v7974_v7 }
 0xa7d   :  { %v22172_v53 = vpop.eup %22171 }
 0xa7e   :  { %v7976_v10 = vmul.f32 %v22172_v53, %v7973_v58 }
 0xa80   :  { %v7981_v56 = vsel %vm2063_vm2, %v7976_v10, 0  ;;  %v7978_v50 = vmul.f32 %v7976_v10, %v7969_v49 }
 0xa81   :  { %v8050_v37 = vand.u32 4294901760, %v7981_v56 }
 0xa82   :  { %v7979_v40 = vsub.f32 %v7977_v63, %v7978_v50 }
 0xa83   :  { %v8051_v0 = vsub.f32 %v7981_v56, %v8050_v37 }
 0xa84   :  { %v8449_v3 = vsel %vm2063_vm2, %v7979_v40, 0  ;;  %v9113_v40 = vld [vmem:[%s25667_s9 + $0x28] sm:$0xff] }
 0xa85   :  { %v8052_v20 = vand.u32 4294901760, %v8051_v0  ;;  %v8518_v26 = vand.u32 4294901760, %v8449_v3 }
 0xa87   :  { %v8053_v34 = vsub.f32 %v8051_v0, %v8052_v20  ;;  %v8519_v57 = vsub.f32 %v8449_v3, %v8518_v26  ;;  %v9147_v3 = vand.u32 4294901760, %v9113_v40 }
 0xa89   :  { %v8054_v15 = vand.u32 4294901760, %v8053_v34  ;;  %v8520_v23 = vand.u32 4294901760, %v8519_v57  ;;  %v9115_v34 = vld [vmem:[%s25667_s9 + $0x38] sm:$0xff] }
 0xa8b   :  { %8055 = vmatmul.mubr.f32.vlgmr.msra.gmra.mrb[46].mxu1 %v8054_v15  ;;  %v8521_v48 = vsub.f32 %v8519_v57, %v8520_v23  ;;  %v9153_v15 = vand.u32 4294901760, %v9115_v34 }
 0xa8c   :  { %8072 = vmatpush1.msra.mxu1 %v26142_v5  ;;  %8135 = vmatprep.mubr.f32.mxu1 %v26139_v42 }
 0xa8d   :  { %v8522_v60 = vand.u32 4294901760, %v8521_v48  ;;  %8145 = vmatprep.subr.mxu1 %v26143_v47  ;;  %v9116_v48 = vld [vmem:[%s25667_s9 + $0x40] sm:$0xff] }
 0xa8f   :  { %8523 = vmatmul.mubr.f32.vlgmr.msra.gmra.mrb[48].mxu0 %v8522_v60  ;;  %v9156_v60 = vand.u32 4294901760, %v9116_v48 }
 0xa90   :  { %8540 = vmatpush1.msra.mxu0 %v26142_v5  ;;  %8603 = vmatprep.mubr.f32.mxu0 %v26139_v42  ;;  %v9117_v5 = vld [vmem:[%s25667_s9 + $0x48] sm:$0xff] }
 0xa91   :  { %8613 = vmatprep.subr.mxu0 %v26143_v47  ;;  %v9159_v47 = vand.u32 4294901760, %v9117_v5 }
 0xa93   :  { %8137 = vmatmul.mubr.f32.vlgmr.msra.gmra.mrb[46].mxu1 %v8050_v37 }
 0xa94   :  { %8148 = vmatpush1.msra.mxu1 %v26144_v1  ;;  %8211 = vmatprep.mubr.f32.mxu1 %v26139_v42 }
 0xa95   :  { %8221 = vmatprep.subr.mxu1 %v26137_v2 }
 0xa97   :  { %8605 = vmatmul.mubr.f32.vlgmr.msra.gmra.mrb[48].mxu0 %v8518_v26 }
 0xa98   :  { %8616 = vmatpush1.msra.mxu0 %v26144_v1  ;;  %8679 = vmatprep.mubr.f32.mxu0 %v26139_v42  ;;  %v24417_v1 = vpack.c.bf16 %v9159_v47, %v9156_v60 }
 0xa99   :  { %8689 = vmatprep.subr.mxu0 %v26137_v2 }
 0xa9b   :  { %8214 = vmatmul.mubr.f32.vlgmr.msra.gmra.mrb[46].mxu1 %v8051_v0 }
 0xa9c   :  { %8223 = vmatpush1.msra.mxu1 %v26138_v24  ;;  %8286 = vmatprep.mubr.f32.mxu1 %v26139_v42 }
 0xa9d   :  { %8299 = vmatprep.subr.mxu1 %v26145_v11 }
 0xa9f   :  { %8682 = vmatmul.mubr.f32.vlgmr.msra.gmra.mrb[48].mxu0 %v8519_v57 }
 0xaa0   :  { %8691 = vmatpush1.msra.mxu0 %v26138_v24  ;;  %8754 = vmatprep.mubr.f32.mxu0 %v26139_v42 }
 0xaa1   :  { %8767 = vmatprep.subr.mxu0 %v26145_v11  ;;  %v9118_v11 = vld [vmem:[%s25667_s9 + $0x50] sm:$0xff] }
 0xaa3   :  { %8290 = vmatmul.mubr.f32.vlgmr.msra.gmra.mrb[46].mxu1 %v8052_v20 }
 0xaa4   :  { %8303 = vmatpush1.msra.mxu1 %v26146_v8  ;;  %8366 = vmatprep.mubr.f32.mxu1 %v26139_v42 }
 0xaa5   :  { %8375 = vmatprep.subr.mxu1 %v26137_v2 }
 0xaa7   :  { %8758 = vmatmul.mubr.f32.vlgmr.msra.gmra.mrb[48].mxu0 %v8520_v23 }
 0xaa8   :  { %8771 = vmatpush1.msra.mxu0 %v26146_v8  ;;  %8834 = vmatprep.mubr.f32.mxu0 %v26139_v42  ;;  %v9119_v8 = vld [vmem:[%s25667_s9 + $0x58] sm:$0xff] }
 0xaa9   :  { %8843 = vmatprep.subr.mxu0 %v26137_v2  ;;  %v22128_v2 = vld [vmem:[%s25662_s4 + $0x48] sm:$0xff]  }
 0xaab   :  { %8368 = vmatmul.mubr.f32.vlgmr.msra.gmra.mrb[46].mxu1 %v8050_v37 }
 0xaac   :  { %8377 = vmatpush1.msra.mxu1 %v26138_v24  ;;  %8440 = vmatprep.mubr.f32.mxu1 %v26139_v42 }
 0xaad   :  { %17559 = vmatprep.subr.bf16.mxu1 %v22126_v61  ;;  %v9162_v61 = vand.u32 4294901760, %v9118_v11 }
 0xaaf   :  { %8836 = vmatmul.mubr.f32.vlgmr.msra.gmra.mrb[48].mxu0 %v8518_v26 }
 0xab0   :  { %8845 = vmatpush1.msra.mxu0 %v26138_v24  ;;  %8908 = vmatprep.mubr.f32.mxu0 %v26139_v42  ;;  %v22130_v24 = vld [vmem:[%s25662_s4 + $0x50] sm:$0xff]  }
 0xab1   :  { %20952 = vmatprep.subr.bf16.mxu0 %v22378_v29 }
 0xab3   :  { %8442 = vmatmul.mubr.f32.vlgmr.msra.gmra.mrb[46].mxu1 %v8050_v37  ;;  %v9112_v37 = vld [vmem:[%s25667_s9 + $0x20] sm:$0xff] }
 0xab4   :  { %17560 = vmatpush3.bf16.msra.mxu1 %v22127_v33  ;;  %v9144_v0 = vand.u32 4294901760, %v9112_v37  ;;  %v9165_v33 = vand.u32 4294901760, %v9119_v8 }
 0xab5   :  { %17561 = vmatprep.subr.bf16.mxu1 %v22128_v2 }
 0xab6   :  { %v24393_v20 = vpack.c.bf16 %v9147_v3, %v9144_v0  ;;  %v24429_v2 = vpack.c.bf16 %v9165_v33, %v9162_v61 }
 0xab7   :  { %8910 = vmatmul.mubr.f32.vlgmr.msra.gmra.mrb[48].mxu0 %v8518_v26  ;;  %v9114_v26 = vld [vmem:[%s25667_s9 + $0x30] sm:$0xff] }
 0xab8   :  { %17562 = vmatpush3.bf16.msra.mxu1 %v22129_v31  ;;  %20954 = vmatpush3.bf16.msra.mxu0 %v24365_v38  ;;  %v9150_v57 = vand.u32 4294901760, %v9114_v26  ;;  %v9120_v31 = vld [vmem:[%s25667_s9 + $0x60] sm:$0xff] }
 0xab9   :  { %17563 = vmatprep.subr.bf16.mxu1 %v22130_v24  ;;  %20955 = vmatprep.subr.bf16.mxu0 %v22378_v29  ;;  %v9121_v24 = vld [vmem:[%s25667_s9 + $0x68] sm:$0xff] }
 0xaba   :  { %v24405_v23 = vpack.c.bf16 %v9153_v15, %v9150_v57  ;;  %18326 = vmatprep.mubr.msk.f32.mxu0 %vm22379_vm3, %v26139_v42 }
 0xabc   :  { %17564 = vmatpush3.bf16.msra.mxu1 %v22131_v54  ;;  %20957 = vmatpush3.bf16.msra.mxu0 %v24372_v46  ;;  %v9168_v54 = vand.u32 4294901760, %v9120_v31 }
 0xabd   :  { %17565 = vmatprep.subr.bf16.mxu1 %v22132_v32  ;;  %20958 = vmatprep.subr.bf16.mxu0 %v22378_v29  ;;  %v9171_v32 = vand.u32 4294901760, %v9121_v24 }
 0xac0   :  { %17566 = vmatpush3.bf16.msra.mxu1 %v22133_v12  ;;  %20960 = vmatpush3.bf16.msra.mxu0 %v24393_v20  ;;  %v24441_v12 = vpack.c.bf16 %v9171_v32, %v9168_v54 }
 0xac1   :  { %17567 = vmatprep.subr.bf16.mxu1 %v22134_v14  ;;  %20961 = vmatprep.subr.bf16.mxu0 %v22378_v29  ;;  %v9122_v14 = vld [vmem:[%s25667_s9 + $0x70] sm:$0xff] }
 0xac4   :  { %17568 = vmatpush3.bf16.msra.mxu1 %v22135_v35  ;;  %20963 = vmatpush3.bf16.msra.mxu0 %v24405_v23  ;;  %v9123_v35 = vld [vmem:[%s25667_s9 + $0x78] sm:$0xff] }
 0xac5   :  { %17569 = vmatprep.subr.bf16.mxu1 %v22136_v36  ;;  %20964 = vmatprep.subr.bf16.mxu0 %v22378_v29  ;;  %v9174_v36 = vand.u32 4294901760, %v9122_v14 }
 0xac8   :  { %17570 = vmatpush3.bf16.msra.mxu1 %v22137_v22  ;;  %20966 = vmatpush3.bf16.msra.mxu0 %v24417_v1  ;;  %v9177_v22 = vand.u32 4294901760, %v9123_v35 }
 0xac9   :  { %17571 = vmatprep.subr.bf16.mxu1 %v22138_v27  ;;  %20967 = vmatprep.subr.bf16.mxu0 %v22378_v29 }
 0xaca   :  { %v24453_v27 = vpack.c.bf16 %v9177_v22, %v9174_v36 }
 0xacc   :  { %17572 = vmatpush3.bf16.msra.mxu1 %v22139_v59  ;;  %20969 = vmatpush3.bf16.msra.mxu0 %v24429_v2  ;;  %v24463_v59 = vsub.f32 %v9112_v37, %v9144_v0 }
 0xacd   :  { %17573 = vmatprep.subr.bf16.mxu1 %v22140_v62  ;;  %20970 = vmatprep.subr.bf16.mxu0 %v22378_v29  ;;  %v24465_v62 = vsub.f32 %v9113_v40, %v9147_v3  ;;  %v24503_v3 = vsub.f32 %v9118_v11, %v9162_v61 }
 0xad0   :  { %17574 = vmatpush3.bf16.msra.mxu1 %v22141_v21  ;;  %20972 = vmatpush3.bf16.msra.mxu0 %v24441_v12  ;;  %v9253_v21 = vand.u32 4294901760, %v24463_v59 }
 0xad1   :  { %21096 = vmatprep.subr.bf16.mxu1 %v22378_v29  ;;  %20973 = vmatprep.subr.bf16.mxu0 %v22378_v29 }
 0xad4   :  { %20975 = vmatpush3.bf16.msra.mxu0 %v24453_v27 }
 0xad5   :  { %20976 = vmatprep.subr.bf16.mxu0 %v22378_v29 }
 0xb86   :  { %v8443_v28 = vpop.f32.mrb[46].mxu1 }
 0xb87   :  { %v8919_v18 = vrot.slane %v8443_v28, %v26147_v17  ;;  %v8445_v30 = vpop.f32.mrb[47].mxu1  ;;  %v9260_v28 = vand.u32 4294901760, %v24465_v62 }
 0xb88   :  { %v8923_v39 = vrot.slane %v8445_v30, %v26147_v17  ;;  %v24472_v30 = vsub.f32 %v9114_v26, %v9150_v57  ;;  %v24505_v26 = vsub.f32 %v9119_v8, %v9165_v33 }
 0xb89   :  { %v8924_v49 = vmul.f32 %v8919_v18, %v26148_v43  ;;  %v9254_v18 = vsub.f32 %v24463_v59, %v9253_v21  ;;  %v9261_v43 = vsub.f32 %v24465_v62, %v9260_v28 }
 0xb8a   :  { %v8925_v19 = vmul.f32 %v8923_v39, %v26149_v25  ;;  %v8911_v45 = vpop.f32.mrb[48].mxu0  ;;  %v24474_v39 = vsub.f32 %v9115_v34, %v9153_v15  ;;  %v25881_v25 = vand.u32 4294901760, %v24472_v30  ;;  %v25877_v15 = vand.u32 4294901760, %v24503_v3 }
 0xb8b   :  { %v8929_v41 = vrot.slane %v8911_v45, %v26147_v17  ;;  %v8913_v52 = vpop.f32.mrb[49].mxu0  ;;  %v9262_v45 = vand.u32 4294901760, %v9261_v43 }
 0xb8c   :  { %v8933_v7 = vrot.slane %v8913_v52, %v26147_v17 }
 0xb8d   :  { %v8934_v58 = vadd.f32 %v8929_v41, %v8924_v49  ;;  %v9255_v49 = vand.u32 4294901760, %v9254_v18  ;;  %v9268_v41 = vsub.f32 %v24472_v30, %v25881_v25  ;;  %v24516_v18 = vsub.f32 %v9121_v24, %v9171_v32 }
 0xb8e   :  { %v8935_v53 = vadd.f32 %v8933_v7, %v8925_v19  ;;  %v25880_v19 = vand.u32 4294901760, %v24474_v39  ;;  %v24487_v7 = vsub.f32 %v9116_v48, %v9156_v60  ;;  %v25876_v48 = vand.u32 4294901760, %v24505_v26 }
 0xb8f   :  { %v8936_v10 = vmax.f32 %v8934_v58, 0.0  ;;  %v24489_v58 = vsub.f32 %v9117_v5, %v9159_v47  ;;  %v9296_v60 = vsub.f32 %v24503_v3, %v25877_v15  ;;  %v24514_v47 = vsub.f32 %v9120_v31, %v9168_v54 }
 0xb90   :  { %v8937_v63 = vmax.f32 %v8935_v53, 0.0  ;;  %v9275_v52 = vsub.f32 %v24474_v39, %v25880_v19  ;;  %v24491_v53 = vpack.c.bf16 %v9262_v45, %v9255_v49  ;;  %v9303_v11 = vsub.f32 %v24505_v26, %v25876_v48 }
 0xb91   :  { %v8938_v50 = vpack.c.bf16 %v8936_v10, %v8936_v10  ;;  %v9269_v10 = vand.u32 4294901760, %v9268_v41  ;;  %v9297_v8 = vand.u32 4294901760, %v9296_v60  ;;  %v25875_v61 = vand.u32 4294901760, %v24514_v47 }
 0xb92   :  { %v8939_v56 = vpack.c.bf16 %v8937_v63, %v8937_v63  ;;  %v9276_v63 = vand.u32 4294901760, %v9275_v52  ;;  %v25874_v33 = vand.u32 4294901760, %v24516_v18  ;;  %v9304_v43 = vand.u32 4294901760, %v9303_v11 }
 0xb93   :  { %v9310_v49 = vsub.f32 %v24514_v47, %v25875_v61  ;;  %v24529_v24 = vsub.f32 %v9122_v14, %v9174_v36  ;;  %v24531_v54 = vsub.f32 %v9123_v35, %v9177_v22  ;;  %v24561_v60 = vpack.c.bf16 %v24505_v26, %v24503_v3 }
 0xb94   :  { %9100 = vmatprep.mubr.bf16.mxu1 %v8939_v56  ;;  %v25879_v56 = vand.u32 4294901760, %v24487_v7  ;;  %v24495_v37 = vpack.c.bf16 %v9276_v63, %v9269_v10  ;;  %v9317_v31 = vsub.f32 %v24516_v18, %v25874_v33  ;;  %v24533_v32 = vpack.c.bf16 %v9304_v43, %v9297_v8 }
 0xb95   :  { %9101 = vmatmul.mubr.bf16.vlgmr.msra.gmra.mrb[48].mxu1 %v8938_v50  ;;  %v25878_v50 = vand.u32 4294901760, %v24489_v58  ;;  %v9311_v45 = vand.u32 4294901760, %v9310_v49  ;;  %v25873_v52 = vand.u32 4294901760, %v24529_v24  ;;  %v25872_v10 = vand.u32 4294901760, %v24531_v54 }
 0xb96   :  { %21098 = vmatpush3.bf16.msra.mxu1 %v24365_v38  ;;  %18536 = vmatprep.mubr.msk.f32.mxu1 %vm22379_vm3, %v26139_v42  ;;  %v9282_v40 = vsub.f32 %v24487_v7, %v25879_v56  ;;  %v9318_v41 = vand.u32 4294901760, %v9317_v31  ;;  %v24565_v11 = vpack.c.bf16 %v24516_v18, %v24514_v47  ;;  %v24569_v8 = vpack.c.bf16 %v24531_v54, %v24529_v24 }
 0xb97   :  { %21099 = vmatprep.subr.bf16.mxu1 %v22378_v29  ;;  %v9289_v0 = vsub.f32 %v24489_v58, %v25878_v50  ;;  %v9331_v14 = vsub.f32 %v24531_v54, %v25872_v10  ;;  %v24581_v33 = vsub.f32 %v24338_v51, %v9132_v13  ;;  %v24598_v51 = vsub.f32 %v24357_v16, %v9141_v6 }
 0xb98   :  { %v9283_v34 = vand.u32 4294901760, %v9282_v40  ;;  %v24537_v63 = vpack.c.bf16 %v9318_v41, %v9311_v45  ;;  %v9324_v40 = vsub.f32 %v24529_v24, %v25873_v52 }
 0xb99   :  { %v9290_v57 = vand.u32 4294901760, %v9289_v0  ;;  %v9332_v36 = vand.u32 4294901760, %v9331_v14  ;;  %v24549_v0 = vpack.c.bf16 %v24465_v62, %v24463_v59  ;;  %v9225_v48 = vand.u32 4294901760, %v24581_v33 }
 0xb9a   :  { %21101 = vmatpush3.bf16.msra.mxu1 %v24372_v46  ;;  %v9325_v35 = vand.u32 4294901760, %v9324_v40  ;;  %v26152_v59 = vand.u32 4294901760, %v24487_v7  ;;  %v26153_v62 = vand.u32 4294901760, %v24489_v58 }
 0xb9b   :  { %21102 = vmatprep.subr.bf16.mxu1 %v22378_v29  ;;  %v24509_v5 = vpack.c.bf16 %v9290_v57, %v9283_v34  ;;  %v24553_v34 = vpack.c.bf16 %v24474_v39, %v24472_v30  ;;  %v24557_v57 = vpack.c.bf16 %v24489_v58, %v24487_v7  ;;  %v26156_v7 = vand.u32 4294901760, %v24514_v47  ;;  %v10432_v47 = vld [vmem:[#allocation8] sm:$0xff] }
 0xb9c   :  { %v24545_v22 = vpack.c.bf16 %v9332_v36, %v9325_v35  ;;  %v26157_v58 = vand.u32 4294901760, %v24516_v18  ;;  %v24888_v18 = vand.u32 4294901760, %v10432_v47 }
 0xb9e   :  { %21104 = vmatpush3.bf16.msra.mxu1 %v24393_v20 }
 0xb9f   :  { %21105 = vmatprep.subr.bf16.mxu1 %v22378_v29 }
 0xba2   :  { %21107 = vmatpush3.bf16.msra.mxu1 %v24405_v23 }
 0xba3   :  { %21108 = vmatprep.subr.bf16.mxu1 %v22378_v29 }
 0xba6   :  { %21110 = vmatpush3.bf16.msra.mxu1 %v24417_v1 }
 0xba7   :  { %21111 = vmatprep.subr.bf16.mxu1 %v22378_v29 }
 0xbaa   :  { %21113 = vmatpush3.bf16.msra.mxu1 %v24429_v2 }
 0xbab   :  { %21114 = vmatprep.subr.bf16.mxu1 %v22378_v29 }
 0xbae   :  { %21116 = vmatpush3.bf16.msra.mxu1 %v24441_v12 }
 0xbaf   :  { %21117 = vmatprep.subr.bf16.mxu1 %v22378_v29 }
 0xbb2   :  { %21119 = vmatpush3.bf16.msra.mxu1 %v24453_v27 }
 0xbb3   :  { %21120 = vmatprep.subr.bf16.mxu1 %v22378_v29 }
 0xc68   :  { %v17575_v43 = vpop.f32.mrb[48].mxu1 }
 0xc69   :  { %v17576_v49 = vpop.f32.mrb[49].mxu1 }
 0xc6a   :  { %v24571_v31 = vadd.f32 %v17576_v49, %v17575_v43  ;;  %v17578_v45 = vpop.f32.mrb[50].mxu1  ;;  %v24586_v43 = vsub.f32 %v24343_v44, %v9135_v4 }
 0xc6b   :  { %v17579_v41 = vpop.f32.mrb[51].mxu1 }
 0xc6c   :  { %v9124_v40 = vsel %vm295_vm1, %v24571_v31, 0.0  ;;  %v9772_v14 = vmul.f32 %v24571_v31, %v24571_v31 }
 0xc6d   :  { %v9125_v35 = vrot.slane %v9124_v40, 4 }
 0xc6e   :  { %v9773_v36 = vsel %vm295_vm1, %v9772_v14, 0.0  ;;  %v9232_v14 = vand.u32 4294901760, %v24586_v43 }
 0xc6f   :  { %v9126_v10 = vadd.f32 %v9125_v35, %v9124_v40  ;;  %v9774_v52 = vrot.slane %v9773_v36, 4  ;;  %v24593_v40 = vsub.f32 %v24352_v55, %v9138_v9  ;;  %v9246_v9 = vand.u32 4294901760, %v24598_v51 }
 0xc70   :  { %v9233_v35 = vsub.f32 %v24586_v43, %v9232_v14 }
 0xc71   :  { %v9127_v49 = vrot.slane %v9126_v10, 2  ;;  %v9775_v45 = vadd.f32 %v9774_v52, %v9773_v36  ;;  %v9239_v55 = vand.u32 4294901760, %v24593_v40 }
 0xc73   :  { %v9128_v41 = vadd.f32 %v9127_v49, %v9126_v10  ;;  %v9776_v61 = vrot.slane %v9775_v45, 2  ;;  %v9226_v10 = vsub.f32 %v24581_v33, %v9225_v48 }
 0xc75   :  { %v9129_v44 = vrot.slane %v9128_v41, 1  ;;  %v9777_v13 = vadd.f32 %v9776_v61, %v9775_v45  ;;  %v9227_v49 = vand.u32 4294901760, %v9226_v10  ;;  %v9234_v45 = vand.u32 4294901760, %v9233_v35 }
 0xc77   :  { %v9130_v4 = vadd.f32 %v9129_v44, %v9128_v41  ;;  %v9778_v52 = vrot.slane %v9777_v13, 1  ;;  %v9240_v41 = vsub.f32 %v24593_v40, %v9239_v55  ;;  %v9247_v44 = vsub.f32 %v24598_v51, %v9246_v9 }
 0xc79   :  { %v24608_v36 = vand.u32 4294901760, %v9130_v4  ;;  %v9779_v16 = vadd.f32 %v9778_v52, %v9777_v13  ;;  %v24629_v52 = vpack.c.bf16 %v9234_v45, %v9227_v49  ;;  %v9241_v10 = vand.u32 4294901760, %v9240_v41  ;;  %v10425_v45 = vld [vmem:[#allocation10 + $0x3] sm:$0x1] }
 0xc7a   :  { %v9248_v35 = vand.u32 4294901760, %v9247_v44  ;;  %v24895_v41 = vsub.f32 %v10432_v47, %v24888_v18 }
 0xc7b   :  { %v24611_v6 = vsub.f32 %v9130_v4, %v24608_v36  ;;  %v24613_v61 = vand.u32 4294901760, %v9779_v16 }
 0xc7d   :  { %v9214_v15 = vand.u32 4294901760, %v24611_v6  ;;  %v24623_v50 = vsub.f32 %v9779_v16, %v24613_v61  ;;  %v24635_v16 = vpack.c.bf16 %v9248_v35, %v9241_v10 }
 0xc7f   :  { %v9215_v13 = vsub.f32 %v24611_v6, %v9214_v15  ;;  %v9863_v4 = vand.u32 4294901760, %v24623_v50 }
 0xc81   :  { %v9216_v56 = vand.u32 4294901760, %v9215_v13  ;;  %v9864_v19 = vsub.f32 %v24623_v50, %v9863_v4 }
 0xc83   :  { %18327 = vmatmul.mubr.f32.vlgmr.msra.gmra.mrb[50].mxu0 %v9216_v56  ;;  %v9865_v25 = vand.u32 4294901760, %v9864_v19  ;;  %v24680_v19 = vpack.c.bf16 %v24598_v51, %v24593_v40  ;;  %v24757_v56 = vpack.c.bf16 %v9232_v14, %v9225_v48  ;;  %v26151_v48 = vand.u32 4294901760, %v24474_v39 }
 0xc84   :  { %20978 = vmatpush3.bf16.msra.mxu0 %v24629_v52  ;;  %18361 = vmatprep.mubr.msk.f32.mxu0 %vm22379_vm3, %v26139_v42  ;;  %v24825_v14 = vpack.c.bf16 %v26157_v58, %v26156_v7 }
 0xc85   :  { %18537 = vmatmul.mubr.f32.vlgmr.msra.gmra.mrb[52].mxu1 %v9865_v25  ;;  %20979 = vmatprep.subr.bf16.mxu0 %v22378_v29  ;;  %v24671_v25 = vpack.c.bf16 %v24586_v43, %v24581_v33  ;;  %v24769_v33 = vpack.c.bf16 %v9246_v9, %v9239_v55 }
 0xc86   :  { %21122 = vmatpush3.bf16.msra.mxu1 %v24629_v52  ;;  %18571 = vmatprep.mubr.msk.f32.mxu1 %vm22379_vm3, %v26139_v42 }
 0xc87   :  { %21123 = vmatprep.subr.bf16.mxu1 %v22378_v29 }
 0xc88   :  { %20981 = vmatpush3.bf16.msra.mxu0 %v24635_v16 }
 0xc89   :  { %20982 = vmatprep.subr.bf16.mxu0 %v22378_v29 }
 0xc8a   :  { %21125 = vmatpush3.bf16.msra.mxu1 %v24635_v16 }
 0xc8b   :  { %21126 = vmatprep.subr.bf16.mxu1 %v22378_v29 }
 0xc8c   :  { %20984 = vmatpush3.bf16.msra.mxu0 %v24491_v53 }
 0xc8d   :  { %20985 = vmatprep.subr.bf16.mxu0 %v22378_v29 }
 0xc8e   :  { %21128 = vmatpush3.bf16.msra.mxu1 %v24491_v53 }
 0xc8f   :  { %21129 = vmatprep.subr.bf16.mxu1 %v22378_v29 }
 0xc90   :  { %20987 = vmatpush3.bf16.msra.mxu0 %v24495_v37 }
 0xc91   :  { %20988 = vmatprep.subr.bf16.mxu0 %v22378_v29 }
 0xc92   :  { %21131 = vmatpush3.bf16.msra.mxu1 %v24495_v37 }
 0xc93   :  { %21132 = vmatprep.subr.bf16.mxu1 %v22378_v29 }
 0xc94   :  { %20990 = vmatpush3.bf16.msra.mxu0 %v24509_v5 }
 0xc95   :  { %20991 = vmatprep.subr.bf16.mxu0 %v22378_v29 }
 0xc96   :  { %21134 = vmatpush3.bf16.msra.mxu1 %v24509_v5 }
 0xc97   :  { %21135 = vmatprep.subr.bf16.mxu1 %v22378_v29 }
 0xc98   :  { %20993 = vmatpush3.bf16.msra.mxu0 %v24533_v32 }
 0xc99   :  { %20994 = vmatprep.subr.bf16.mxu0 %v22378_v29 }
 0xc9a   :  { %21137 = vmatpush3.bf16.msra.mxu1 %v24533_v32 }
 0xc9b   :  { %21138 = vmatprep.subr.bf16.mxu1 %v22378_v29 }
 0xc9c   :  { %20996 = vmatpush3.bf16.msra.mxu0 %v24537_v63 }
 0xc9d   :  { %20997 = vmatprep.subr.bf16.mxu0 %v22378_v29 }
 0xc9e   :  { %21140 = vmatpush3.bf16.msra.mxu1 %v24537_v63 }
 0xc9f   :  { %21141 = vmatprep.subr.bf16.mxu1 %v22378_v29 }
 0xca0   :  { %20999 = vmatpush3.bf16.msra.mxu0 %v24545_v22 }
 0xca1   :  { %21000 = vmatprep.subr.bf16.mxu0 %v22378_v29 }
 0xca2   :  { %21143 = vmatpush3.bf16.msra.mxu1 %v24545_v22 }
 0xca3   :  { %18362 = vmatmul.mubr.f32.vlgmr.msra.gmra.mrb[50].mxu0 %v24608_v36  ;;  %21144 = vmatprep.subr.bf16.mxu1 %v22378_v29 }
 0xca4   :  { %21002 = vmatpush3.bf16.msra.mxu0 %v24671_v25  ;;  %18396 = vmatprep.mubr.msk.f32.mxu0 %vm22379_vm3, %v26139_v42 }
 0xca5   :  { %18572 = vmatmul.mubr.f32.vlgmr.msra.gmra.mrb[52].mxu1 %v24613_v61  ;;  %21003 = vmatprep.subr.bf16.mxu0 %v22378_v29 }
 0xca6   :  { %21146 = vmatpush3.bf16.msra.mxu1 %v24671_v25  ;;  %18606 = vmatprep.mubr.msk.f32.mxu1 %vm22379_vm3, %v26139_v42 }
 0xca7   :  { %21147 = vmatprep.subr.bf16.mxu1 %v22378_v29 }
 0xca8   :  { %21005 = vmatpush3.bf16.msra.mxu0 %v24680_v19 }
 0xca9   :  { %21006 = vmatprep.subr.bf16.mxu0 %v22378_v29 }
 0xcaa   :  { %21149 = vmatpush3.bf16.msra.mxu1 %v24680_v19 }
 0xcab   :  { %21150 = vmatprep.subr.bf16.mxu1 %v22378_v29 }
 0xcac   :  { %21008 = vmatpush3.bf16.msra.mxu0 %v24549_v0 }
 0xcad   :  { %21009 = vmatprep.subr.bf16.mxu0 %v22378_v29 }
 0xcae   :  { %21152 = vmatpush3.bf16.msra.mxu1 %v24549_v0 }
 0xcaf   :  { %21153 = vmatprep.subr.bf16.mxu1 %v22378_v29 }
 0xcb0   :  { %21011 = vmatpush3.bf16.msra.mxu0 %v24553_v34 }
 0xcb1   :  { %21012 = vmatprep.subr.bf16.mxu0 %v22378_v29 }
 0xcb2   :  { %21155 = vmatpush3.bf16.msra.mxu1 %v24553_v34 }
 0xcb3   :  { %21156 = vmatprep.subr.bf16.mxu1 %v22378_v29 }
 0xcb4   :  { %21014 = vmatpush3.bf16.msra.mxu0 %v24557_v57 }
 0xcb5   :  { %21015 = vmatprep.subr.bf16.mxu0 %v22378_v29 }
 0xcb6   :  { %21158 = vmatpush3.bf16.msra.mxu1 %v24557_v57 }
 0xcb7   :  { %21159 = vmatprep.subr.bf16.mxu1 %v22378_v29 }
 0xcb8   :  { %21017 = vmatpush3.bf16.msra.mxu0 %v24561_v60 }
 0xcb9   :  { %21018 = vmatprep.subr.bf16.mxu0 %v22378_v29 }
 0xcba   :  { %21161 = vmatpush3.bf16.msra.mxu1 %v24561_v60 }
 0xcbb   :  { %21162 = vmatprep.subr.bf16.mxu1 %v22378_v29 }
 0xcbc   :  { %21020 = vmatpush3.bf16.msra.mxu0 %v24565_v11 }
 0xcbd   :  { %21021 = vmatprep.subr.bf16.mxu0 %v22378_v29 }
 0xcbe   :  { %21164 = vmatpush3.bf16.msra.mxu1 %v24565_v11 }
 0xcbf   :  { %21165 = vmatprep.subr.bf16.mxu1 %v22378_v29 }
 0xcc0   :  { %21023 = vmatpush3.bf16.msra.mxu0 %v24569_v8 }
 0xcc1   :  { %21024 = vmatprep.subr.bf16.mxu0 %v22378_v29 }
 0xcc2   :  { %21167 = vmatpush3.bf16.msra.mxu1 %v24569_v8 }
 0xcc3   :  { %18397 = vmatmul.mubr.f32.vlgmr.msra.gmra.mrb[50].mxu0 %v24611_v6  ;;  %21168 = vmatprep.subr.bf16.mxu1 %v22378_v29 }
 0xcc4   :  { %21026 = vmatpush3.bf16.msra.mxu0 %v24365_v38  ;;  %18431 = vmatprep.mubr.msk.f32.mxu0 %vm22379_vm3, %v26139_v42 }
 0xcc5   :  { %18607 = vmatmul.mubr.f32.vlgmr.msra.gmra.mrb[52].mxu1 %v24623_v50  ;;  %21027 = vmatprep.subr.bf16.mxu0 %v22378_v29  ;;  %v26150_v50 = vand.u32 4294901760, %v24472_v30  ;;  %v26155_v30 = vand.u32 4294901760, %v24505_v26  ;;  %v26159_v26 = vand.u32 4294901760, %v24531_v54 }
 0xcc6   :  { %21170 = vmatpush3.bf16.msra.mxu1 %v24365_v38  ;;  %18641 = vmatprep.mubr.msk.f32.mxu1 %vm22379_vm3, %v26139_v42 }
 0xcc7   :  { %21171 = vmatprep.subr.bf16.mxu1 %v22378_v29  ;;  %v24795_v43 = vpack.c.bf16 %v26151_v48, %v26150_v50  ;;  %v24899_v50 = vand.u32 4294901760, %v24895_v41 }
 0xcc8   :  { %21029 = vmatpush3.bf16.msra.mxu0 %v24372_v46 }
 0xcc9   :  { %21030 = vmatprep.subr.bf16.mxu0 %v22378_v29 }
 0xcca   :  { %21173 = vmatpush3.bf16.msra.mxu1 %v24372_v46 }
 0xccb   :  { %21174 = vmatprep.subr.bf16.mxu1 %v22378_v29 }
 0xccc   :  { %21032 = vmatpush3.bf16.msra.mxu0 %v24393_v20 }
 0xccd   :  { %21033 = vmatprep.subr.bf16.mxu0 %v22378_v29 }
 0xcce   :  { %21176 = vmatpush3.bf16.msra.mxu1 %v24393_v20 }
 0xccf   :  { %21177 = vmatprep.subr.bf16.mxu1 %v22378_v29 }
 0xcd0   :  { %21035 = vmatpush3.bf16.msra.mxu0 %v24405_v23 }
 0xcd1   :  { %21036 = vmatprep.subr.bf16.mxu0 %v22378_v29 }
 0xcd2   :  { %21179 = vmatpush3.bf16.msra.mxu1 %v24405_v23 }
 0xcd3   :  { %21180 = vmatprep.subr.bf16.mxu1 %v22378_v29 }
 0xcd4   :  { %21038 = vmatpush3.bf16.msra.mxu0 %v24417_v1 }
 0xcd5   :  { %21039 = vmatprep.subr.bf16.mxu0 %v22378_v29 }
 0xcd6   :  { %21182 = vmatpush3.bf16.msra.mxu1 %v24417_v1 }
 0xcd7   :  { %21183 = vmatprep.subr.bf16.mxu1 %v22378_v29 }
 0xcd8   :  { %21041 = vmatpush3.bf16.msra.mxu0 %v24429_v2 }
 0xcd9   :  { %21042 = vmatprep.subr.bf16.mxu0 %v22378_v29 }
 0xcda   :  { %21185 = vmatpush3.bf16.msra.mxu1 %v24429_v2 }
 0xcdb   :  { %21186 = vmatprep.subr.bf16.mxu1 %v22378_v29 }
 0xcdc   :  { %21044 = vmatpush3.bf16.msra.mxu0 %v24441_v12 }
 0xcdd   :  { %21045 = vmatprep.subr.bf16.mxu0 %v22378_v29 }
 0xcde   :  { %21188 = vmatpush3.bf16.msra.mxu1 %v24441_v12 }
 0xcdf   :  { %21189 = vmatprep.subr.bf16.mxu1 %v22378_v29 }
 0xce0   :  { %21047 = vmatpush3.bf16.msra.mxu0 %v24453_v27 }
 0xce1   :  { %21048 = vmatprep.subr.bf16.mxu0 %v22378_v29 }
 0xce2   :  { %21191 = vmatpush3.bf16.msra.mxu1 %v24453_v27 }
 0xce3   :  { %18432 = vmatmul.mubr.f32.vlgmr.msra.gmra.mrb[50].mxu0 %v9214_v15  ;;  %21192 = vmatprep.subr.bf16.mxu1 %v22378_v29  ;;  %v24785_v15 = vpack.c.bf16 %v9260_v28, %v9253_v21  ;;  %v24805_v21 = vpack.c.bf16 %v26153_v62, %v26152_v59  ;;  %v26154_v28 = vand.u32 4294901760, %v24503_v3  ;;  %v26158_v3 = vand.u32 4294901760, %v24529_v24 }
 0xce4   :  { %21050 = vmatpush3.bf16.msra.mxu0 %v24757_v56  ;;  %18466 = vmatprep.mubr.msk.f32.mxu0 %vm22379_vm3, %v26139_v42 }
 0xce5   :  { %18642 = vmatmul.mubr.f32.vlgmr.msra.gmra.mrb[52].mxu1 %v9863_v4  ;;  %21051 = vmatprep.subr.bf16.mxu0 %v22378_v29  ;;  %v24815_v39 = vpack.c.bf16 %v26155_v30, %v26154_v28  ;;  %v24835_v40 = vpack.c.bf16 %v26159_v26, %v26158_v3  ;;  %v10429_v4 = vld [vmem:[#allocation11 + $0x3] sm:$0x1]  ;;  %v10516_v28 = vsub.f32 %v24895_v41, %v24899_v50 }
 0xce6   :  { %21194 = vmatpush3.bf16.msra.mxu1 %v24757_v56  ;;  %18676 = vmatprep.mubr.msk.f32.mxu1 %vm22379_vm3, %v26139_v42 }
 0xce7   :  { %21195 = vmatprep.subr.bf16.mxu1 %v22378_v29  ;;  %v24904_v47 = vand.u32 4294901760, %v10516_v28 }
 0xce8   :  { %21053 = vmatpush3.bf16.msra.mxu0 %v24769_v33 }
 0xce9   :  { %21054 = vmatprep.subr.bf16.mxu0 %v22378_v29 }
 0xcea   :  { %21197 = vmatpush3.bf16.msra.mxu1 %v24769_v33 }
 0xceb   :  { %21198 = vmatprep.subr.bf16.mxu1 %v22378_v29 }
 0xcec   :  { %21056 = vmatpush3.bf16.msra.mxu0 %v24785_v15 }
 0xced   :  { %21057 = vmatprep.subr.bf16.mxu0 %v22378_v29 }
 0xcee   :  { %21200 = vmatpush3.bf16.msra.mxu1 %v24785_v15 }
 0xcef   :  { %21201 = vmatprep.subr.bf16.mxu1 %v22378_v29 }
 0xcf0   :  { %21059 = vmatpush3.bf16.msra.mxu0 %v24795_v43 }
 0xcf1   :  { %21060 = vmatprep.subr.bf16.mxu0 %v22378_v29 }
 0xcf2   :  { %21203 = vmatpush3.bf16.msra.mxu1 %v24795_v43 }
 0xcf3   :  { %21204 = vmatprep.subr.bf16.mxu1 %v22378_v29 }
 0xcf4   :  { %21062 = vmatpush3.bf16.msra.mxu0 %v24805_v21 }
 0xcf5   :  { %21063 = vmatprep.subr.bf16.mxu0 %v22378_v29 }
 0xcf6   :  { %21206 = vmatpush3.bf16.msra.mxu1 %v24805_v21 }
 0xcf7   :  { %21207 = vmatprep.subr.bf16.mxu1 %v22378_v29 }
 0xcf8   :  { %21065 = vmatpush3.bf16.msra.mxu0 %v24815_v39 }
 0xcf9   :  { %21066 = vmatprep.subr.bf16.mxu0 %v22378_v29 }
 0xcfa   :  { %21209 = vmatpush3.bf16.msra.mxu1 %v24815_v39 }
 0xcfb   :  { %21210 = vmatprep.subr.bf16.mxu1 %v22378_v29 }
 0xcfc   :  { %21068 = vmatpush3.bf16.msra.mxu0 %v24825_v14 }
 0xcfd   :  { %21069 = vmatprep.subr.bf16.mxu0 %v22378_v29 }
 0xcfe   :  { %21212 = vmatpush3.bf16.msra.mxu1 %v24825_v14 }
 0xcff   :  { %21213 = vmatprep.subr.bf16.mxu1 %v22378_v29 }
 0xd00   :  { %21071 = vmatpush3.bf16.msra.mxu0 %v24835_v40 }
 0xd01   :  { %21072 = vmatprep.subr.bf16.mxu0 %v22378_v29 }
 0xd02   :  { %21215 = vmatpush3.bf16.msra.mxu1 %v24835_v40 }
 0xd03   :  { %18467 = vmatmul.mubr.f32.vlgmr.msra.gmra.mrb[50].mxu0 %v24608_v36  ;;  %21216 = vmatprep.subr.bf16.mxu1 %v22378_v29 }
 0xd04   :  { %21074 = vmatpush3.bf16.msra.mxu0 %v24365_v38  ;;  %18501 = vmatprep.mubr.msk.f32.mxu0 %vm22379_vm3, %v26139_v42 }
 0xd05   :  { %18677 = vmatmul.mubr.f32.vlgmr.msra.gmra.mrb[52].mxu1 %v24613_v61  ;;  %21075 = vmatprep.subr.bf16.mxu0 %v22378_v29 }
 0xd06   :  { %21218 = vmatpush3.bf16.msra.mxu1 %v24365_v38  ;;  %18711 = vmatprep.mubr.msk.f32.mxu1 %vm22379_vm3, %v26139_v42 }
 0xd07   :  { %21219 = vmatprep.subr.bf16.mxu1 %v22378_v29 }
 0xd08   :  { %21077 = vmatpush3.bf16.msra.mxu0 %v24372_v46 }
 0xd09   :  { %21078 = vmatprep.subr.bf16.mxu0 %v22378_v29 }
 0xd0a   :  { %21221 = vmatpush3.bf16.msra.mxu1 %v24372_v46 }
 0xd0b   :  { %21222 = vmatprep.subr.bf16.mxu1 %v22378_v29 }
 0xd0c   :  { %21080 = vmatpush3.bf16.msra.mxu0 %v24393_v20 }
 0xd0d   :  { %21081 = vmatprep.subr.bf16.mxu0 %v22378_v29 }
 0xd0e   :  { %21224 = vmatpush3.bf16.msra.mxu1 %v24393_v20 }
 0xd0f   :  { %21225 = vmatprep.subr.bf16.mxu1 %v22378_v29 }
 0xd10   :  { %21083 = vmatpush3.bf16.msra.mxu0 %v24405_v23 }
 0xd11   :  { %21084 = vmatprep.subr.bf16.mxu0 %v22378_v29 }
 0xd12   :  { %21227 = vmatpush3.bf16.msra.mxu1 %v24405_v23 }
 0xd13   :  { %21228 = vmatprep.subr.bf16.mxu1 %v22378_v29 }
 0xd14   :  { %21086 = vmatpush3.bf16.msra.mxu0 %v24417_v1 }
 0xd15   :  { %21087 = vmatprep.subr.bf16.mxu0 %v22378_v29 }
 0xd16   :  { %21230 = vmatpush3.bf16.msra.mxu1 %v24417_v1 }
 0xd17   :  { %21231 = vmatprep.subr.bf16.mxu1 %v22378_v29 }
 0xd18   :  { %21089 = vmatpush3.bf16.msra.mxu0 %v24429_v2 }
 0xd19   :  { %21090 = vmatprep.subr.bf16.mxu0 %v22378_v29 }
 0xd1a   :  { %21233 = vmatpush3.bf16.msra.mxu1 %v24429_v2 }
 0xd1b   :  { %21234 = vmatprep.subr.bf16.mxu1 %v22378_v29 }
 0xd1c   :  { %21092 = vmatpush3.bf16.msra.mxu0 %v24441_v12 }
 0xd1d   :  { %21093 = vmatprep.subr.bf16.mxu0 %v22378_v29 }
 0xd1e   :  { %21236 = vmatpush3.bf16.msra.mxu1 %v24441_v12 }
 0xd1f   :  { %21237 = vmatprep.subr.bf16.mxu1 %v22378_v29 }
 0xd20   :  { %21095 = vmatpush3.bf16.msra.mxu0 %v24453_v27 }
 0xd21   :  { %18714 = vmatprep.subr.mxu0 %v26139_v42 }
 0xd22   :  { %21239 = vmatpush3.bf16.msra.mxu1 %v24453_v27 }
 0xd23   :  { %18502 = vmatmul.mubr.f32.vlgmr.msra.gmra.mrb[50].mxu0 %v24608_v36  ;;  %18744 = vmatprep.subr.mxu1 %v26139_v42 }
 0xd24   :  { %18716 = vmatprep.mubr.msk.f32.mxu0 %vm22379_vm3, %v26139_v42  ;;  %18715 = vmatpush3.msra.mxu0 %v24888_v18 }
 0xd25   :  { %18712 = vmatmul.mubr.f32.vlgmr.msra.gmra.mrb[52].mxu1 %v24613_v61  ;;  %18719 = vmatprep.subr.mxu0 %v26139_v42 }
 0xd26   :  { %18746 = vmatprep.mubr.msk.f32.mxu1 %vm22379_vm3, %v26139_v42  ;;  %18745 = vmatpush3.msra.mxu1 %v24888_v18 }
 0xd27   :  { %18749 = vmatprep.subr.mxu1 %v26139_v42 }
 0xdf6   :  { %v9768_v24 = vpop.f32.mrb[50].mxu0 }
 0xdf7   :  { %v10421_v54 = vmul.f32 0.015625, %v9768_v24  ;;  %v18503_v51 = vpop.f32.mrb[51].mxu0 }
 0xdf8   :  { %v10417_v55 = vpop.f32.mrb[52].mxu1 }
 0xdf9   :  { %v10423_v9 = vmul.f32 %v10421_v54, %v10421_v54  ;;  %v10422_v36 = vmul.f32 0.015625, %v10417_v55  ;;  %v18713_v6 = vpop.f32.mrb[53].mxu1 }
 0xdfa   :  { %v22144_v6 = vld [vmem:[#allocation5 + $0x10] sm:$0xff]  }
 0xdfb   :  { %v10424_v61 = vsub.f32 %v10422_v36, %v10423_v9  ;;  %v22142_v9 = vld [vmem:[#allocation5] sm:$0xff]   ;;  %v22143_v36 = vld [vmem:[#allocation5 + $0x8] sm:$0xff]  }
 0xdfd   :  { %v10426_v49 = vadd.f32 1e-05, %v10424_v61  ;;  %v22145_v61 = vld [vmem:[#allocation5 + $0x18] sm:$0xff]  }
 0xdff   :  { %22173 = vrsqrt.f32 %v10426_v49  ;;  %v22146_v49 = vld [vmem:[#allocation5 + $0x20] sm:$0xff]  }
 0xe09   :  { %v22174_v44 = vpop.eup %22173 }
 0xe0a   :  { %v10428_v13 = vmul.f32 %v22174_v44, %v10425_v45  ;;  %v22147_v45 = vld [vmem:[#allocation5 + $0x28] sm:$0xff]   ;;  %v22148_v44 = vld [vmem:[#allocation5 + $0x30] sm:$0xff]  }
 0xe0c   :  { %v10430_v10 = vmul.f32 %v10428_v13, %v10421_v54  ;;  %v10434_v35 = vsel %vm2063_vm2, %v10428_v13, 0  ;;  %v22149_v13 = vld [vmem:[#allocation5 + $0x38] sm:$0xff]  }
 0xe0d   :  { %v10502_v48 = vand.u32 4294901760, %v10434_v35 }
 0xe0e   :  { %v10431_v59 = vsub.f32 %v10429_v4, %v10430_v10 }
 0xe0f   :  { %v10503_v62 = vsub.f32 %v10434_v35, %v10502_v48 }
 0xe10   :  { %v10883_v30 = vsel %vm2063_vm2, %v10431_v59, 0 }
 0xe11   :  { %v10504_v7 = vand.u32 4294901760, %v10503_v62  ;;  %v10951_v58 = vand.u32 4294901760, %v10883_v30 }
 0xe13   :  { %v10505_v3 = vsub.f32 %v10503_v62, %v10504_v7  ;;  %v10952_v26 = vsub.f32 %v10883_v30, %v10951_v58 }
 0xe15   :  { %v10506_v24 = vand.u32 4294901760, %v10505_v3  ;;  %v10953_v54 = vand.u32 4294901760, %v10952_v26 }
 0xe17   :  { %18717 = vmatmul.mubr.f32.vlgmr.msra.gmra.mrb[52].mxu0 %v10506_v24  ;;  %v10954_v51 = vsub.f32 %v10952_v26, %v10953_v54 }
 0xe18   :  { %18720 = vmatpush3.msra.mxu0 %v24904_v47  ;;  %18721 = vmatprep.mubr.msk.f32.mxu0 %vm22379_vm3, %v26139_v42 }
 0xe19   :  { %v10955_v55 = vand.u32 4294901760, %v10954_v51  ;;  %18724 = vmatprep.subr.mxu0 %v26139_v42 }
 0xe1b   :  { %18747 = vmatmul.mubr.f32.vlgmr.msra.gmra.mrb[54].mxu1 %v10955_v55 }
 0xe1c   :  { %18750 = vmatpush3.msra.mxu1 %v24904_v47  ;;  %18751 = vmatprep.mubr.msk.f32.mxu1 %vm22379_vm3, %v26139_v42 }
 0xe1d   :  { %18754 = vmatprep.subr.mxu1 %v26139_v42 }
 0xe1f   :  { %18722 = vmatmul.mubr.f32.vlgmr.msra.gmra.mrb[52].mxu0 %v10502_v48 }
 0xe20   :  { %18725 = vmatpush3.msra.mxu0 %v24895_v41  ;;  %18726 = vmatprep.mubr.msk.f32.mxu0 %vm22379_vm3, %v26139_v42 }
 0xe21   :  { %18729 = vmatprep.subr.mxu0 %v26139_v42 }
 0xe23   :  { %18752 = vmatmul.mubr.f32.vlgmr.msra.gmra.mrb[54].mxu1 %v10951_v58 }
 0xe24   :  { %18755 = vmatpush3.msra.mxu1 %v24895_v41  ;;  %18756 = vmatprep.mubr.msk.f32.mxu1 %vm22379_vm3, %v26139_v42 }
 0xe25   :  { %18759 = vmatprep.subr.mxu1 %v26139_v42 }
 0xe27   :  { %18727 = vmatmul.mubr.f32.vlgmr.msra.gmra.mrb[52].mxu0 %v10503_v62 }
 0xe28   :  { %18730 = vmatpush3.msra.mxu0 %v24888_v18  ;;  %18731 = vmatprep.mubr.msk.f32.mxu0 %vm22379_vm3, %v26139_v42 }
 0xe29   :  { %18734 = vmatprep.subr.mxu0 %v26139_v42 }
 0xe2b   :  { %18757 = vmatmul.mubr.f32.vlgmr.msra.gmra.mrb[54].mxu1 %v10952_v26 }
 0xe2c   :  { %18760 = vmatpush3.msra.mxu1 %v24888_v18  ;;  %18761 = vmatprep.mubr.msk.f32.mxu1 %vm22379_vm3, %v26139_v42 }
 0xe2d   :  { %18764 = vmatprep.subr.mxu1 %v26139_v42 }
 0xe2f   :  { %18732 = vmatmul.mubr.f32.vlgmr.msra.gmra.mrb[52].mxu0 %v10504_v7 }
 0xe30   :  { %18735 = vmatpush3.msra.mxu0 %v24899_v50  ;;  %18736 = vmatprep.mubr.msk.f32.mxu0 %vm22379_vm3, %v26139_v42 }
 0xe31   :  { %18739 = vmatprep.subr.mxu0 %v26139_v42 }
 0xe33   :  { %18762 = vmatmul.mubr.f32.vlgmr.msra.gmra.mrb[54].mxu1 %v10953_v54 }
 0xe34   :  { %18765 = vmatpush3.msra.mxu1 %v24899_v50  ;;  %18766 = vmatprep.mubr.msk.f32.mxu1 %vm22379_vm3, %v26139_v42 }
 0xe35   :  { %18769 = vmatprep.subr.mxu1 %v26139_v42 }
 0xe37   :  { %18737 = vmatmul.mubr.f32.vlgmr.msra.gmra.mrb[52].mxu0 %v10502_v48 }
 0xe38   :  { %18740 = vmatpush3.msra.mxu0 %v24888_v18  ;;  %18741 = vmatprep.mubr.msk.f32.mxu0 %vm22379_vm3, %v26139_v42 }
 0xe39   :  { %18774 = vmatprep.subr.bf16.mxu0 %v26139_v42 }
 0xe3b   :  { %18767 = vmatmul.mubr.f32.vlgmr.msra.gmra.mrb[54].mxu1 %v10951_v58 }
 0xe3c   :  { %18770 = vmatpush3.msra.mxu1 %v24888_v18  ;;  %18771 = vmatprep.mubr.msk.f32.mxu1 %vm22379_vm3, %v26139_v42 }
 0xe3d   :  { %21240 = vmatprep.subr.bf16.mxu1 %v22378_v29 }
 0xe3f   :  { %18742 = vmatmul.mubr.f32.vlgmr.msra.gmra.mrb[52].mxu0 %v10502_v48 }
 0xe40   :  { %18775 = vmatpush3.bf16.msra.mxu0 %v22142_v9  ;;  %18790 = vmatprep.mubr.msk.bf16.mxu0 %vm22379_vm3, %v26139_v42 }
 0xe41   :  { %18776 = vmatprep.subr.bf16.mxu0 %v26139_v42 }
 0xe43   :  { %18772 = vmatmul.mubr.f32.vlgmr.msra.gmra.mrb[54].mxu1 %v10951_v58 }
 0xe44   :  { %18777 = vmatpush3.bf16.msra.mxu0 %v22143_v36  ;;  %21242 = vmatpush3.bf16.msra.mxu1 %v24365_v38 }
 0xe45   :  { %18778 = vmatprep.subr.bf16.mxu0 %v26139_v42  ;;  %21243 = vmatprep.subr.bf16.mxu1 %v22378_v29 }
 0xe46   :  { %18826 = vmatprep.mubr.msk.f32.mxu1 %vm22379_vm3, %v26139_v42 }
 0xe48   :  { %18779 = vmatpush3.bf16.msra.mxu0 %v22144_v6  ;;  %21245 = vmatpush3.bf16.msra.mxu1 %v24372_v46 }
 0xe49   :  { %18780 = vmatprep.subr.bf16.mxu0 %v26139_v42  ;;  %21246 = vmatprep.subr.bf16.mxu1 %v22378_v29 }
 0xe4c   :  { %18781 = vmatpush3.bf16.msra.mxu0 %v22145_v61  ;;  %21248 = vmatpush3.bf16.msra.mxu1 %v24393_v20 }
 0xe4d   :  { %18782 = vmatprep.subr.bf16.mxu0 %v26139_v42  ;;  %21249 = vmatprep.subr.bf16.mxu1 %v22378_v29 }
 0xe50   :  { %18783 = vmatpush3.bf16.msra.mxu0 %v22146_v49  ;;  %21251 = vmatpush3.bf16.msra.mxu1 %v24405_v23 }
 0xe51   :  { %18784 = vmatprep.subr.bf16.mxu0 %v26139_v42  ;;  %21252 = vmatprep.subr.bf16.mxu1 %v22378_v29 }
 0xe54   :  { %21254 = vmatpush3.bf16.msra.mxu1 %v24417_v1  ;;  %18785 = vmatpush3.bf16.msra.mxu0 %v22147_v45 }
 0xe55   :  { %21255 = vmatprep.subr.bf16.mxu1 %v22378_v29  ;;  %18786 = vmatprep.subr.bf16.mxu0 %v26139_v42 }
 0xe58   :  { %21257 = vmatpush3.bf16.msra.mxu1 %v24429_v2  ;;  %18787 = vmatpush3.bf16.msra.mxu0 %v22148_v44 }
 0xe59   :  { %21258 = vmatprep.subr.bf16.mxu1 %v22378_v29  ;;  %18788 = vmatprep.subr.bf16.mxu0 %v26139_v42 }
 0xe5c   :  { %21260 = vmatpush3.bf16.msra.mxu1 %v24441_v12  ;;  %18789 = vmatpush3.bf16.msra.mxu0 %v22149_v13 }
 0xe5d   :  { %21261 = vmatprep.subr.bf16.mxu1 %v22378_v29  ;;  %21384 = vmatprep.subr.bf16.mxu0 %v22378_v29 }
 0xe60   :  { %21263 = vmatpush3.bf16.msra.mxu1 %v24453_v27 }
 0xe61   :  { %21264 = vmatprep.subr.bf16.mxu1 %v22378_v29 }
 0xf12   :  { %v10878_v4 = vpop.f32.mrb[52].mxu0 }
 0xf13   :  { %v11334_v10 = vrot.slane %v10878_v4, %v26147_v17  ;;  %v18743_v35 = vpop.f32.mrb[53].mxu0 }
 0xf15   :  { %v11335_v59 = vmul.f32 %v24571_v31, %v11334_v10 }
 0xf16   :  { %v11327_v48 = vpop.f32.mrb[54].mxu1 }
 0xf17   :  { %v11339_v62 = vrot.slane %v11327_v48, %v26147_v17  ;;  %v18773_v28 = vpop.f32.mrb[55].mxu1 }
 0xf19   :  { %v11340_v30 = vadd.f32 %v11339_v62, %v11335_v59 }
 0xf1b   :  { %v11341_v7 = vmax.f32 %v11340_v30, 0.0 }
 0xf1d   :  { %v11342_v58 = vpack.c.bf16 %v11341_v7, %v11341_v7 }
 0xf1f   :  { %18791 = vmatmul.mubr.bf16.vlgmr.msra.gmra.mrb[56].mxu0 %v11342_v58 }
 0xf20   :  { %21386 = vmatpush3.bf16.msra.mxu0 %v24365_v38  ;;  %19036 = vmatprep.mubr.msk.f32.mxu0 %vm22379_vm3, %v26139_v42 }
 0xf21   :  { %21387 = vmatprep.subr.bf16.mxu0 %v22378_v29 }
 0xf24   :  { %21389 = vmatpush3.bf16.msra.mxu0 %v24372_v46 }
 0xf25   :  { %21390 = vmatprep.subr.bf16.mxu0 %v22378_v29 }
 0xf28   :  { %21392 = vmatpush3.bf16.msra.mxu0 %v24393_v20 }
 0xf29   :  { %21393 = vmatprep.subr.bf16.mxu0 %v22378_v29 }
 0xf2c   :  { %21395 = vmatpush3.bf16.msra.mxu0 %v24405_v23 }
 0xf2d   :  { %21396 = vmatprep.subr.bf16.mxu0 %v22378_v29 }
 0xf30   :  { %21398 = vmatpush3.bf16.msra.mxu0 %v24417_v1 }
 0xf31   :  { %21399 = vmatprep.subr.bf16.mxu0 %v22378_v29 }
 0xf34   :  { %21401 = vmatpush3.bf16.msra.mxu0 %v24429_v2 }
 0xf35   :  { %21402 = vmatprep.subr.bf16.mxu0 %v22378_v29 }
 0xf38   :  { %21404 = vmatpush3.bf16.msra.mxu0 %v24441_v12 }
 0xf39   :  { %21405 = vmatprep.subr.bf16.mxu0 %v22378_v29 }
 0xf3c   :  { %21407 = vmatpush3.bf16.msra.mxu0 %v24453_v27 }
 0xf3d   :  { %21408 = vmatprep.subr.bf16.mxu0 %v22378_v29 }
 0xff2   :  { %v24995_v31 = vpop.f32.mrb[56].mxu0 }
 0xff3   :  { %v11447_v3 = vsel %vm295_vm1, %v24995_v31, 0.0  ;;  %v12095_v26 = vmul.f32 %v24995_v31, %v24995_v31  ;;  %v18792_v24 = vpop.f32.mrb[57].mxu0 }
 0xff4   :  { %v11448_v54 = vrot.slane %v11447_v3, 4  ;;  %v11444_v51 = vpop.f32.mrb[58].mxu0 }
 0xff5   :  { %v12096_v55 = vsel %vm295_vm1, %v12095_v26, 0.0  ;;  %v18793_v9 = vpop.f32.mrb[59].mxu0 }
 0xff6   :  { %v11449_v36 = vadd.f32 %v11448_v54, %v11447_v3  ;;  %v12097_v6 = vrot.slane %v12096_v55, 4 }
 0xff8   :  { %v11450_v61 = vrot.slane %v11449_v36, 2  ;;  %v12098_v49 = vadd.f32 %v12097_v6, %v12096_v55 }
 0xffa   :  { %v11451_v45 = vadd.f32 %v11450_v61, %v11449_v36  ;;  %v12099_v44 = vrot.slane %v12098_v49, 2 }
 0xffc   :  { %v11452_v13 = vrot.slane %v11451_v45, 1  ;;  %v12100_v4 = vadd.f32 %v12099_v44, %v12098_v49 }
 0xffe   :  { %v11453_v10 = vadd.f32 %v11452_v13, %v11451_v45  ;;  %v12101_v35 = vrot.slane %v12100_v4, 1  ;;  %v12748_v13 = vld [vmem:[#allocation10 + $0x4] sm:$0x1] }
0x1000   :  { %v25002_v48 = vand.u32 4294901760, %v11453_v10  ;;  %v12102_v59 = vadd.f32 %v12101_v35, %v12100_v4  ;;  %v12752_v35 = vld [vmem:[#allocation11 + $0x4] sm:$0x1] }
0x1002   :  { %v25005_v62 = vsub.f32 %v11453_v10, %v25002_v48  ;;  %v25007_v28 = vand.u32 4294901760, %v12102_v59 }
0x1004   :  { %v11537_v30 = vand.u32 4294901760, %v25005_v62  ;;  %v25011_v7 = vsub.f32 %v12102_v59, %v25007_v28 }
0x1006   :  { %v11538_v58 = vsub.f32 %v25005_v62, %v11537_v30  ;;  %v12186_v3 = vand.u32 4294901760, %v25011_v7 }
0x1008   :  { %v11539_v26 = vand.u32 4294901760, %v11538_v58  ;;  %v12187_v24 = vsub.f32 %v25011_v7, %v12186_v3 }
0x100a   :  { %18827 = vmatmul.mubr.f32.vlgmr.msra.gmra.mrb[56].mxu1 %v11539_v26  ;;  %v12188_v54 = vand.u32 4294901760, %v12187_v24 }
0x100b   :  { %21266 = vmatpush3.bf16.msra.mxu1 %v24629_v52  ;;  %18861 = vmatprep.mubr.msk.f32.mxu1 %vm22379_vm3, %v26139_v42 }
0x100c   :  { %19037 = vmatmul.mubr.f32.vlgmr.msra.gmra.mrb[54].mxu0 %v12188_v54  ;;  %21267 = vmatprep.subr.bf16.mxu1 %v22378_v29 }
0x100d   :  { %21410 = vmatpush3.bf16.msra.mxu0 %v24629_v52  ;;  %19071 = vmatprep.mubr.msk.f32.mxu0 %vm22379_vm3, %v26139_v42 }
0x100e   :  { %21411 = vmatprep.subr.bf16.mxu0 %v22378_v29 }
0x100f   :  { %21269 = vmatpush3.bf16.msra.mxu1 %v24635_v16 }
0x1010   :  { %21270 = vmatprep.subr.bf16.mxu1 %v22378_v29 }
0x1011   :  { %21413 = vmatpush3.bf16.msra.mxu0 %v24635_v16 }
0x1012   :  { %21414 = vmatprep.subr.bf16.mxu0 %v22378_v29 }
0x1013   :  { %21272 = vmatpush3.bf16.msra.mxu1 %v24491_v53 }
0x1014   :  { %21273 = vmatprep.subr.bf16.mxu1 %v22378_v29 }
0x1015   :  { %21416 = vmatpush3.bf16.msra.mxu0 %v24491_v53 }
0x1016   :  { %21417 = vmatprep.subr.bf16.mxu0 %v22378_v29 }
0x1017   :  { %21275 = vmatpush3.bf16.msra.mxu1 %v24495_v37 }
0x1018   :  { %21276 = vmatprep.subr.bf16.mxu1 %v22378_v29 }
0x1019   :  { %21419 = vmatpush3.bf16.msra.mxu0 %v24495_v37 }
0x101a   :  { %21420 = vmatprep.subr.bf16.mxu0 %v22378_v29 }
0x101b   :  { %21278 = vmatpush3.bf16.msra.mxu1 %v24509_v5 }
0x101c   :  { %21279 = vmatprep.subr.bf16.mxu1 %v22378_v29 }
0x101d   :  { %21422 = vmatpush3.bf16.msra.mxu0 %v24509_v5 }
0x101e   :  { %21423 = vmatprep.subr.bf16.mxu0 %v22378_v29 }
0x101f   :  { %21281 = vmatpush3.bf16.msra.mxu1 %v24533_v32 }
0x1020   :  { %21282 = vmatprep.subr.bf16.mxu1 %v22378_v29 }
0x1021   :  { %21425 = vmatpush3.bf16.msra.mxu0 %v24533_v32 }
0x1022   :  { %21426 = vmatprep.subr.bf16.mxu0 %v22378_v29 }
0x1023   :  { %21284 = vmatpush3.bf16.msra.mxu1 %v24537_v63 }
0x1024   :  { %21285 = vmatprep.subr.bf16.mxu1 %v22378_v29 }
0x1025   :  { %21428 = vmatpush3.bf16.msra.mxu0 %v24537_v63 }
0x1026   :  { %21429 = vmatprep.subr.bf16.mxu0 %v22378_v29 }
0x1027   :  { %21287 = vmatpush3.bf16.msra.mxu1 %v24545_v22 }
0x1028   :  { %21288 = vmatprep.subr.bf16.mxu1 %v22378_v29 }
0x1029   :  { %21431 = vmatpush3.bf16.msra.mxu0 %v24545_v22 }
0x102a   :  { %18862 = vmatmul.mubr.f32.vlgmr.msra.gmra.mrb[56].mxu1 %v25002_v48  ;;  %21432 = vmatprep.subr.bf16.mxu0 %v22378_v29 }
0x102b   :  { %21290 = vmatpush3.bf16.msra.mxu1 %v24671_v25  ;;  %18896 = vmatprep.mubr.msk.f32.mxu1 %vm22379_vm3, %v26139_v42 }
0x102c   :  { %19072 = vmatmul.mubr.f32.vlgmr.msra.gmra.mrb[54].mxu0 %v25007_v28  ;;  %21291 = vmatprep.subr.bf16.mxu1 %v22378_v29 }
0x102d   :  { %21434 = vmatpush3.bf16.msra.mxu0 %v24671_v25  ;;  %19106 = vmatprep.mubr.msk.f32.mxu0 %vm22379_vm3, %v26139_v42 }
0x102e   :  { %21435 = vmatprep.subr.bf16.mxu0 %v22378_v29 }
0x102f   :  { %21293 = vmatpush3.bf16.msra.mxu1 %v24680_v19 }
0x1030   :  { %21294 = vmatprep.subr.bf16.mxu1 %v22378_v29 }
0x1031   :  { %21437 = vmatpush3.bf16.msra.mxu0 %v24680_v19 }
0x1032   :  { %21438 = vmatprep.subr.bf16.mxu0 %v22378_v29 }
0x1033   :  { %21296 = vmatpush3.bf16.msra.mxu1 %v24549_v0 }
0x1034   :  { %21297 = vmatprep.subr.bf16.mxu1 %v22378_v29 }
0x1035   :  { %21440 = vmatpush3.bf16.msra.mxu0 %v24549_v0 }
0x1036   :  { %21441 = vmatprep.subr.bf16.mxu0 %v22378_v29 }
0x1037   :  { %21299 = vmatpush3.bf16.msra.mxu1 %v24553_v34 }
0x1038   :  { %21300 = vmatprep.subr.bf16.mxu1 %v22378_v29 }
0x1039   :  { %21443 = vmatpush3.bf16.msra.mxu0 %v24553_v34 }
0x103a   :  { %21444 = vmatprep.subr.bf16.mxu0 %v22378_v29 }
0x103b   :  { %21302 = vmatpush3.bf16.msra.mxu1 %v24557_v57 }
0x103c   :  { %21303 = vmatprep.subr.bf16.mxu1 %v22378_v29 }
0x103d   :  { %21446 = vmatpush3.bf16.msra.mxu0 %v24557_v57 }
0x103e   :  { %21447 = vmatprep.subr.bf16.mxu0 %v22378_v29 }
0x103f   :  { %21305 = vmatpush3.bf16.msra.mxu1 %v24561_v60 }
0x1040   :  { %21306 = vmatprep.subr.bf16.mxu1 %v22378_v29 }
0x1041   :  { %21449 = vmatpush3.bf16.msra.mxu0 %v24561_v60 }
0x1042   :  { %21450 = vmatprep.subr.bf16.mxu0 %v22378_v29 }
0x1043   :  { %21308 = vmatpush3.bf16.msra.mxu1 %v24565_v11 }
0x1044   :  { %21309 = vmatprep.subr.bf16.mxu1 %v22378_v29 }
0x1045   :  { %21452 = vmatpush3.bf16.msra.mxu0 %v24565_v11 }
0x1046   :  { %21453 = vmatprep.subr.bf16.mxu0 %v22378_v29 }
0x1047   :  { %21311 = vmatpush3.bf16.msra.mxu1 %v24569_v8 }
0x1048   :  { %21312 = vmatprep.subr.bf16.mxu1 %v22378_v29 }
0x1049   :  { %21455 = vmatpush3.bf16.msra.mxu0 %v24569_v8 }
0x104a   :  { %18897 = vmatmul.mubr.f32.vlgmr.msra.gmra.mrb[56].mxu1 %v25005_v62  ;;  %21456 = vmatprep.subr.bf16.mxu0 %v22378_v29 }
0x104b   :  { %21314 = vmatpush3.bf16.msra.mxu1 %v24365_v38  ;;  %18931 = vmatprep.mubr.msk.f32.mxu1 %vm22379_vm3, %v26139_v42 }
0x104c   :  { %19107 = vmatmul.mubr.f32.vlgmr.msra.gmra.mrb[54].mxu0 %v25011_v7  ;;  %21315 = vmatprep.subr.bf16.mxu1 %v22378_v29 }
0x104d   :  { %21458 = vmatpush3.bf16.msra.mxu0 %v24365_v38  ;;  %19141 = vmatprep.mubr.msk.f32.mxu0 %vm22379_vm3, %v26139_v42 }
0x104e   :  { %21459 = vmatprep.subr.bf16.mxu0 %v22378_v29 }
0x104f   :  { %21317 = vmatpush3.bf16.msra.mxu1 %v24372_v46 }
0x1050   :  { %21318 = vmatprep.subr.bf16.mxu1 %v22378_v29 }
0x1051   :  { %21461 = vmatpush3.bf16.msra.mxu0 %v24372_v46 }
0x1052   :  { %21462 = vmatprep.subr.bf16.mxu0 %v22378_v29 }
0x1053   :  { %21320 = vmatpush3.bf16.msra.mxu1 %v24393_v20 }
0x1054   :  { %21321 = vmatprep.subr.bf16.mxu1 %v22378_v29 }
0x1055   :  { %21464 = vmatpush3.bf16.msra.mxu0 %v24393_v20 }
0x1056   :  { %21465 = vmatprep.subr.bf16.mxu0 %v22378_v29 }
0x1057   :  { %21323 = vmatpush3.bf16.msra.mxu1 %v24405_v23 }
0x1058   :  { %21324 = vmatprep.subr.bf16.mxu1 %v22378_v29 }
0x1059   :  { %21467 = vmatpush3.bf16.msra.mxu0 %v24405_v23 }
0x105a   :  { %21468 = vmatprep.subr.bf16.mxu0 %v22378_v29 }
0x105b   :  { %21326 = vmatpush3.bf16.msra.mxu1 %v24417_v1 }
0x105c   :  { %21327 = vmatprep.subr.bf16.mxu1 %v22378_v29 }
0x105d   :  { %21470 = vmatpush3.bf16.msra.mxu0 %v24417_v1 }
0x105e   :  { %21471 = vmatprep.subr.bf16.mxu0 %v22378_v29 }
0x105f   :  { %21329 = vmatpush3.bf16.msra.mxu1 %v24429_v2 }
0x1060   :  { %21330 = vmatprep.subr.bf16.mxu1 %v22378_v29 }
0x1061   :  { %21473 = vmatpush3.bf16.msra.mxu0 %v24429_v2 }
0x1062   :  { %21474 = vmatprep.subr.bf16.mxu0 %v22378_v29 }
0x1063   :  { %21332 = vmatpush3.bf16.msra.mxu1 %v24441_v12 }
0x1064   :  { %21333 = vmatprep.subr.bf16.mxu1 %v22378_v29 }
0x1065   :  { %21476 = vmatpush3.bf16.msra.mxu0 %v24441_v12 }
0x1066   :  { %21477 = vmatprep.subr.bf16.mxu0 %v22378_v29 }
0x1067   :  { %21335 = vmatpush3.bf16.msra.mxu1 %v24453_v27 }
0x1068   :  { %21336 = vmatprep.subr.bf16.mxu1 %v22378_v29 }
0x1069   :  { %21479 = vmatpush3.bf16.msra.mxu0 %v24453_v27 }
0x106a   :  { %18932 = vmatmul.mubr.f32.vlgmr.msra.gmra.mrb[56].mxu1 %v11537_v30  ;;  %21480 = vmatprep.subr.bf16.mxu0 %v22378_v29 }
0x106b   :  { %21338 = vmatpush3.bf16.msra.mxu1 %v24757_v56  ;;  %18966 = vmatprep.mubr.msk.f32.mxu1 %vm22379_vm3, %v26139_v42 }
0x106c   :  { %19142 = vmatmul.mubr.f32.vlgmr.msra.gmra.mrb[54].mxu0 %v12186_v3  ;;  %21339 = vmatprep.subr.bf16.mxu1 %v22378_v29 }
0x106d   :  { %21482 = vmatpush3.bf16.msra.mxu0 %v24757_v56  ;;  %19176 = vmatprep.mubr.msk.f32.mxu0 %vm22379_vm3, %v26139_v42 }
0x106e   :  { %21483 = vmatprep.subr.bf16.mxu0 %v22378_v29 }
0x106f   :  { %21341 = vmatpush3.bf16.msra.mxu1 %v24769_v33 }
0x1070   :  { %21342 = vmatprep.subr.bf16.mxu1 %v22378_v29 }
0x1071   :  { %21485 = vmatpush3.bf16.msra.mxu0 %v24769_v33 }
0x1072   :  { %21486 = vmatprep.subr.bf16.mxu0 %v22378_v29 }
0x1073   :  { %21344 = vmatpush3.bf16.msra.mxu1 %v24785_v15 }
0x1074   :  { %21345 = vmatprep.subr.bf16.mxu1 %v22378_v29 }
0x1075   :  { %21488 = vmatpush3.bf16.msra.mxu0 %v24785_v15 }
0x1076   :  { %21489 = vmatprep.subr.bf16.mxu0 %v22378_v29 }
0x1077   :  { %21347 = vmatpush3.bf16.msra.mxu1 %v24795_v43 }
0x1078   :  { %21348 = vmatprep.subr.bf16.mxu1 %v22378_v29 }
0x1079   :  { %21491 = vmatpush3.bf16.msra.mxu0 %v24795_v43 }
0x107a   :  { %21492 = vmatprep.subr.bf16.mxu0 %v22378_v29 }
0x107b   :  { %21350 = vmatpush3.bf16.msra.mxu1 %v24805_v21 }
0x107c   :  { %21351 = vmatprep.subr.bf16.mxu1 %v22378_v29 }
0x107d   :  { %21494 = vmatpush3.bf16.msra.mxu0 %v24805_v21 }
0x107e   :  { %21495 = vmatprep.subr.bf16.mxu0 %v22378_v29 }
0x107f   :  { %21353 = vmatpush3.bf16.msra.mxu1 %v24815_v39 }
0x1080   :  { %21354 = vmatprep.subr.bf16.mxu1 %v22378_v29 }
0x1081   :  { %21497 = vmatpush3.bf16.msra.mxu0 %v24815_v39 }
0x1082   :  { %21498 = vmatprep.subr.bf16.mxu0 %v22378_v29 }
0x1083   :  { %21356 = vmatpush3.bf16.msra.mxu1 %v24825_v14 }
0x1084   :  { %21357 = vmatprep.subr.bf16.mxu1 %v22378_v29 }
0x1085   :  { %21500 = vmatpush3.bf16.msra.mxu0 %v24825_v14 }
0x1086   :  { %21501 = vmatprep.subr.bf16.mxu0 %v22378_v29 }
0x1087   :  { %21359 = vmatpush3.bf16.msra.mxu1 %v24835_v40 }
0x1088   :  { %21360 = vmatprep.subr.bf16.mxu1 %v22378_v29 }
0x1089   :  { %21503 = vmatpush3.bf16.msra.mxu0 %v24835_v40 }
0x108a   :  { %18967 = vmatmul.mubr.f32.vlgmr.msra.gmra.mrb[56].mxu1 %v25002_v48  ;;  %21504 = vmatprep.subr.bf16.mxu0 %v22378_v29 }
0x108b   :  { %21362 = vmatpush3.bf16.msra.mxu1 %v24365_v38  ;;  %19001 = vmatprep.mubr.msk.f32.mxu1 %vm22379_vm3, %v26139_v42 }
0x108c   :  { %19177 = vmatmul.mubr.f32.vlgmr.msra.gmra.mrb[54].mxu0 %v25007_v28  ;;  %21363 = vmatprep.subr.bf16.mxu1 %v22378_v29 }
0x108d   :  { %21506 = vmatpush3.bf16.msra.mxu0 %v24365_v38  ;;  %19211 = vmatprep.mubr.msk.f32.mxu0 %vm22379_vm3, %v26139_v42 }
0x108e   :  { %21507 = vmatprep.subr.bf16.mxu0 %v22378_v29 }
0x108f   :  { %21365 = vmatpush3.bf16.msra.mxu1 %v24372_v46 }
0x1090   :  { %21366 = vmatprep.subr.bf16.mxu1 %v22378_v29 }
0x1091   :  { %21509 = vmatpush3.bf16.msra.mxu0 %v24372_v46 }
0x1092   :  { %21510 = vmatprep.subr.bf16.mxu0 %v22378_v29 }
0x1093   :  { %21368 = vmatpush3.bf16.msra.mxu1 %v24393_v20 }
0x1094   :  { %21369 = vmatprep.subr.bf16.mxu1 %v22378_v29 }
0x1095   :  { %21512 = vmatpush3.bf16.msra.mxu0 %v24393_v20 }
0x1096   :  { %21513 = vmatprep.subr.bf16.mxu0 %v22378_v29 }
0x1097   :  { %21371 = vmatpush3.bf16.msra.mxu1 %v24405_v23 }
0x1098   :  { %21372 = vmatprep.subr.bf16.mxu1 %v22378_v29 }
0x1099   :  { %21515 = vmatpush3.bf16.msra.mxu0 %v24405_v23 }
0x109a   :  { %21516 = vmatprep.subr.bf16.mxu0 %v22378_v29 }
0x109b   :  { %21374 = vmatpush3.bf16.msra.mxu1 %v24417_v1 }
0x109c   :  { %21375 = vmatprep.subr.bf16.mxu1 %v22378_v29 }
0x109d   :  { %21518 = vmatpush3.bf16.msra.mxu0 %v24417_v1 }
0x109e   :  { %21519 = vmatprep.subr.bf16.mxu0 %v22378_v29 }
0x109f   :  { %21377 = vmatpush3.bf16.msra.mxu1 %v24429_v2 }
0x10a0   :  { %21378 = vmatprep.subr.bf16.mxu1 %v22378_v29 }
0x10a1   :  { %21521 = vmatpush3.bf16.msra.mxu0 %v24429_v2 }
0x10a2   :  { %21522 = vmatprep.subr.bf16.mxu0 %v22378_v29 }
0x10a3   :  { %21380 = vmatpush3.bf16.msra.mxu1 %v24441_v12 }
0x10a4   :  { %21381 = vmatprep.subr.bf16.mxu1 %v22378_v29 }
0x10a5   :  { %21524 = vmatpush3.bf16.msra.mxu0 %v24441_v12 }
0x10a6   :  { %21525 = vmatprep.subr.bf16.mxu0 %v22378_v29 }
0x10a7   :  { %21383 = vmatpush3.bf16.msra.mxu1 %v24453_v27 }
0x10a8   :  { %19214 = vmatprep.subr.mxu1 %v26139_v42 }
0x10a9   :  { %21527 = vmatpush3.bf16.msra.mxu0 %v24453_v27 }
0x10aa   :  { %19002 = vmatmul.mubr.f32.vlgmr.msra.gmra.mrb[56].mxu1 %v25002_v48  ;;  %19244 = vmatprep.subr.mxu0 %v26139_v42 }
0x10ab   :  { %19215 = vmatpush3.msra.mxu1 %v24888_v18  ;;  %19216 = vmatprep.mubr.msk.f32.mxu1 %vm22379_vm3, %v26139_v42 }
0x10ac   :  { %19212 = vmatmul.mubr.f32.vlgmr.msra.gmra.mrb[54].mxu0 %v25007_v28  ;;  %19219 = vmatprep.subr.mxu1 %v26139_v42 }
0x10ad   :  { %19245 = vmatpush3.msra.mxu0 %v24888_v18  ;;  %19246 = vmatprep.mubr.msk.f32.mxu0 %vm22379_vm3, %v26139_v42 }
0x10ae   :  { %19249 = vmatprep.subr.mxu0 %v26139_v42 }
0x117d   :  { %v12091_v51 = vpop.f32.mrb[56].mxu1 }
0x117e   :  { %v12744_v55 = vmul.f32 0.015625, %v12091_v51  ;;  %v19003_v9 = vpop.f32.mrb[57].mxu1 }
0x117f   :  { %v12740_v36 = vpop.f32.mrb[54].mxu0 }
0x1180   :  { %v12746_v6 = vmul.f32 %v12744_v55, %v12744_v55  ;;  %v12745_v61 = vmul.f32 0.015625, %v12740_v36  ;;  %v19213_v49 = vpop.f32.mrb[55].mxu0  ;;  %v22150_v36 = vld [vmem:[%s25664_s6] sm:$0xff]  }
0x1181   :  { %v22153_v49 = vld [vmem:[%s25664_s6 + $0x18] sm:$0xff]  }
0x1182   :  { %v12747_v45 = vsub.f32 %v12745_v61, %v12746_v6  ;;  %v22151_v6 = vld [vmem:[%s25664_s6 + $0x8] sm:$0xff]   ;;  %v22152_v61 = vld [vmem:[%s25664_s6 + $0x10] sm:$0xff]  }
0x1184   :  { %v12749_v44 = vadd.f32 1e-05, %v12747_v45  ;;  %v22154_v45 = vld [vmem:[%s25664_s6 + $0x20] sm:$0xff]  }
0x1186   :  { %22175 = vrsqrt.f32 %v12749_v44  ;;  %v22155_v44 = vld [vmem:[%s25664_s6 + $0x28] sm:$0xff]  }
0x1190   :  { %v22176_v4 = vpop.eup %22175 }
0x1191   :  { %v12751_v10 = vmul.f32 %v22176_v4, %v12748_v13  ;;  %v22156_v13 = vld [vmem:[%s25664_s6 + $0x30] sm:$0xff]   ;;  %v22157_v4 = vld [vmem:[%s25664_s6 + $0x38] sm:$0xff]  }
0x1193   :  { %v12753_v48 = vmul.f32 %v12751_v10, %v12744_v55  ;;  %v12756_v59 = vsel %vm2063_vm2, %v12751_v10, 0 }
0x1194   :  { %v12824_v62 = vand.u32 4294901760, %v12756_v59 }
0x1195   :  { %v12754_v28 = vsub.f32 %v12752_v35, %v12753_v48 }
0x1196   :  { %v12825_v30 = vsub.f32 %v12756_v59, %v12824_v62 }
0x1197   :  { %v13205_v7 = vsel %vm2063_vm2, %v12754_v28, 0 }
0x1198   :  { %v12826_v58 = vand.u32 4294901760, %v12825_v30  ;;  %v13273_v3 = vand.u32 4294901760, %v13205_v7 }
0x119a   :  { %v12827_v26 = vsub.f32 %v12825_v30, %v12826_v58  ;;  %v13274_v24 = vsub.f32 %v13205_v7, %v13273_v3 }
0x119c   :  { %v12828_v54 = vand.u32 4294901760, %v12827_v26  ;;  %v13275_v51 = vand.u32 4294901760, %v13274_v24 }
0x119e   :  { %19217 = vmatmul.mubr.f32.vlgmr.msra.gmra.mrb[58].mxu1 %v12828_v54  ;;  %v13276_v9 = vsub.f32 %v13274_v24, %v13275_v51 }
0x119f   :  { %19220 = vmatpush3.msra.mxu1 %v24904_v47  ;;  %19221 = vmatprep.mubr.msk.f32.mxu1 %vm22379_vm3, %v26139_v42 }
0x11a0   :  { %v13277_v55 = vand.u32 4294901760, %v13276_v9  ;;  %19224 = vmatprep.subr.mxu1 %v26139_v42 }
0x11a2   :  { %19247 = vmatmul.mubr.f32.vlgmr.msra.gmra.mrb[60].mxu0 %v13277_v55 }
0x11a3   :  { %19250 = vmatpush3.msra.mxu0 %v24904_v47  ;;  %19251 = vmatprep.mubr.msk.f32.mxu0 %vm22379_vm3, %v26139_v42 }
0x11a4   :  { %19254 = vmatprep.subr.mxu0 %v26139_v42 }
0x11a6   :  { %19222 = vmatmul.mubr.f32.vlgmr.msra.gmra.mrb[58].mxu1 %v12824_v62 }
0x11a7   :  { %19225 = vmatpush3.msra.mxu1 %v24895_v41  ;;  %19226 = vmatprep.mubr.msk.f32.mxu1 %vm22379_vm3, %v26139_v42 }
0x11a8   :  { %19229 = vmatprep.subr.mxu1 %v26139_v42 }
0x11aa   :  { %19252 = vmatmul.mubr.f32.vlgmr.msra.gmra.mrb[60].mxu0 %v13273_v3 }
0x11ab   :  { %19255 = vmatpush3.msra.mxu0 %v24895_v41  ;;  %19256 = vmatprep.mubr.msk.f32.mxu0 %vm22379_vm3, %v26139_v42 }
0x11ac   :  { %19259 = vmatprep.subr.mxu0 %v26139_v42 }
0x11ae   :  { %19227 = vmatmul.mubr.f32.vlgmr.msra.gmra.mrb[58].mxu1 %v12825_v30 }
0x11af   :  { %19230 = vmatpush3.msra.mxu1 %v24888_v18  ;;  %19231 = vmatprep.mubr.msk.f32.mxu1 %vm22379_vm3, %v26139_v42 }
0x11b0   :  { %19234 = vmatprep.subr.mxu1 %v26139_v42 }
0x11b2   :  { %19257 = vmatmul.mubr.f32.vlgmr.msra.gmra.mrb[60].mxu0 %v13274_v24 }
0x11b3   :  { %19260 = vmatpush3.msra.mxu0 %v24888_v18  ;;  %19261 = vmatprep.mubr.msk.f32.mxu0 %vm22379_vm3, %v26139_v42 }
0x11b4   :  { %19264 = vmatprep.subr.mxu0 %v26139_v42 }
0x11b6   :  { %19232 = vmatmul.mubr.f32.vlgmr.msra.gmra.mrb[58].mxu1 %v12826_v58 }
0x11b7   :  { %19235 = vmatpush3.msra.mxu1 %v24899_v50  ;;  %19236 = vmatprep.mubr.msk.f32.mxu1 %vm22379_vm3, %v26139_v42 }
0x11b8   :  { %19239 = vmatprep.subr.mxu1 %v26139_v42 }
0x11ba   :  { %19262 = vmatmul.mubr.f32.vlgmr.msra.gmra.mrb[60].mxu0 %v13275_v51 }
0x11bb   :  { %19265 = vmatpush3.msra.mxu0 %v24899_v50  ;;  %19266 = vmatprep.mubr.msk.f32.mxu0 %vm22379_vm3, %v26139_v42 }
0x11bc   :  { %19269 = vmatprep.subr.mxu0 %v26139_v42 }
0x11be   :  { %19237 = vmatmul.mubr.f32.vlgmr.msra.gmra.mrb[58].mxu1 %v12824_v62 }
0x11bf   :  { %19240 = vmatpush3.msra.mxu1 %v24888_v18  ;;  %19241 = vmatprep.mubr.msk.f32.mxu1 %vm22379_vm3, %v26139_v42 }
0x11c0   :  { %19274 = vmatprep.subr.bf16.mxu1 %v26139_v42 }
0x11c2   :  { %19267 = vmatmul.mubr.f32.vlgmr.msra.gmra.mrb[60].mxu0 %v13273_v3 }
0x11c3   :  { %19270 = vmatpush3.msra.mxu0 %v24888_v18  ;;  %19271 = vmatprep.mubr.msk.f32.mxu0 %vm22379_vm3, %v26139_v42 }
0x11c4   :  { %21528 = vmatprep.subr.bf16.mxu0 %v22378_v29 }
0x11c6   :  { %19242 = vmatmul.mubr.f32.vlgmr.msra.gmra.mrb[58].mxu1 %v12824_v62 }
0x11c7   :  { %19275 = vmatpush3.bf16.msra.mxu1 %v22150_v36  ;;  %19290 = vmatprep.mubr.msk.bf16.mxu1 %vm22379_vm3, %v26139_v42 }
0x11c8   :  { %19276 = vmatprep.subr.bf16.mxu1 %v26139_v42 }
0x11ca   :  { %19272 = vmatmul.mubr.f32.vlgmr.msra.gmra.mrb[60].mxu0 %v13273_v3 }
0x11cb   :  { %19277 = vmatpush3.bf16.msra.mxu1 %v22151_v6  ;;  %21530 = vmatpush3.bf16.msra.mxu0 %v24365_v38 }
0x11cc   :  { %19278 = vmatprep.subr.bf16.mxu1 %v26139_v42  ;;  %21531 = vmatprep.subr.bf16.mxu0 %v22378_v29 }
0x11cd   :  { %19326 = vmatprep.mubr.msk.f32.mxu0 %vm22379_vm3, %v26139_v42 }
0x11cf   :  { %19279 = vmatpush3.bf16.msra.mxu1 %v22152_v61  ;;  %21533 = vmatpush3.bf16.msra.mxu0 %v24372_v46 }
0x11d0   :  { %19280 = vmatprep.subr.bf16.mxu1 %v26139_v42  ;;  %21534 = vmatprep.subr.bf16.mxu0 %v22378_v29 }
0x11d3   :  { %19281 = vmatpush3.bf16.msra.mxu1 %v22153_v49  ;;  %21536 = vmatpush3.bf16.msra.mxu0 %v24393_v20 }
0x11d4   :  { %19282 = vmatprep.subr.bf16.mxu1 %v26139_v42  ;;  %21537 = vmatprep.subr.bf16.mxu0 %v22378_v29 }
0x11d7   :  { %19283 = vmatpush3.bf16.msra.mxu1 %v22154_v45  ;;  %21539 = vmatpush3.bf16.msra.mxu0 %v24405_v23 }
0x11d8   :  { %19284 = vmatprep.subr.bf16.mxu1 %v26139_v42  ;;  %21540 = vmatprep.subr.bf16.mxu0 %v22378_v29 }
0x11db   :  { %21542 = vmatpush3.bf16.msra.mxu0 %v24417_v1  ;;  %19285 = vmatpush3.bf16.msra.mxu1 %v22155_v44 }
0x11dc   :  { %21543 = vmatprep.subr.bf16.mxu0 %v22378_v29  ;;  %19286 = vmatprep.subr.bf16.mxu1 %v26139_v42 }
0x11df   :  { %21545 = vmatpush3.bf16.msra.mxu0 %v24429_v2  ;;  %19287 = vmatpush3.bf16.msra.mxu1 %v22156_v13 }
0x11e0   :  { %21546 = vmatprep.subr.bf16.mxu0 %v22378_v29  ;;  %19288 = vmatprep.subr.bf16.mxu1 %v26139_v42 }
0x11e3   :  { %21548 = vmatpush3.bf16.msra.mxu0 %v24441_v12  ;;  %19289 = vmatpush3.bf16.msra.mxu1 %v22157_v4 }
0x11e4   :  { %21549 = vmatprep.subr.bf16.mxu0 %v22378_v29  ;;  %21672 = vmatprep.subr.bf16.mxu1 %v22378_v29 }
0x11e7   :  { %21551 = vmatpush3.bf16.msra.mxu0 %v24453_v27 }
0x11e8   :  { %21552 = vmatprep.subr.bf16.mxu0 %v22378_v29 }
0x1299   :  { %v13200_v10 = vpop.f32.mrb[58].mxu1 }
0x129a   :  { %v13656_v35 = vrot.slane %v13200_v10, %v26147_v17  ;;  %v19243_v48 = vpop.f32.mrb[59].mxu1 }
0x129c   :  { %v13657_v59 = vmul.f32 %v13656_v35, %v24995_v31 }
0x129d   :  { %v13649_v62 = vpop.f32.mrb[60].mxu0 }
0x129e   :  { %v13661_v28 = vrot.slane %v13649_v62, %v26147_v17  ;;  %v19273_v30 = vpop.f32.mrb[61].mxu0 }
0x12a0   :  { %v13662_v7 = vadd.f32 %v13661_v28, %v13657_v59 }
0x12a2   :  { %v13663_v58 = vmax.f32 %v13662_v7, 0.0 }
0x12a4   :  { %v13664_v3 = vpack.c.bf16 %v13663_v58, %v13663_v58 }
0x12a6   :  { %19291 = vmatmul.mubr.bf16.vlgmr.msra.gmra.mrb[60].mxu1 %v13664_v3 }
0x12a7   :  { %21674 = vmatpush3.bf16.msra.mxu1 %v24365_v38  ;;  %19536 = vmatprep.mubr.msk.f32.mxu1 %vm22379_vm3, %v26139_v42 }
0x12a8   :  { %21675 = vmatprep.subr.bf16.mxu1 %v22378_v29 }
0x12ab   :  { %21677 = vmatpush3.bf16.msra.mxu1 %v24372_v46 }
0x12ac   :  { %21678 = vmatprep.subr.bf16.mxu1 %v22378_v29 }
0x12af   :  { %21680 = vmatpush3.bf16.msra.mxu1 %v24393_v20 }
0x12b0   :  { %21681 = vmatprep.subr.bf16.mxu1 %v22378_v29 }
0x12b3   :  { %21683 = vmatpush3.bf16.msra.mxu1 %v24405_v23 }
0x12b4   :  { %21684 = vmatprep.subr.bf16.mxu1 %v22378_v29 }
0x12b7   :  { %21686 = vmatpush3.bf16.msra.mxu1 %v24417_v1 }
0x12b8   :  { %21687 = vmatprep.subr.bf16.mxu1 %v22378_v29 }
0x12bb   :  { %21689 = vmatpush3.bf16.msra.mxu1 %v24429_v2 }
0x12bc   :  { %21690 = vmatprep.subr.bf16.mxu1 %v22378_v29 }
0x12bf   :  { %21692 = vmatpush3.bf16.msra.mxu1 %v24441_v12 }
0x12c0   :  { %21693 = vmatprep.subr.bf16.mxu1 %v22378_v29 }
0x12c3   :  { %21695 = vmatpush3.bf16.msra.mxu1 %v24453_v27 }
0x12c4   :  { %21696 = vmatprep.subr.bf16.mxu1 %v22378_v29 }
0x1379   :  { %v25335_v31 = vpop.f32.mrb[60].mxu1 }
0x137a   :  { %v13769_v26 = vsel %vm295_vm1, %v25335_v31, 0.0  ;;  %v14417_v24 = vmul.f32 %v25335_v31, %v25335_v31  ;;  %v19292_v54 = vpop.f32.mrb[61].mxu1 }
0x137b   :  { %v13770_v51 = vrot.slane %v13769_v26, 4  ;;  %v13766_v9 = vpop.f32.mrb[62].mxu1 }
0x137c   :  { %v14418_v55 = vsel %vm295_vm1, %v14417_v24, 0.0  ;;  %v19293_v36 = vpop.f32.mrb[63].mxu1 }
0x137d   :  { %v13771_v6 = vadd.f32 %v13770_v51, %v13769_v26  ;;  %v14419_v61 = vrot.slane %v14418_v55, 4 }
0x137f   :  { %v13772_v49 = vrot.slane %v13771_v6, 2  ;;  %v14420_v45 = vadd.f32 %v14419_v61, %v14418_v55 }
0x1381   :  { %v13773_v44 = vadd.f32 %v13772_v49, %v13771_v6  ;;  %v14421_v13 = vrot.slane %v14420_v45, 2 }
0x1383   :  { %v13774_v4 = vrot.slane %v13773_v44, 1  ;;  %v14422_v10 = vadd.f32 %v14421_v13, %v14420_v45  ;;  %v16287_v13 = vld [vmem:[%s25672_s14] ss:$0 sm:$0xff]  ;;  %s22333_s14 = scalar_lea.vmem %s16167_s18, 64 }
0x1384   :  { %p22334_p0 = scmp.ne.s32.totalorder %s16167_s18, %s22333_s14  ;;  %p22339_p2 = scmp.lt.s32.totalorder %s22333_s14, %s22333_s14 }
0x1385   :  { %v13775_v35 = vadd.f32 %v13774_v4, %v13773_v44  ;;  %v14423_v48 = vrot.slane %v14422_v10, 1 }
0x1386   :  { %p22340_p3 = por %p22339_p2, %p22338_p1 }
0x1387   :  { %v25342_v59 = vand.u32 4294901760, %v13775_v35  ;;  %v14424_v62 = vadd.f32 %v14423_v48, %v14422_v10 }
0x1388   :  { %p22341_p4 = pnand %p22340_p3, %p22334_p0 }
0x1389   :  { %v25345_v28 = vsub.f32 %v13775_v35, %v25342_v59  ;;  %v25347_v30 = vand.u32 4294901760, %v14424_v62 }
0x138b   :  { %v13859_v7 = vand.u32 4294901760, %v25345_v28  ;;  %v25351_v58 = vsub.f32 %v14424_v62, %v25347_v30 }
0x138d   :  { %v13860_v3 = vsub.f32 %v25345_v28, %v13859_v7  ;;  %v14508_v26 = vand.u32 4294901760, %v25351_v58 }
0x138f   :  { %v13861_v24 = vand.u32 4294901760, %v13860_v3  ;;  %v14509_v54 = vsub.f32 %v25351_v58, %v14508_v26 }
0x1391   :  { %19327 = vmatmul.mubr.f32.vlgmr.msra.gmra.mrb[62].mxu0 %v13861_v24  ;;  %v14510_v51 = vand.u32 4294901760, %v14509_v54 }
0x1392   :  { %21554 = vmatpush3.bf16.msra.mxu0 %v24629_v52  ;;  %19361 = vmatprep.mubr.msk.f32.mxu0 %vm22379_vm3, %v26139_v42 }
0x1393   :  { %19537 = vmatmul.mubr.f32.vlgmr.msra.gmra.mrb[64].mxu1 %v14510_v51  ;;  %21555 = vmatprep.subr.bf16.mxu0 %v22378_v29 }
0x1394   :  { %21698 = vmatpush3.bf16.msra.mxu1 %v24629_v52  ;;  %19571 = vmatprep.mubr.msk.f32.mxu1 %vm22379_vm3, %v26139_v42 }
0x1395   :  { %21699 = vmatprep.subr.bf16.mxu1 %v22378_v29 }
0x1396   :  { %21557 = vmatpush3.bf16.msra.mxu0 %v24635_v16 }
0x1397   :  { %21558 = vmatprep.subr.bf16.mxu0 %v22378_v29 }
0x1398   :  { %21701 = vmatpush3.bf16.msra.mxu1 %v24635_v16 }
0x1399   :  { %21702 = vmatprep.subr.bf16.mxu1 %v22378_v29 }
0x139a   :  { %21560 = vmatpush3.bf16.msra.mxu0 %v24491_v53 }
0x139b   :  { %21561 = vmatprep.subr.bf16.mxu0 %v22378_v29 }
0x139c   :  { %21704 = vmatpush3.bf16.msra.mxu1 %v24491_v53  ;;  %v15070_v53 = vld [vmem:[#allocation10 + $0x5] sm:$0x1] }
0x139d   :  { %21705 = vmatprep.subr.bf16.mxu1 %v22378_v29 }
0x139e   :  { %21563 = vmatpush3.bf16.msra.mxu0 %v24495_v37 }
0x139f   :  { %21564 = vmatprep.subr.bf16.mxu0 %v22378_v29 }
0x13a0   :  { %21707 = vmatpush3.bf16.msra.mxu1 %v24495_v37 }
0x13a1   :  { %21708 = vmatprep.subr.bf16.mxu1 %v22378_v29 }
0x13a2   :  { %21566 = vmatpush3.bf16.msra.mxu0 %v24509_v5 }
0x13a3   :  { %21567 = vmatprep.subr.bf16.mxu0 %v22378_v29 }
0x13a4   :  { %21710 = vmatpush3.bf16.msra.mxu1 %v24509_v5 }
0x13a5   :  { %21711 = vmatprep.subr.bf16.mxu1 %v22378_v29 }
0x13a6   :  { %21569 = vmatpush3.bf16.msra.mxu0 %v24533_v32 }
0x13a7   :  { %21570 = vmatprep.subr.bf16.mxu0 %v22378_v29 }
0x13a8   :  { %21713 = vmatpush3.bf16.msra.mxu1 %v24533_v32  ;;  %v15074_v32 = vld [vmem:[#allocation11 + $0x5] sm:$0x1] }
0x13a9   :  { %21714 = vmatprep.subr.bf16.mxu1 %v22378_v29 }
0x13aa   :  { %21572 = vmatpush3.bf16.msra.mxu0 %v24537_v63 }
0x13ab   :  { %21573 = vmatprep.subr.bf16.mxu0 %v22378_v29 }
0x13ac   :  { %21716 = vmatpush3.bf16.msra.mxu1 %v24537_v63 }
0x13ad   :  { %21717 = vmatprep.subr.bf16.mxu1 %v22378_v29 }
0x13ae   :  { %21575 = vmatpush3.bf16.msra.mxu0 %v24545_v22 }
0x13af   :  { %21576 = vmatprep.subr.bf16.mxu0 %v22378_v29 }
0x13b0   :  { %21719 = vmatpush3.bf16.msra.mxu1 %v24545_v22 }
0x13b1   :  { %19362 = vmatmul.mubr.f32.vlgmr.msra.gmra.mrb[62].mxu0 %v25342_v59  ;;  %21720 = vmatprep.subr.bf16.mxu1 %v22378_v29 }
0x13b2   :  { %21578 = vmatpush3.bf16.msra.mxu0 %v24671_v25  ;;  %19396 = vmatprep.mubr.msk.f32.mxu0 %vm22379_vm3, %v26139_v42 }
0x13b3   :  { %19572 = vmatmul.mubr.f32.vlgmr.msra.gmra.mrb[64].mxu1 %v25347_v30  ;;  %21579 = vmatprep.subr.bf16.mxu0 %v22378_v29 }
0x13b4   :  { %21722 = vmatpush3.bf16.msra.mxu1 %v24671_v25  ;;  %19606 = vmatprep.mubr.msk.f32.mxu1 %vm22379_vm3, %v26139_v42 }
0x13b5   :  { %21723 = vmatprep.subr.bf16.mxu1 %v22378_v29 }
0x13b6   :  { %21581 = vmatpush3.bf16.msra.mxu0 %v24680_v19 }
0x13b7   :  { %21582 = vmatprep.subr.bf16.mxu0 %v22378_v29 }
0x13b8   :  { %21725 = vmatpush3.bf16.msra.mxu1 %v24680_v19 }
0x13b9   :  { %21726 = vmatprep.subr.bf16.mxu1 %v22378_v29 }
0x13ba   :  { %21584 = vmatpush3.bf16.msra.mxu0 %v24549_v0 }
0x13bb   :  { %21585 = vmatprep.subr.bf16.mxu0 %v22378_v29 }
0x13bc   :  { %21728 = vmatpush3.bf16.msra.mxu1 %v24549_v0 }
0x13bd   :  { %21729 = vmatprep.subr.bf16.mxu1 %v22378_v29 }
0x13be   :  { %21587 = vmatpush3.bf16.msra.mxu0 %v24553_v34 }
0x13bf   :  { %21588 = vmatprep.subr.bf16.mxu0 %v22378_v29 }
0x13c0   :  { %21731 = vmatpush3.bf16.msra.mxu1 %v24553_v34 }
0x13c1   :  { %21732 = vmatprep.subr.bf16.mxu1 %v22378_v29 }
0x13c2   :  { %21590 = vmatpush3.bf16.msra.mxu0 %v24557_v57 }
0x13c3   :  { %21591 = vmatprep.subr.bf16.mxu0 %v22378_v29 }
0x13c4   :  { %21734 = vmatpush3.bf16.msra.mxu1 %v24557_v57 }
0x13c5   :  { %21735 = vmatprep.subr.bf16.mxu1 %v22378_v29 }
0x13c6   :  { %21593 = vmatpush3.bf16.msra.mxu0 %v24561_v60 }
0x13c7   :  { %21594 = vmatprep.subr.bf16.mxu0 %v22378_v29 }
0x13c8   :  { %21737 = vmatpush3.bf16.msra.mxu1 %v24561_v60 }
0x13c9   :  { %21738 = vmatprep.subr.bf16.mxu1 %v22378_v29 }
0x13ca   :  { %21596 = vmatpush3.bf16.msra.mxu0 %v24565_v11 }
0x13cb   :  { %21597 = vmatprep.subr.bf16.mxu0 %v22378_v29 }
0x13cc   :  { %21740 = vmatpush3.bf16.msra.mxu1 %v24565_v11 }
0x13cd   :  { %21741 = vmatprep.subr.bf16.mxu1 %v22378_v29 }
0x13ce   :  { %21599 = vmatpush3.bf16.msra.mxu0 %v24569_v8 }
0x13cf   :  { %21600 = vmatprep.subr.bf16.mxu0 %v22378_v29 }
0x13d0   :  { %21743 = vmatpush3.bf16.msra.mxu1 %v24569_v8 }
0x13d1   :  { %19397 = vmatmul.mubr.f32.vlgmr.msra.gmra.mrb[62].mxu0 %v25345_v28  ;;  %21744 = vmatprep.subr.bf16.mxu1 %v22378_v29 }
0x13d2   :  { %21602 = vmatpush3.bf16.msra.mxu0 %v24365_v38  ;;  %19431 = vmatprep.mubr.msk.f32.mxu0 %vm22379_vm3, %v26139_v42 }
0x13d3   :  { %19607 = vmatmul.mubr.f32.vlgmr.msra.gmra.mrb[64].mxu1 %v25351_v58  ;;  %21603 = vmatprep.subr.bf16.mxu0 %v22378_v29 }
0x13d4   :  { %21746 = vmatpush3.bf16.msra.mxu1 %v24365_v38  ;;  %19641 = vmatprep.mubr.msk.f32.mxu1 %vm22379_vm3, %v26139_v42 }
0x13d5   :  { %21747 = vmatprep.subr.bf16.mxu1 %v22378_v29 }
0x13d6   :  { %21605 = vmatpush3.bf16.msra.mxu0 %v24372_v46 }
0x13d7   :  { %21606 = vmatprep.subr.bf16.mxu0 %v22378_v29 }
0x13d8   :  { %21749 = vmatpush3.bf16.msra.mxu1 %v24372_v46 }
0x13d9   :  { %21750 = vmatprep.subr.bf16.mxu1 %v22378_v29 }
0x13da   :  { %21608 = vmatpush3.bf16.msra.mxu0 %v24393_v20 }
0x13db   :  { %21609 = vmatprep.subr.bf16.mxu0 %v22378_v29 }
0x13dc   :  { %21752 = vmatpush3.bf16.msra.mxu1 %v24393_v20 }
0x13dd   :  { %21753 = vmatprep.subr.bf16.mxu1 %v22378_v29 }
0x13de   :  { %21611 = vmatpush3.bf16.msra.mxu0 %v24405_v23 }
0x13df   :  { %21612 = vmatprep.subr.bf16.mxu0 %v22378_v29 }
0x13e0   :  { %21755 = vmatpush3.bf16.msra.mxu1 %v24405_v23 }
0x13e1   :  { %21756 = vmatprep.subr.bf16.mxu1 %v22378_v29 }
0x13e2   :  { %21614 = vmatpush3.bf16.msra.mxu0 %v24417_v1 }
0x13e3   :  { %21615 = vmatprep.subr.bf16.mxu0 %v22378_v29 }
0x13e4   :  { %21758 = vmatpush3.bf16.msra.mxu1 %v24417_v1 }
0x13e5   :  { %21759 = vmatprep.subr.bf16.mxu1 %v22378_v29 }
0x13e6   :  { %21617 = vmatpush3.bf16.msra.mxu0 %v24429_v2 }
0x13e7   :  { %21618 = vmatprep.subr.bf16.mxu0 %v22378_v29 }
0x13e8   :  { %21761 = vmatpush3.bf16.msra.mxu1 %v24429_v2 }
0x13e9   :  { %21762 = vmatprep.subr.bf16.mxu1 %v22378_v29 }
0x13ea   :  { %21620 = vmatpush3.bf16.msra.mxu0 %v24441_v12 }
0x13eb   :  { %21621 = vmatprep.subr.bf16.mxu0 %v22378_v29 }
0x13ec   :  { %21764 = vmatpush3.bf16.msra.mxu1 %v24441_v12 }
0x13ed   :  { %21765 = vmatprep.subr.bf16.mxu1 %v22378_v29 }
0x13ee   :  { %21623 = vmatpush3.bf16.msra.mxu0 %v24453_v27 }
0x13ef   :  { %21624 = vmatprep.subr.bf16.mxu0 %v22378_v29 }
0x13f0   :  { %21767 = vmatpush3.bf16.msra.mxu1 %v24453_v27 }
0x13f1   :  { %19432 = vmatmul.mubr.f32.vlgmr.msra.gmra.mrb[62].mxu0 %v13859_v7  ;;  %21768 = vmatprep.subr.bf16.mxu1 %v22378_v29 }
0x13f2   :  { %21626 = vmatpush3.bf16.msra.mxu0 %v24757_v56  ;;  %19466 = vmatprep.mubr.msk.f32.mxu0 %vm22379_vm3, %v26139_v42 }
0x13f3   :  { %19642 = vmatmul.mubr.f32.vlgmr.msra.gmra.mrb[64].mxu1 %v14508_v26  ;;  %21627 = vmatprep.subr.bf16.mxu0 %v22378_v29 }
0x13f4   :  { %21770 = vmatpush3.bf16.msra.mxu1 %v24757_v56  ;;  %19676 = vmatprep.mubr.msk.f32.mxu1 %vm22379_vm3, %v26139_v42 }
0x13f5   :  { %21771 = vmatprep.subr.bf16.mxu1 %v22378_v29 }
0x13f6   :  { %21629 = vmatpush3.bf16.msra.mxu0 %v24769_v33 }
0x13f7   :  { %21630 = vmatprep.subr.bf16.mxu0 %v22378_v29 }
0x13f8   :  { %21773 = vmatpush3.bf16.msra.mxu1 %v24769_v33 }
0x13f9   :  { %21774 = vmatprep.subr.bf16.mxu1 %v22378_v29 }
0x13fa   :  { %21632 = vmatpush3.bf16.msra.mxu0 %v24785_v15 }
0x13fb   :  { %21633 = vmatprep.subr.bf16.mxu0 %v22378_v29 }
0x13fc   :  { %21776 = vmatpush3.bf16.msra.mxu1 %v24785_v15  ;;  %v22158_v15 = vld [vmem:[%s25671_s13] sm:$0xff]  }
0x13fd   :  { %21777 = vmatprep.subr.bf16.mxu1 %v22378_v29 }
0x13fe   :  { %21635 = vmatpush3.bf16.msra.mxu0 %v24795_v43 }
0x13ff   :  { %21636 = vmatprep.subr.bf16.mxu0 %v22378_v29 }
0x1400   :  { %21779 = vmatpush3.bf16.msra.mxu1 %v24795_v43  ;;  %v22159_v43 = vld [vmem:[%s25671_s13 + $0x8] sm:$0xff]  }
0x1401   :  { %21780 = vmatprep.subr.bf16.mxu1 %v22378_v29 }
0x1402   :  { %21638 = vmatpush3.bf16.msra.mxu0 %v24805_v21 }
0x1403   :  { %21639 = vmatprep.subr.bf16.mxu0 %v22378_v29 }
0x1404   :  { %21782 = vmatpush3.bf16.msra.mxu1 %v24805_v21  ;;  %v22160_v21 = vld [vmem:[%s25671_s13 + $0x10] sm:$0xff]  }
0x1405   :  { %21783 = vmatprep.subr.bf16.mxu1 %v22378_v29 }
0x1406   :  { %21641 = vmatpush3.bf16.msra.mxu0 %v24815_v39 }
0x1407   :  { %21642 = vmatprep.subr.bf16.mxu0 %v22378_v29 }
0x1408   :  { %21785 = vmatpush3.bf16.msra.mxu1 %v24815_v39  ;;  %v22161_v39 = vld [vmem:[%s25671_s13 + $0x18] sm:$0xff]  }
0x1409   :  { %21786 = vmatprep.subr.bf16.mxu1 %v22378_v29 }
0x140a   :  { %21644 = vmatpush3.bf16.msra.mxu0 %v24825_v14 }
0x140b   :  { %21645 = vmatprep.subr.bf16.mxu0 %v22378_v29 }
0x140c   :  { %21788 = vmatpush3.bf16.msra.mxu1 %v24825_v14  ;;  %v22162_v14 = vld [vmem:[%s25671_s13 + $0x20] sm:$0xff]  }
0x140d   :  { %21789 = vmatprep.subr.bf16.mxu1 %v22378_v29 }
0x140e   :  { %21647 = vmatpush3.bf16.msra.mxu0 %v24835_v40 }
0x140f   :  { %21648 = vmatprep.subr.bf16.mxu0 %v22378_v29 }
0x1410   :  { %21791 = vmatpush3.bf16.msra.mxu1 %v24835_v40  ;;  %v22163_v40 = vld [vmem:[%s25671_s13 + $0x28] sm:$0xff]  }
0x1411   :  { %19467 = vmatmul.mubr.f32.vlgmr.msra.gmra.mrb[62].mxu0 %v25342_v59  ;;  %21792 = vmatprep.subr.bf16.mxu1 %v22378_v29 }
0x1412   :  { %21650 = vmatpush3.bf16.msra.mxu0 %v24365_v38  ;;  %19501 = vmatprep.mubr.msk.f32.mxu0 %vm22379_vm3, %v26139_v42 }
0x1413   :  { %19677 = vmatmul.mubr.f32.vlgmr.msra.gmra.mrb[64].mxu1 %v25347_v30  ;;  %21651 = vmatprep.subr.bf16.mxu0 %v22378_v29 }
0x1414   :  { %21794 = vmatpush3.bf16.msra.mxu1 %v24365_v38  ;;  %19711 = vmatprep.mubr.msk.f32.mxu1 %vm22379_vm3, %v26139_v42 }
0x1415   :  { %21795 = vmatprep.subr.bf16.mxu1 %v22378_v29 }
0x1416   :  { %21653 = vmatpush3.bf16.msra.mxu0 %v24372_v46 }
0x1417   :  { %21654 = vmatprep.subr.bf16.mxu0 %v22378_v29 }
0x1418   :  { %21797 = vmatpush3.bf16.msra.mxu1 %v24372_v46 }
0x1419   :  { %21798 = vmatprep.subr.bf16.mxu1 %v22378_v29 }
0x141a   :  { %21656 = vmatpush3.bf16.msra.mxu0 %v24393_v20 }
0x141b   :  { %21657 = vmatprep.subr.bf16.mxu0 %v22378_v29 }
0x141c   :  { %21800 = vmatpush3.bf16.msra.mxu1 %v24393_v20 }
0x141d   :  { %21801 = vmatprep.subr.bf16.mxu1 %v22378_v29 }
0x141e   :  { %21659 = vmatpush3.bf16.msra.mxu0 %v24405_v23 }
0x141f   :  { %21660 = vmatprep.subr.bf16.mxu0 %v22378_v29 }
0x1420   :  { %21803 = vmatpush3.bf16.msra.mxu1 %v24405_v23 }
0x1421   :  { %21804 = vmatprep.subr.bf16.mxu1 %v22378_v29 }
0x1422   :  { %21662 = vmatpush3.bf16.msra.mxu0 %v24417_v1 }
0x1423   :  { %21663 = vmatprep.subr.bf16.mxu0 %v22378_v29 }
0x1424   :  { %21806 = vmatpush3.bf16.msra.mxu1 %v24417_v1 }
0x1425   :  { %21807 = vmatprep.subr.bf16.mxu1 %v22378_v29 }
0x1426   :  { %21665 = vmatpush3.bf16.msra.mxu0 %v24429_v2 }
0x1427   :  { %21666 = vmatprep.subr.bf16.mxu0 %v22378_v29 }
0x1428   :  { %21809 = vmatpush3.bf16.msra.mxu1 %v24429_v2 }
0x1429   :  { %21810 = vmatprep.subr.bf16.mxu1 %v22378_v29 }
0x142a   :  { %21668 = vmatpush3.bf16.msra.mxu0 %v24441_v12 }
0x142b   :  { %21669 = vmatprep.subr.bf16.mxu0 %v22378_v29 }
0x142c   :  { %21812 = vmatpush3.bf16.msra.mxu1 %v24441_v12 }
0x142d   :  { %21813 = vmatprep.subr.bf16.mxu1 %v22378_v29 }
0x142e   :  { %21671 = vmatpush3.bf16.msra.mxu0 %v24453_v27 }
0x142f   :  { %19714 = vmatprep.subr.mxu0 %v26139_v42 }
0x1430   :  { %21815 = vmatpush3.bf16.msra.mxu1 %v24453_v27 }
0x1431   :  { %19502 = vmatmul.mubr.f32.vlgmr.msra.gmra.mrb[62].mxu0 %v25342_v59  ;;  %19744 = vmatprep.subr.mxu1 %v26139_v42 }
0x1432   :  { %19715 = vmatpush3.msra.mxu0 %v24888_v18  ;;  %19716 = vmatprep.mubr.msk.f32.mxu0 %vm22379_vm3, %v26139_v42 }
0x1433   :  { %19712 = vmatmul.mubr.f32.vlgmr.msra.gmra.mrb[64].mxu1 %v25347_v30  ;;  %19719 = vmatprep.subr.mxu0 %v26139_v42 }
0x1434   :  { %19745 = vmatpush3.msra.mxu1 %v24888_v18  ;;  %19746 = vmatprep.mubr.msk.f32.mxu1 %vm22379_vm3, %v26139_v42 }
0x1435   :  { %19749 = vmatprep.subr.mxu1 %v26139_v42 }
0x1504   :  { %v14413_v29 = vpop.f32.mrb[62].mxu0 }
0x1505   :  { %v15066_v38 = vmul.f32 0.015625, %v14413_v29  ;;  %v19503_v46 = vpop.f32.mrb[63].mxu0 }
0x1506   :  { %v15062_v20 = vpop.f32.mrb[64].mxu1 }
0x1507   :  { %v15068_v23 = vmul.f32 %v15066_v38, %v15066_v38  ;;  %v15067_v1 = vmul.f32 0.015625, %v15062_v20  ;;  %v19713_v2 = vpop.f32.mrb[65].mxu1 }
0x1509   :  { %v15069_v12 = vsub.f32 %v15067_v1, %v15068_v23 }
0x150b   :  { %v15071_v27 = vadd.f32 1e-05, %v15069_v12 }
0x150d   :  { %22177 = vrsqrt.f32 %v15071_v27 }
0x1517   :  { %v22178_v37 = vpop.eup %22177 }
0x1518   :  { %v15073_v5 = vmul.f32 %v22178_v37, %v15070_v53 }
0x151a   :  { %v15075_v63 = vmul.f32 %v15073_v5, %v15066_v38  ;;  %v15078_v22 = vsel %vm2063_vm2, %v15073_v5, 0 }
0x151b   :  { %v15146_v0 = vand.u32 4294901760, %v15078_v22 }
0x151c   :  { %v15076_v34 = vsub.f32 %v15074_v32, %v15075_v63 }
0x151d   :  { %v15147_v57 = vsub.f32 %v15078_v22, %v15146_v0 }
0x151e   :  { %v15527_v60 = vsel %vm2063_vm2, %v15076_v34, 0 }
0x151f   :  { %v15148_v11 = vand.u32 4294901760, %v15147_v57  ;;  %v15595_v8 = vand.u32 4294901760, %v15527_v60 }
0x1521   :  { %v15149_v52 = vsub.f32 %v15147_v57, %v15148_v11  ;;  %v15596_v16 = vsub.f32 %v15527_v60, %v15595_v8 }
0x1523   :  { %v15150_v25 = vand.u32 4294901760, %v15149_v52  ;;  %v15597_v19 = vand.u32 4294901760, %v15596_v16 }
0x1525   :  { %19717 = vmatmul.mubr.f32.vlgmr.msra.gmra.mrb[64].mxu0 %v15150_v25  ;;  %v15598_v56 = vsub.f32 %v15596_v16, %v15597_v19 }
0x1526   :  { %19720 = vmatpush3.msra.mxu0 %v24904_v47  ;;  %19721 = vmatprep.mubr.msk.f32.mxu0 %vm22379_vm3, %v26139_v42 }
0x1527   :  { %v15599_v33 = vand.u32 4294901760, %v15598_v56  ;;  %19724 = vmatprep.subr.mxu0 %v26139_v42 }
0x1529   :  { %19747 = vmatmul.mubr.f32.vlgmr.msra.gmra.mrb[66].mxu1 %v15599_v33 }
0x152a   :  { %19750 = vmatpush3.msra.mxu1 %v24904_v47  ;;  %19751 = vmatprep.mubr.msk.f32.mxu1 %vm22379_vm3, %v26139_v42 }
0x152b   :  { %19754 = vmatprep.subr.mxu1 %v26139_v42 }
0x152d   :  { %19722 = vmatmul.mubr.f32.vlgmr.msra.gmra.mrb[64].mxu0 %v15146_v0 }
0x152e   :  { %19725 = vmatpush3.msra.mxu0 %v24895_v41  ;;  %19726 = vmatprep.mubr.msk.f32.mxu0 %vm22379_vm3, %v26139_v42 }
0x152f   :  { %19729 = vmatprep.subr.mxu0 %v26139_v42 }
0x1531   :  { %19752 = vmatmul.mubr.f32.vlgmr.msra.gmra.mrb[66].mxu1 %v15595_v8 }
0x1532   :  { %19755 = vmatpush3.msra.mxu1 %v24895_v41  ;;  %19756 = vmatprep.mubr.msk.f32.mxu1 %vm22379_vm3, %v26139_v42  ;;  %v22165_v41 = vld [vmem:[%s25671_s13 + $0x38] sm:$0xff]  }
0x1533   :  { %19759 = vmatprep.subr.mxu1 %v26139_v42 }
0x1535   :  { %19727 = vmatmul.mubr.f32.vlgmr.msra.gmra.mrb[64].mxu0 %v15147_v57 }
0x1536   :  { %19730 = vmatpush3.msra.mxu0 %v24888_v18  ;;  %19731 = vmatprep.mubr.msk.f32.mxu0 %vm22379_vm3, %v26139_v42 }
0x1537   :  { %19734 = vmatprep.subr.mxu0 %v26139_v42 }
0x1539   :  { %19757 = vmatmul.mubr.f32.vlgmr.msra.gmra.mrb[66].mxu1 %v15596_v16 }
0x153a   :  { %19760 = vmatpush3.msra.mxu1 %v24888_v18  ;;  %19761 = vmatprep.mubr.msk.f32.mxu1 %vm22379_vm3, %v26139_v42 }
0x153b   :  { %19764 = vmatprep.subr.mxu1 %v26139_v42 }
0x153d   :  { %19732 = vmatmul.mubr.f32.vlgmr.msra.gmra.mrb[64].mxu0 %v15148_v11 }
0x153e   :  { %19735 = vmatpush3.msra.mxu0 %v24899_v50  ;;  %19736 = vmatprep.mubr.msk.f32.mxu0 %vm22379_vm3, %v26139_v42 }
0x153f   :  { %19739 = vmatprep.subr.mxu0 %v26139_v42 }
0x1541   :  { %19762 = vmatmul.mubr.f32.vlgmr.msra.gmra.mrb[66].mxu1 %v15597_v19 }
0x1542   :  { %19765 = vmatpush3.msra.mxu1 %v24899_v50  ;;  %19766 = vmatprep.mubr.msk.f32.mxu1 %vm22379_vm3, %v26139_v42 }
0x1543   :  { %19769 = vmatprep.subr.mxu1 %v26139_v42 }
0x1545   :  { %19737 = vmatmul.mubr.f32.vlgmr.msra.gmra.mrb[64].mxu0 %v15146_v0 }
0x1546   :  { %19740 = vmatpush3.msra.mxu0 %v24888_v18  ;;  %19741 = vmatprep.mubr.msk.f32.mxu0 %vm22379_vm3, %v26139_v42 }
0x1547   :  { %19774 = vmatprep.subr.bf16.mxu0 %v26139_v42 }
0x1549   :  { %19767 = vmatmul.mubr.f32.vlgmr.msra.gmra.mrb[66].mxu1 %v15595_v8 }
0x154a   :  { %19770 = vmatpush3.msra.mxu1 %v24888_v18  ;;  %19771 = vmatprep.mubr.msk.f32.mxu1 %vm22379_vm3, %v26139_v42  ;;  %v22164_v18 = vld [vmem:[%s25671_s13 + $0x30] sm:$0xff]  }
0x154b   :  { %19794 = vmatprep.subr.bf16.mxu1 %v26139_v42 }
0x154d   :  { %19742 = vmatmul.mubr.f32.vlgmr.msra.gmra.mrb[64].mxu0 %v15146_v0 }
0x154e   :  { %19775 = vmatpush3.bf16.msra.mxu0 %v22158_v15  ;;  %19790 = vmatprep.mubr.msk.bf16.mxu0 %vm22379_vm3, %v26139_v42 }
0x154f   :  { %19776 = vmatprep.subr.bf16.mxu0 %v26139_v42 }
0x1551   :  { %19772 = vmatmul.mubr.f32.vlgmr.msra.gmra.mrb[66].mxu1 %v15595_v8 }
0x1552   :  { %19777 = vmatpush3.bf16.msra.mxu0 %v22159_v43  ;;  %19796 = vmatprep.mubr.msk.bf16.mxu1 %vm22379_vm3, %v26139_v42 }
0x1553   :  { %19778 = vmatprep.subr.bf16.mxu0 %v26139_v42 }
0x1556   :  { %19779 = vmatpush3.bf16.msra.mxu0 %v22160_v21 }
0x1557   :  { %19780 = vmatprep.subr.bf16.mxu0 %v26139_v42 }
0x155a   :  { %19781 = vmatpush3.bf16.msra.mxu0 %v22161_v39 }
0x155b   :  { %19782 = vmatprep.subr.bf16.mxu0 %v26139_v42 }
0x155e   :  { %19783 = vmatpush3.bf16.msra.mxu0 %v22162_v14 }
0x155f   :  { %19784 = vmatprep.subr.bf16.mxu0 %v26139_v42 }
0x1562   :  { %19785 = vmatpush3.bf16.msra.mxu0 %v22163_v40 }
0x1563   :  { %19786 = vmatprep.subr.bf16.mxu0 %v26139_v42 }
0x1566   :  { %19787 = vmatpush3.bf16.msra.mxu0 %v22164_v18 }
0x1567   :  { %19788 = vmatprep.subr.bf16.mxu0 %v26139_v42  ;;  %v22166_v42 = vld [vmem:[#allocation13] sm:$0xff]  }
0x1568   :  { %19795 = vmatpush3.bf16.msra.mxu1 %v22166_v42 }
0x156a   :  { %19789 = vmatpush3.bf16.msra.mxu0 %v22165_v41 }
0x1620   :  { %v15522_v50 = vpop.f32.mrb[64].mxu0 }
0x1621   :  { %v15978_v47 = vrot.slane %v15522_v50, %v26147_v17  ;;  %v19743_v9 = vpop.f32.mrb[65].mxu0 }
0x1623   :  { %v15979_v55 = vmul.f32 %v15978_v47, %v25335_v31 }
0x1624   :  { %v15971_v36 = vpop.f32.mrb[66].mxu1 }
0x1625   :  { %v15983_v6 = vrot.slane %v15971_v36, %v26147_v17  ;;  %v19773_v61 = vpop.f32.mrb[67].mxu1  ;;  %v16296_v17 = vld [vmem:[%s25674_s16] ss:$0 sm:$0xff] }
0x1627   :  { %v15984_v49 = vadd.f32 %v15983_v6, %v15979_v55 }
0x1629   :  { %v15985_v45 = vmax.f32 %v15984_v49, 0.0 }
0x162b   :  { %v15986_v44 = vpack.c.bf16 %v15985_v45, %v15985_v45 }
0x162d   :  { %19791 = vmatmul.mubr.bf16.vlgmr.msra.gmra.mrb[68].mxu0 %v15986_v44 }
0x1700   :  { %v16092_v4 = vpop.f32.mrb[68].mxu0 }
0x1701   :  { %v16093_v10 = vadd.f32 %v16287_v13, %v16092_v4  ;;  %v19792_v35 = vpop.f32.mrb[69].mxu0 }
0x1702   :  { %v16095_v48 = vpop.f32.mrb[70].mxu0 }
0x1703   :  { %v16098_v59 = vmax.f32 %v16093_v10, 0.0  ;;  %v19793_v31 = vpop.f32.mrb[71].mxu0 }
0x1705   :  { %v16099_v62 = vpack.c.bf16 %v16098_v59, %v16098_v59 }
0x1707   :  { %19797 = vmatmul.mubr.msk.bf16.vlgmr.msra.gmra.mrb[68].mxu1 %vm16115_vm4, %v16099_v62 }
0x17da   :  { %v16153_v28 = vpop.f32.mrb[68].mxu1 }
0x17db   :  { %v16154_v30 = vadd.f32 %v16296_v17, %v16153_v28  ;;  %v19798_v7 = vpop.f32.mrb[69].mxu1 }
0x17dc   :  { %v16156_v58 = vpop.f32.mrb[70].mxu1 }
0x17dd   :  { %16159 = vst [vmem:[#allocation14] sm:$0xf] %v16154_v30  ;;  %v19799_v3 = vpop.f32.mrb[71].mxu1 }
0x17de   :  { %22344 = shalt.err (!%p22341_p4)
}
0x17df   :  { %s26160_s23 = sld [smem:[#allocation65_spill]] }
0x17e5   :  { %s22345_s16 = scalar_lea.hbm %s26160_s23, 64 }
0x17e6   :  { %p22346_p5 = scmp.ne.s32.totalorder %s26160_s23, %s22345_s16  ;;  %p22349_p6 = scmp.lt.u32.totalorder %s22345_s16, %s26160_s23 }
0x17e8   :  { %p22351_p7 = pnand %p22349_p6, %p22346_p5 }
0x17ea   :  { %22354 = shalt.err (!%p22351_p7)
}
0x17eb   :  { %16169 = dma.vmem_to_hbm [thread:$0]  %s16167_s18, 64, %s26160_s23, [#allocation4]  }
0x17ec   :  { %22363 = dma.done.wait [#allocation4], 64  }
0x17ed   :  { %22364 = vsyncadd [#allocation4], 4294967232 }
0x17ee   :  { %16173 = vsyncpa [#allocation3], 1 }
0x17ef   :  { %16174 = vsyncpa [#allocation6], 1 }
0x17f0   :  { %16175 = vsyncpa [#allocation9], 1 }
0x17f1   :  { %16176 = vsyncpa [#allocation12], 1 }
0x17f2   :  { %16177 = vsyncpa [#allocation4], 1 }

</bundles_post_ra>
